<compile_context>
chip_gen: v6e
topology: v6e:2x2x1
jax: 0.10.0
libtpu: 0.0.40
codegen_flags: <defaults>
</compile_context>

<pallas_src>
import functools
import math

import jax
import jax.numpy as jnp
from jax.experimental import pallas as pl
from jax.experimental.pallas import tpu as pltpu


def _round_up(v, m):
    return (v + m - 1) // m * m


def _gru_kernel(num_layers, hp, t_chunk, b_blk, *refs):
    """One (batch-block, time-chunk) grid step.

    refs: x (b_blk, t_chunk, Dp) bf16;
          per layer: wih (in_p, 3Hp) bf16, whh (Hp, 3Hp) bf16,
                     bih (1, 3Hp) f32,    bhh (1, 3Hp) f32;
          wfc (Hp, O) bf16, bfc (1, O) f32;
          out (b_blk, O) f32;
          scratch: gi (t_chunk, b_blk, 3Hp) f32  [time-major],
                   seq (t_chunk, b_blk, Hp) f32  [time-major],
                   h   (num_layers, b_blk, Hp) f32 [carried across chunks].
    """
    n_param = 4 * num_layers
    x_ref = refs[0]
    layer_refs = refs[1:1 + n_param]
    wfc_ref = refs[1 + n_param]
    bfc_ref = refs[2 + n_param]
    out_ref = refs[3 + n_param]
    gi_ref = refs[4 + n_param]
    seq_ref = refs[5 + n_param]
    h_ref = refs[6 + n_param]

    tc = pl.program_id(1)

    # Hidden states carried across time chunks in persistent scratch.
    @pl.when(tc == 0)
    def _init():
        h_ref[...] = jnp.zeros_like(h_ref)

    for l in range(num_layers):
        wih_ref = layer_refs[4 * l + 0]
        whh_ref = layer_refs[4 * l + 1]
        bih_ref = layer_refs[4 * l + 2]
        bhh_ref = layer_refs[4 * l + 3]

        # ---- hoisted input projection for the whole chunk (one big matmul,
        # ---- b_ih folded in once) ------------------------------------------
        if l == 0:
            # x arrives batch-major (b, t, Dp); project it all at once, then
            # scatter rows into the time-major gi scratch (cheap static row
            # copies instead of a wrapper-side transpose of x).
            xs = x_ref[...]                                         # bf16
            gi2d = jnp.dot(xs.reshape(b_blk * t_chunk, xs.shape[-1]),
                           wih_ref[...],
                           preferred_element_type=jnp.float32) + bih_ref[...]
            gi3 = gi2d.reshape(b_blk, t_chunk, 3 * hp)
            for t in range(t_chunk):
                gi_ref[t] = gi3[:, t, :]
        else:
            # Previous layer's chunk output is already time-major.
            src = seq_ref[...].astype(jnp.bfloat16)                 # (t, b, Hp)
            gi2d = jnp.dot(src.reshape(t_chunk * b_blk, hp), wih_ref[...],
                           preferred_element_type=jnp.float32) + bih_ref[...]
            gi_ref[...] = gi2d.reshape(t_chunk, b_blk, 3 * hp)

        # Pre-broadcast b_hh once per layer (not once per step).
        bhh_b = jnp.broadcast_to(bhh_ref[...], (b_blk, 3 * hp))

        last_layer = (l == num_layers - 1)

        # ---- serial recurrence over the chunk (fully unrolled, static
        # ---- leading-axis / lane-aligned slices) ---------------------------
        for t in range(t_chunk):
            h_prev = h_ref[l]                                       # (b, Hp) f32
            gh = jnp.dot(h_prev.astype(jnp.bfloat16), whh_ref[...],
                         preferred_element_type=jnp.float32) + bhh_b
            gi_t = gi_ref[t]                                        # (b, 3Hp) f32
            # Gate slabs live at Hp (=128k) offsets -> lane-aligned slices.
            r = jax.nn.sigmoid(gi_t[:, 0:hp] + gh[:, 0:hp])
            z = jax.nn.sigmoid(gi_t[:, hp:2 * hp] + gh[:, hp:2 * hp])
            n = jnp.tanh(gi_t[:, 2 * hp:3 * hp] + r * gh[:, 2 * hp:3 * hp])
            h_new = (1.0 - z) * n + z * h_prev
            h_ref[l] = h_new
            if not last_layer:
                seq_ref[t] = h_new      # input for the next layer (this chunk)

    # Final Linear on the last step of the last layer, only on the last chunk.
    @pl.when(tc == pl.num_programs(1) - 1)
    def _final():
        h_last = h_ref[num_layers - 1].astype(jnp.bfloat16)
        out_ref[...] = (jnp.dot(h_last, wfc_ref[...],
                                preferred_element_type=jnp.float32)
                        + bfc_ref[...])


def gru_forward(x, params, *, num_layers, hidden_dim, output_dim,
                b_blk=8, t_chunk=None):
    """x: (B, T, D) float32, PyTorch batch_first convention."""
    B, T, D = x.shape
    H = hidden_dim
    # Lane/sublane-aligned padding.  (For large H on v6e/v7x prefer rounding
    # Hp to 256 so each gate slab fills a full 256-wide MXU pass.)
    hp = _round_up(H, 128)
    dp = _round_up(D, 128)
    bp = _round_up(B, b_blk)
    if t_chunk is None:
        t_chunk = T if T <= 256 else 256
    assert T % t_chunk == 0 and (t_chunk % 8 == 0 or t_chunk == T), \
        "t_chunk must divide T and be a multiple of 8 (or equal T)"

    f32, bf16 = jnp.float32, jnp.bfloat16

    # batch_first kept as-is (no wrapper transpose); zero padding keeps the
    # padded lanes / batch rows inert through the recurrence.
    x_p = jnp.zeros((bp, T, dp), bf16).at[:B, :, :D].set(x.astype(bf16))

    def pad_w(w, in_p):                      # (3H, in) -> (in_p, 3*hp), bf16
        out = jnp.zeros((in_p, 3 * hp), bf16)
        for g in range(3):
            out = out.at[:w.shape[1], g * hp:g * hp + H].set(
                w[g * H:(g + 1) * H, :].T.astype(bf16))
        return out

    def pad_b(b):                            # (3H,) -> (1, 3*hp), f32
        out = jnp.zeros((1, 3 * hp), f32)
        for g in range(3):
            out = out.at[0, g * hp:g * hp + H].set(b[g * H:(g + 1) * H])
        return out

    flat_inputs = [x_p]
    for l in range(num_layers):
        w_ih, w_hh, b_ih, b_hh = params["layers"][l]
        in_p = dp if l == 0 else hp
        flat_inputs += [pad_w(w_ih, in_p), pad_w(w_hh, hp),
                        pad_b(b_ih), pad_b(b_hh)]
    wfc_p = jnp.zeros((hp, output_dim), bf16).at[:H, :].set(
        params["w_fc"].T.astype(bf16))
    bfc_p = params["b_fc"][None, :].astype(f32)
    flat_inputs += [wfc_p, bfc_p]

    grid = (bp // b_blk, T // t_chunk)

    def const_spec(a):
        return pl.BlockSpec(a.shape, lambda b, tcb: (0,) * a.ndim)

    in_specs = [pl.BlockSpec((b_blk, t_chunk, dp), lambda b, tcb: (b, tcb, 0))]
    in_specs += [const_spec(a) for a in flat_inputs[1:]]

    kernel = functools.partial(_gru_kernel, num_layers, hp, t_chunk, b_blk)
    out_p = pl.pallas_call(
        kernel,
        out_shape=jax.ShapeDtypeStruct((bp, output_dim), f32),
        grid_spec=pltpu.PrefetchScalarGridSpec(
            num_scalar_prefetch=0,
            grid=grid,
            in_specs=in_specs,
            out_specs=pl.BlockSpec((b_blk, output_dim), lambda b, tcb: (b, 0)),
            scratch_shapes=[
                pltpu.VMEM((t_chunk, b_blk, 3 * hp), f32),   # gi (per chunk)
                pltpu.VMEM((t_chunk, b_blk, hp), f32),       # layer output seq
                pltpu.VMEM((num_layers, b_blk, hp), f32),    # carried hidden
            ]),
        compiler_params=pltpu.CompilerParams(
            dimension_semantics=("parallel", "arbitrary")),
    )(*flat_inputs)
    return out_p[:B]


def gru_reference(x, params, *, num_layers, hidden_dim):
    """Pure-JAX f32 reference mirroring torch.nn.GRU(batch_first=True) + Linear."""
    B, T, _ = x.shape
    H = hidden_dim
    inp = x
    for l in range(num_layers):
        w_ih, w_hh, b_ih, b_hh = params["layers"][l]
        h = jnp.zeros((B, H), jnp.float32)
        outs = []
        for t in range(T):
            x_t = inp[:, t, :]
            gi = x_t @ w_ih.T + b_ih
            gh = h @ w_hh.T + b_hh
            r = jax.nn.sigmoid(gi[:, :H] + gh[:, :H])
            z = jax.nn.sigmoid(gi[:, H:2 * H] + gh[:, H:2 * H])
            n = jnp.tanh(gi[:, 2 * H:] + r * gh[:, 2 * H:])
            h = (1.0 - z) * n + z * h
            outs.append(h)
        inp = jnp.stack(outs, axis=1)
    return inp[:, -1, :] @ params["w_fc"].T + params["b_fc"]


def init_params(key, *, input_dim, hidden_dim, num_layers, output_dim):
    """Deterministic init matching PyTorch shapes (U(-1/sqrt(H), 1/sqrt(H)))."""
    k = 1.0 / math.sqrt(hidden_dim)
    layers = []
    for l in range(num_layers):
        in_l = input_dim if l == 0 else hidden_dim
        key, k1, k2, k3, k4 = jax.random.split(key, 5)
        layers.append((
            jax.random.uniform(k1, (3 * hidden_dim, in_l), jnp.float32, -k, k),
            jax.random.uniform(k2, (3 * hidden_dim, hidden_dim), jnp.float32, -k, k),
            jax.random.uniform(k3, (3 * hidden_dim,), jnp.float32, -k, k),
            jax.random.uniform(k4, (3 * hidden_dim,), jnp.float32, -k, k),
        ))
    key, k5, k6 = jax.random.split(key, 3)
    w_fc = jax.random.uniform(k5, (output_dim, hidden_dim), jnp.float32, -k, k)
    b_fc = jax.random.uniform(k6, (output_dim,), jnp.float32, -k, k)
    return {"layers": layers, "w_fc": w_fc, "b_fc": b_fc}


if __name__ == "__main__":
    B, T = 2, 16
    INPUT_DIM, HIDDEN_DIM, NUM_LAYERS, OUTPUT_DIM = 16, 32, 2, 4

    key = jax.random.PRNGKey(0)
    key, xk = jax.random.split(key)
    x = jax.random.normal(xk, (B, T, INPUT_DIM), jnp.float32)

    params = init_params(key, input_dim=INPUT_DIM, hidden_dim=HIDDEN_DIM,
                         num_layers=NUM_LAYERS, output_dim=OUTPUT_DIM)

    # t_chunk=8 -> 2 time chunks: exercises the pipelined/chunked path with
    # hidden state carried in persistent scratch across grid steps.
    out = gru_forward(x, params, num_layers=NUM_LAYERS, hidden_dim=HIDDEN_DIM,
                      output_dim=OUTPUT_DIM, t_chunk=8)
    out = jax.block_until_ready(out)

    ref = gru_reference(x, params, num_layers=NUM_LAYERS, hidden_dim=HIDDEN_DIM)
    assert out.shape == (B, OUTPUT_DIM)
    # bf16 MXU operands vs. f32 reference -> loosened tolerance.
    assert jnp.allclose(out, ref, rtol=5e-2, atol=5e-2), (out, ref)

    print("KERNEL_OK")
</pallas_src>

<mosaic_0001>
module attributes {stable_mosaic.version = 11 : i64} {
  func.func @_gru_kernel(%arg0: i32, %arg1: i32, %arg2: memref<8x8x128xbf16, #tpu.memory_space<vmem>>, %arg3: memref<128x384xbf16, #tpu.memory_space<vmem>>, %arg4: memref<128x384xbf16, #tpu.memory_space<vmem>>, %arg5: memref<1x384xf32, #tpu.memory_space<vmem>>, %arg6: memref<1x384xf32, #tpu.memory_space<vmem>>, %arg7: memref<128x384xbf16, #tpu.memory_space<vmem>>, %arg8: memref<128x384xbf16, #tpu.memory_space<vmem>>, %arg9: memref<1x384xf32, #tpu.memory_space<vmem>>, %arg10: memref<1x384xf32, #tpu.memory_space<vmem>>, %arg11: memref<128x4xbf16, #tpu.memory_space<vmem>>, %arg12: memref<1x4xf32, #tpu.memory_space<vmem>>, %arg13: memref<8x4xf32, #tpu.memory_space<vmem>>, %arg14: memref<8x8x384xf32, #tpu.memory_space<vmem>>, %arg15: memref<8x8x128xf32, #tpu.memory_space<vmem>>, %arg16: memref<2x8x128xf32, #tpu.memory_space<vmem>>) attributes {dimension_semantics = [#tpu.dimension_semantics<parallel>, #tpu.dimension_semantics<arbitrary>], iteration_bounds = array<i64: 1, 2>, scalar_prefetch = 0 : i64, scratch_operands = 3 : i64, tpu.core_type = #tpu.core_type<tc>, window_params = [{transform_indices = @transform_0, window_bounds = array<i64: 8, 8, 128>}, {pipeline_mode = #tpu.pipeline_mode<synchronous>, transform_indices = @transform_1, window_bounds = array<i64: 128, 384>}, {pipeline_mode = #tpu.pipeline_mode<synchronous>, transform_indices = @transform_2, window_bounds = array<i64: 128, 384>}, {pipeline_mode = #tpu.pipeline_mode<synchronous>, transform_indices = @transform_3, window_bounds = array<i64: 1, 384>}, {pipeline_mode = #tpu.pipeline_mode<synchronous>, transform_indices = @transform_4, window_bounds = array<i64: 1, 384>}, {pipeline_mode = #tpu.pipeline_mode<synchronous>, transform_indices = @transform_5, window_bounds = array<i64: 128, 384>}, {pipeline_mode = #tpu.pipeline_mode<synchronous>, transform_indices = @transform_6, window_bounds = array<i64: 128, 384>}, {pipeline_mode = #tpu.pipeline_mode<synchronous>, transform_indices = @transform_7, window_bounds = array<i64: 1, 384>}, {pipeline_mode = #tpu.pipeline_mode<synchronous>, transform_indices = @transform_8, window_bounds = array<i64: 1, 384>}, {pipeline_mode = #tpu.pipeline_mode<synchronous>, transform_indices = @transform_9, window_bounds = array<i64: 128, 4>}, {pipeline_mode = #tpu.pipeline_mode<synchronous>, transform_indices = @transform_10, window_bounds = array<i64: 1, 4>}, {transform_indices = @transform_11, window_bounds = array<i64: 8, 4>}]} {
    %c0_i32 = arith.constant 0 : i32
    %0 = arith.cmpi eq, %arg1, %c0_i32 : i32
    %1 = arith.extui %0 : i1 to i32
    %c0_i32_0 = arith.constant 0 : i32
    %2 = arith.cmpi ne, %1, %c0_i32_0 : i32
    scf.if %2 {
      %cst_304 = arith.constant 0.000000e+00 : f32
      %686 = vector.broadcast %cst_304 : f32 to vector<2x8x128xf32>
      %c0_305 = arith.constant 0 : index
      %c0_306 = arith.constant 0 : index
      %c0_307 = arith.constant 0 : index
      %687 = vector.load %arg16[%c0_305, %c0_306, %c0_307] : memref<2x8x128xf32, #tpu.memory_space<vmem>>, vector<2x8x128xf32>
      tpu.vector_store %arg16[%c0_305, %c0_306, %c0_307], %686 {strides = array<i32>} : memref<2x8x128xf32, #tpu.memory_space<vmem>>, vector<2x8x128xf32>,
    } else {
    }
    %c0 = arith.constant 0 : index
    %c0_1 = arith.constant 0 : index
    %c0_2 = arith.constant 0 : index
    %3 = vector.load %arg2[%c0, %c0_1, %c0_2] : memref<8x8x128xbf16, #tpu.memory_space<vmem>>, vector<8x8x128xbf16>
    %4 = vector.shape_cast %3 : vector<8x8x128xbf16> to vector<64x128xbf16>
    %c0_3 = arith.constant 0 : index
    %c0_4 = arith.constant 0 : index
    %5 = vector.load %arg3[%c0_3, %c0_4] : memref<128x384xbf16, #tpu.memory_space<vmem>>, vector<128x384xbf16>
    %cst = arith.constant dense<0.000000e+00> : vector<64x384xf32>
    %6 = tpu.matmul %4, %5, %cst {dimension_numbers = #tpu.dot_dimension_numbers<[1], [0], [0], [1], [0, 0, 1, 1], [], []>} : vector<64x128xbf16>, vector<128x384xbf16>, vector<64x384xf32> -> vector<64x384xf32>
    %c0_5 = arith.constant 0 : index
    %c0_6 = arith.constant 0 : index
    %7 = vector.load %arg5[%c0_5, %c0_6] : memref<1x384xf32, #tpu.memory_space<vmem>>, vector<1x384xf32>
    %8 = vector.broadcast %7 : vector<1x384xf32> to vector<64x384xf32>
    %9 = arith.addf %6, %8 : vector<64x384xf32>
    %10 = vector.shape_cast %9 : vector<64x384xf32> to vector<8x8x384xf32>
    %11 = vector.extract_strided_slice %10 {offsets = [0, 0, 0], sizes = [8, 1, 384], strides = [1, 1, 1]} : vector<8x8x384xf32> to vector<8x1x384xf32>
    %12 = vector.shape_cast %11 : vector<8x1x384xf32> to vector<8x384xf32>
    %c0_7 = arith.constant 0 : index
    %c0_8 = arith.constant 0 : index
    %c0_9 = arith.constant 0 : index
    %13 = vector.load %arg14[%c0_7, %c0_8, %c0_9] : memref<8x8x384xf32, #tpu.memory_space<vmem>>, vector<1x8x384xf32>
    %14 = vector.shape_cast %13 : vector<1x8x384xf32> to vector<8x384xf32>
    %15 = vector.shape_cast %12 : vector<8x384xf32> to vector<1x8x384xf32>
    tpu.vector_store %arg14[%c0_7, %c0_8, %c0_9], %15 {strides = array<i32>} : memref<8x8x384xf32, #tpu.memory_space<vmem>>, vector<1x8x384xf32>,
    %16 = vector.extract_strided_slice %10 {offsets = [0, 1, 0], sizes = [8, 1, 384], strides = [1, 1, 1]} : vector<8x8x384xf32> to vector<8x1x384xf32>
    %17 = vector.shape_cast %16 : vector<8x1x384xf32> to vector<8x384xf32>
    %c1 = arith.constant 1 : index
    %c0_10 = arith.constant 0 : index
    %c0_11 = arith.constant 0 : index
    %18 = vector.load %arg14[%c1, %c0_10, %c0_11] : memref<8x8x384xf32, #tpu.memory_space<vmem>>, vector<1x8x384xf32>
    %19 = vector.shape_cast %18 : vector<1x8x384xf32> to vector<8x384xf32>
    %20 = vector.shape_cast %17 : vector<8x384xf32> to vector<1x8x384xf32>
    tpu.vector_store %arg14[%c1, %c0_10, %c0_11], %20 {strides = array<i32>} : memref<8x8x384xf32, #tpu.memory_space<vmem>>, vector<1x8x384xf32>,
    %21 = vector.extract_strided_slice %10 {offsets = [0, 2, 0], sizes = [8, 1, 384], strides = [1, 1, 1]} : vector<8x8x384xf32> to vector<8x1x384xf32>
    %22 = vector.shape_cast %21 : vector<8x1x384xf32> to vector<8x384xf32>
    %c2 = arith.constant 2 : index
    %c0_12 = arith.constant 0 : index
    %c0_13 = arith.constant 0 : index
    %23 = vector.load %arg14[%c2, %c0_12, %c0_13] : memref<8x8x384xf32, #tpu.memory_space<vmem>>, vector<1x8x384xf32>
    %24 = vector.shape_cast %23 : vector<1x8x384xf32> to vector<8x384xf32>
    %25 = vector.shape_cast %22 : vector<8x384xf32> to vector<1x8x384xf32>
    tpu.vector_store %arg14[%c2, %c0_12, %c0_13], %25 {strides = array<i32>} : memref<8x8x384xf32, #tpu.memory_space<vmem>>, vector<1x8x384xf32>,
    %26 = vector.extract_strided_slice %10 {offsets = [0, 3, 0], sizes = [8, 1, 384], strides = [1, 1, 1]} : vector<8x8x384xf32> to vector<8x1x384xf32>
    %27 = vector.shape_cast %26 : vector<8x1x384xf32> to vector<8x384xf32>
    %c3 = arith.constant 3 : index
    %c0_14 = arith.constant 0 : index
    %c0_15 = arith.constant 0 : index
    %28 = vector.load %arg14[%c3, %c0_14, %c0_15] : memref<8x8x384xf32, #tpu.memory_space<vmem>>, vector<1x8x384xf32>
    %29 = vector.shape_cast %28 : vector<1x8x384xf32> to vector<8x384xf32>
    %30 = vector.shape_cast %27 : vector<8x384xf32> to vector<1x8x384xf32>
    tpu.vector_store %arg14[%c3, %c0_14, %c0_15], %30 {strides = array<i32>} : memref<8x8x384xf32, #tpu.memory_space<vmem>>, vector<1x8x384xf32>,
    %31 = vector.extract_strided_slice %10 {offsets = [0, 4, 0], sizes = [8, 1, 384], strides = [1, 1, 1]} : vector<8x8x384xf32> to vector<8x1x384xf32>
    %32 = vector.shape_cast %31 : vector<8x1x384xf32> to vector<8x384xf32>
    %c4 = arith.constant 4 : index
    %c0_16 = arith.constant 0 : index
    %c0_17 = arith.constant 0 : index
    %33 = vector.load %arg14[%c4, %c0_16, %c0_17] : memref<8x8x384xf32, #tpu.memory_space<vmem>>, vector<1x8x384xf32>
    %34 = vector.shape_cast %33 : vector<1x8x384xf32> to vector<8x384xf32>
    %35 = vector.shape_cast %32 : vector<8x384xf32> to vector<1x8x384xf32>
    tpu.vector_store %arg14[%c4, %c0_16, %c0_17], %35 {strides = array<i32>} : memref<8x8x384xf32, #tpu.memory_space<vmem>>, vector<1x8x384xf32>,
    %36 = vector.extract_strided_slice %10 {offsets = [0, 5, 0], sizes = [8, 1, 384], strides = [1, 1, 1]} : vector<8x8x384xf32> to vector<8x1x384xf32>
    %37 = vector.shape_cast %36 : vector<8x1x384xf32> to vector<8x384xf32>
    %c5 = arith.constant 5 : index
    %c0_18 = arith.constant 0 : index
    %c0_19 = arith.constant 0 : index
    %38 = vector.load %arg14[%c5, %c0_18, %c0_19] : memref<8x8x384xf32, #tpu.memory_space<vmem>>, vector<1x8x384xf32>
    %39 = vector.shape_cast %38 : vector<1x8x384xf32> to vector<8x384xf32>
    %40 = vector.shape_cast %37 : vector<8x384xf32> to vector<1x8x384xf32>
    tpu.vector_store %arg14[%c5, %c0_18, %c0_19], %40 {strides = array<i32>} : memref<8x8x384xf32, #tpu.memory_space<vmem>>, vector<1x8x384xf32>,
    %41 = vector.extract_strided_slice %10 {offsets = [0, 6, 0], sizes = [8, 1, 384], strides = [1, 1, 1]} : vector<8x8x384xf32> to vector<8x1x384xf32>
    %42 = vector.shape_cast %41 : vector<8x1x384xf32> to vector<8x384xf32>
    %c6 = arith.constant 6 : index
    %c0_20 = arith.constant 0 : index
    %c0_21 = arith.constant 0 : index
    %43 = vector.load %arg14[%c6, %c0_20, %c0_21] : memref<8x8x384xf32, #tpu.memory_space<vmem>>, vector<1x8x384xf32>
    %44 = vector.shape_cast %43 : vector<1x8x384xf32> to vector<8x384xf32>
    %45 = vector.shape_cast %42 : vector<8x384xf32> to vector<1x8x384xf32>
    tpu.vector_store %arg14[%c6, %c0_20, %c0_21], %45 {strides = array<i32>} : memref<8x8x384xf32, #tpu.memory_space<vmem>>, vector<1x8x384xf32>,
    %46 = vector.extract_strided_slice %10 {offsets = [0, 7, 0], sizes = [8, 1, 384], strides = [1, 1, 1]} : vector<8x8x384xf32> to vector<8x1x384xf32>
    %47 = vector.shape_cast %46 : vector<8x1x384xf32> to vector<8x384xf32>
    %c7 = arith.constant 7 : index
    %c0_22 = arith.constant 0 : index
    %c0_23 = arith.constant 0 : index
    %48 = vector.load %arg14[%c7, %c0_22, %c0_23] : memref<8x8x384xf32, #tpu.memory_space<vmem>>, vector<1x8x384xf32>
    %49 = vector.shape_cast %48 : vector<1x8x384xf32> to vector<8x384xf32>
    %50 = vector.shape_cast %47 : vector<8x384xf32> to vector<1x8x384xf32>
    tpu.vector_store %arg14[%c7, %c0_22, %c0_23], %50 {strides = array<i32>} : memref<8x8x384xf32, #tpu.memory_space<vmem>>, vector<1x8x384xf32>,
    %c0_24 = arith.constant 0 : index
    %c0_25 = arith.constant 0 : index
    %51 = vector.load %arg6[%c0_24, %c0_25] : memref<1x384xf32, #tpu.memory_space<vmem>>, vector<1x384xf32>
    %52 = vector.shape_cast %51 : vector<1x384xf32> to vector<1x384xf32>
    %53 = vector.broadcast %52 : vector<1x384xf32> to vector<8x384xf32>
    %c0_26 = arith.constant 0 : index
    %c0_27 = arith.constant 0 : index
    %c0_28 = arith.constant 0 : index
    %54 = vector.load %arg16[%c0_26, %c0_27, %c0_28] : memref<2x8x128xf32, #tpu.memory_space<vmem>>, vector<1x8x128xf32>
    %55 = vector.shape_cast %54 : vector<1x8x128xf32> to vector<8x128xf32>
    %56 = arith.truncf %55 : vector<8x128xf32> to vector<8x128xbf16>
    %c0_29 = arith.constant 0 : index
    %c0_30 = arith.constant 0 : index
    %57 = vector.load %arg4[%c0_29, %c0_30] : memref<128x384xbf16, #tpu.memory_space<vmem>>, vector<128x384xbf16>
    %cst_31 = arith.constant dense<0.000000e+00> : vector<8x384xf32>
    %58 = tpu.matmul %56, %57, %cst_31 {dimension_numbers = #tpu.dot_dimension_numbers<[1], [0], [0], [1], [0, 0, 1, 1], [], []>} : vector<8x128xbf16>, vector<128x384xbf16>, vector<8x384xf32> -> vector<8x384xf32>
    %59 = arith.addf %58, %53 : vector<8x384xf32>
    %c0_32 = arith.constant 0 : index
    %c0_33 = arith.constant 0 : index
    %c0_34 = arith.constant 0 : index
    %60 = vector.load %arg14[%c0_32, %c0_33, %c0_34] : memref<8x8x384xf32, #tpu.memory_space<vmem>>, vector<1x8x384xf32>
    %61 = vector.shape_cast %60 : vector<1x8x384xf32> to vector<8x384xf32>
    %62 = vector.extract_strided_slice %61 {offsets = [0, 0], sizes = [8, 128], strides = [1, 1]} : vector<8x384xf32> to vector<8x128xf32>
    %63 = vector.extract_strided_slice %59 {offsets = [0, 0], sizes = [8, 128], strides = [1, 1]} : vector<8x384xf32> to vector<8x128xf32>
    %64 = arith.addf %62, %63 : vector<8x128xf32>
    %65 = arith.negf %64 : vector<8x128xf32>
    %66 = math.exp %65 : vector<8x128xf32>
    %cst_35 = arith.constant 1.000000e+00 : f32
    %67 = vector.broadcast %cst_35 : f32 to vector<8x128xf32>
    %68 = arith.addf %67, %66 : vector<8x128xf32>
    %69 = arith.divf %67, %68 : vector<8x128xf32>
    %70 = vector.extract_strided_slice %61 {offsets = [0, 128], sizes = [8, 128], strides = [1, 1]} : vector<8x384xf32> to vector<8x128xf32>
    %71 = vector.extract_strided_slice %59 {offsets = [0, 128], sizes = [8, 128], strides = [1, 1]} : vector<8x384xf32> to vector<8x128xf32>
    %72 = arith.addf %70, %71 : vector<8x128xf32>
    %73 = arith.negf %72 : vector<8x128xf32>
    %74 = math.exp %73 : vector<8x128xf32>
    %cst_36 = arith.constant 1.000000e+00 : f32
    %75 = vector.broadcast %cst_36 : f32 to vector<8x128xf32>
    %76 = arith.addf %75, %74 : vector<8x128xf32>
    %77 = arith.divf %75, %76 : vector<8x128xf32>
    %78 = vector.extract_strided_slice %61 {offsets = [0, 256], sizes = [8, 128], strides = [1, 1]} : vector<8x384xf32> to vector<8x128xf32>
    %79 = vector.extract_strided_slice %59 {offsets = [0, 256], sizes = [8, 128], strides = [1, 1]} : vector<8x384xf32> to vector<8x128xf32>
    %80 = arith.mulf %69, %79 : vector<8x128xf32>
    %81 = arith.addf %78, %80 : vector<8x128xf32>
    %82 = math.tanh %81 : vector<8x128xf32>
    %cst_37 = arith.constant 1.000000e+00 : f32
    %83 = vector.broadcast %cst_37 : f32 to vector<8x128xf32>
    %84 = arith.subf %83, %77 : vector<8x128xf32>
    %85 = arith.mulf %84, %82 : vector<8x128xf32>
    %86 = arith.mulf %77, %55 : vector<8x128xf32>
    %87 = arith.addf %85, %86 : vector<8x128xf32>
    %c0_38 = arith.constant 0 : index
    %c0_39 = arith.constant 0 : index
    %c0_40 = arith.constant 0 : index
    %88 = vector.load %arg16[%c0_38, %c0_39, %c0_40] : memref<2x8x128xf32, #tpu.memory_space<vmem>>, vector<1x8x128xf32>
    %89 = vector.shape_cast %88 : vector<1x8x128xf32> to vector<8x128xf32>
    %90 = vector.shape_cast %87 : vector<8x128xf32> to vector<1x8x128xf32>
    tpu.vector_store %arg16[%c0_38, %c0_39, %c0_40], %90 {strides = array<i32>} : memref<2x8x128xf32, #tpu.memory_space<vmem>>, vector<1x8x128xf32>,
    %c0_41 = arith.constant 0 : index
    %c0_42 = arith.constant 0 : index
    %c0_43 = arith.constant 0 : index
    %91 = vector.load %arg15[%c0_41, %c0_42, %c0_43] : memref<8x8x128xf32, #tpu.memory_space<vmem>>, vector<1x8x128xf32>
    %92 = vector.shape_cast %91 : vector<1x8x128xf32> to vector<8x128xf32>
    %93 = vector.shape_cast %87 : vector<8x128xf32> to vector<1x8x128xf32>
    tpu.vector_store %arg15[%c0_41, %c0_42, %c0_43], %93 {strides = array<i32>} : memref<8x8x128xf32, #tpu.memory_space<vmem>>, vector<1x8x128xf32>,
    %c0_44 = arith.constant 0 : index
    %c0_45 = arith.constant 0 : index
    %c0_46 = arith.constant 0 : index
    %94 = vector.load %arg16[%c0_44, %c0_45, %c0_46] : memref<2x8x128xf32, #tpu.memory_space<vmem>>, vector<1x8x128xf32>
    %95 = vector.shape_cast %94 : vector<1x8x128xf32> to vector<8x128xf32>
    %96 = arith.truncf %95 : vector<8x128xf32> to vector<8x128xbf16>
    %c0_47 = arith.constant 0 : index
    %c0_48 = arith.constant 0 : index
    %97 = vector.load %arg4[%c0_47, %c0_48] : memref<128x384xbf16, #tpu.memory_space<vmem>>, vector<128x384xbf16>
    %cst_49 = arith.constant dense<0.000000e+00> : vector<8x384xf32>
    %98 = tpu.matmul %96, %97, %cst_49 {dimension_numbers = #tpu.dot_dimension_numbers<[1], [0], [0], [1], [0, 0, 1, 1], [], []>} : vector<8x128xbf16>, vector<128x384xbf16>, vector<8x384xf32> -> vector<8x384xf32>
    %99 = arith.addf %98, %53 : vector<8x384xf32>
    %c1_50 = arith.constant 1 : index
    %c0_51 = arith.constant 0 : index
    %c0_52 = arith.constant 0 : index
    %100 = vector.load %arg14[%c1_50, %c0_51, %c0_52] : memref<8x8x384xf32, #tpu.memory_space<vmem>>, vector<1x8x384xf32>
    %101 = vector.shape_cast %100 : vector<1x8x384xf32> to vector<8x384xf32>
    %102 = vector.extract_strided_slice %101 {offsets = [0, 0], sizes = [8, 128], strides = [1, 1]} : vector<8x384xf32> to vector<8x128xf32>
    %103 = vector.extract_strided_slice %99 {offsets = [0, 0], sizes = [8, 128], strides = [1, 1]} : vector<8x384xf32> to vector<8x128xf32>
    %104 = arith.addf %102, %103 : vector<8x128xf32>
    %105 = arith.negf %104 : vector<8x128xf32>
    %106 = math.exp %105 : vector<8x128xf32>
    %cst_53 = arith.constant 1.000000e+00 : f32
    %107 = vector.broadcast %cst_53 : f32 to vector<8x128xf32>
    %108 = arith.addf %107, %106 : vector<8x128xf32>
    %109 = arith.divf %107, %108 : vector<8x128xf32>
    %110 = vector.extract_strided_slice %101 {offsets = [0, 128], sizes = [8, 128], strides = [1, 1]} : vector<8x384xf32> to vector<8x128xf32>
    %111 = vector.extract_strided_slice %99 {offsets = [0, 128], sizes = [8, 128], strides = [1, 1]} : vector<8x384xf32> to vector<8x128xf32>
    %112 = arith.addf %110, %111 : vector<8x128xf32>
    %113 = arith.negf %112 : vector<8x128xf32>
    %114 = math.exp %113 : vector<8x128xf32>
    %cst_54 = arith.constant 1.000000e+00 : f32
    %115 = vector.broadcast %cst_54 : f32 to vector<8x128xf32>
    %116 = arith.addf %115, %114 : vector<8x128xf32>
    %117 = arith.divf %115, %116 : vector<8x128xf32>
    %118 = vector.extract_strided_slice %101 {offsets = [0, 256], sizes = [8, 128], strides = [1, 1]} : vector<8x384xf32> to vector<8x128xf32>
    %119 = vector.extract_strided_slice %99 {offsets = [0, 256], sizes = [8, 128], strides = [1, 1]} : vector<8x384xf32> to vector<8x128xf32>
    %120 = arith.mulf %109, %119 : vector<8x128xf32>
    %121 = arith.addf %118, %120 : vector<8x128xf32>
    %122 = math.tanh %121 : vector<8x128xf32>
    %cst_55 = arith.constant 1.000000e+00 : f32
    %123 = vector.broadcast %cst_55 : f32 to vector<8x128xf32>
    %124 = arith.subf %123, %117 : vector<8x128xf32>
    %125 = arith.mulf %124, %122 : vector<8x128xf32>
    %126 = arith.mulf %117, %95 : vector<8x128xf32>
    %127 = arith.addf %125, %126 : vector<8x128xf32>
    %c0_56 = arith.constant 0 : index
    %c0_57 = arith.constant 0 : index
    %c0_58 = arith.constant 0 : index
    %128 = vector.load %arg16[%c0_56, %c0_57, %c0_58] : memref<2x8x128xf32, #tpu.memory_space<vmem>>, vector<1x8x128xf32>
    %129 = vector.shape_cast %128 : vector<1x8x128xf32> to vector<8x128xf32>
    %130 = vector.shape_cast %127 : vector<8x128xf32> to vector<1x8x128xf32>
    tpu.vector_store %arg16[%c0_56, %c0_57, %c0_58], %130 {strides = array<i32>} : memref<2x8x128xf32, #tpu.memory_space<vmem>>, vector<1x8x128xf32>,
    %c1_59 = arith.constant 1 : index
    %c0_60 = arith.constant 0 : index
    %c0_61 = arith.constant 0 : index
    %131 = vector.load %arg15[%c1_59, %c0_60, %c0_61] : memref<8x8x128xf32, #tpu.memory_space<vmem>>, vector<1x8x128xf32>
    %132 = vector.shape_cast %131 : vector<1x8x128xf32> to vector<8x128xf32>
    %133 = vector.shape_cast %127 : vector<8x128xf32> to vector<1x8x128xf32>
    tpu.vector_store %arg15[%c1_59, %c0_60, %c0_61], %133 {strides = array<i32>} : memref<8x8x128xf32, #tpu.memory_space<vmem>>, vector<1x8x128xf32>,
    %c0_62 = arith.constant 0 : index
    %c0_63 = arith.constant 0 : index
    %c0_64 = arith.constant 0 : index
    %134 = vector.load %arg16[%c0_62, %c0_63, %c0_64] : memref<2x8x128xf32, #tpu.memory_space<vmem>>, vector<1x8x128xf32>
    %135 = vector.shape_cast %134 : vector<1x8x128xf32> to vector<8x128xf32>
    %136 = arith.truncf %135 : vector<8x128xf32> to vector<8x128xbf16>
    %c0_65 = arith.constant 0 : index
    %c0_66 = arith.constant 0 : index
    %137 = vector.load %arg4[%c0_65, %c0_66] : memref<128x384xbf16, #tpu.memory_space<vmem>>, vector<128x384xbf16>
    %cst_67 = arith.constant dense<0.000000e+00> : vector<8x384xf32>
    %138 = tpu.matmul %136, %137, %cst_67 {dimension_numbers = #tpu.dot_dimension_numbers<[1], [0], [0], [1], [0, 0, 1, 1], [], []>} : vector<8x128xbf16>, vector<128x384xbf16>, vector<8x384xf32> -> vector<8x384xf32>
    %139 = arith.addf %138, %53 : vector<8x384xf32>
    %c2_68 = arith.constant 2 : index
    %c0_69 = arith.constant 0 : index
    %c0_70 = arith.constant 0 : index
    %140 = vector.load %arg14[%c2_68, %c0_69, %c0_70] : memref<8x8x384xf32, #tpu.memory_space<vmem>>, vector<1x8x384xf32>
    %141 = vector.shape_cast %140 : vector<1x8x384xf32> to vector<8x384xf32>
    %142 = vector.extract_strided_slice %141 {offsets = [0, 0], sizes = [8, 128], strides = [1, 1]} : vector<8x384xf32> to vector<8x128xf32>
    %143 = vector.extract_strided_slice %139 {offsets = [0, 0], sizes = [8, 128], strides = [1, 1]} : vector<8x384xf32> to vector<8x128xf32>
    %144 = arith.addf %142, %143 : vector<8x128xf32>
    %145 = arith.negf %144 : vector<8x128xf32>
    %146 = math.exp %145 : vector<8x128xf32>
    %cst_71 = arith.constant 1.000000e+00 : f32
    %147 = vector.broadcast %cst_71 : f32 to vector<8x128xf32>
    %148 = arith.addf %147, %146 : vector<8x128xf32>
    %149 = arith.divf %147, %148 : vector<8x128xf32>
    %150 = vector.extract_strided_slice %141 {offsets = [0, 128], sizes = [8, 128], strides = [1, 1]} : vector<8x384xf32> to vector<8x128xf32>
    %151 = vector.extract_strided_slice %139 {offsets = [0, 128], sizes = [8, 128], strides = [1, 1]} : vector<8x384xf32> to vector<8x128xf32>
    %152 = arith.addf %150, %151 : vector<8x128xf32>
    %153 = arith.negf %152 : vector<8x128xf32>
    %154 = math.exp %153 : vector<8x128xf32>
    %cst_72 = arith.constant 1.000000e+00 : f32
    %155 = vector.broadcast %cst_72 : f32 to vector<8x128xf32>
    %156 = arith.addf %155, %154 : vector<8x128xf32>
    %157 = arith.divf %155, %156 : vector<8x128xf32>
    %158 = vector.extract_strided_slice %141 {offsets = [0, 256], sizes = [8, 128], strides = [1, 1]} : vector<8x384xf32> to vector<8x128xf32>
    %159 = vector.extract_strided_slice %139 {offsets = [0, 256], sizes = [8, 128], strides = [1, 1]} : vector<8x384xf32> to vector<8x128xf32>
    %160 = arith.mulf %149, %159 : vector<8x128xf32>
    %161 = arith.addf %158, %160 : vector<8x128xf32>
    %162 = math.tanh %161 : vector<8x128xf32>
    %cst_73 = arith.constant 1.000000e+00 : f32
    %163 = vector.broadcast %cst_73 : f32 to vector<8x128xf32>
    %164 = arith.subf %163, %157 : vector<8x128xf32>
    %165 = arith.mulf %164, %162 : vector<8x128xf32>
    %166 = arith.mulf %157, %135 : vector<8x128xf32>
    %167 = arith.addf %165, %166 : vector<8x128xf32>
    %c0_74 = arith.constant 0 : index
    %c0_75 = arith.constant 0 : index
    %c0_76 = arith.constant 0 : index
    %168 = vector.load %arg16[%c0_74, %c0_75, %c0_76] : memref<2x8x128xf32, #tpu.memory_space<vmem>>, vector<1x8x128xf32>
    %169 = vector.shape_cast %168 : vector<1x8x128xf32> to vector<8x128xf32>
    %170 = vector.shape_cast %167 : vector<8x128xf32> to vector<1x8x128xf32>
    tpu.vector_store %arg16[%c0_74, %c0_75, %c0_76], %170 {strides = array<i32>} : memref<2x8x128xf32, #tpu.memory_space<vmem>>, vector<1x8x128xf32>,
    %c2_77 = arith.constant 2 : index
    %c0_78 = arith.constant 0 : index
    %c0_79 = arith.constant 0 : index
    %171 = vector.load %arg15[%c2_77, %c0_78, %c0_79] : memref<8x8x128xf32, #tpu.memory_space<vmem>>, vector<1x8x128xf32>
    %172 = vector.shape_cast %171 : vector<1x8x128xf32> to vector<8x128xf32>
    %173 = vector.shape_cast %167 : vector<8x128xf32> to vector<1x8x128xf32>
    tpu.vector_store %arg15[%c2_77, %c0_78, %c0_79], %173 {strides = array<i32>} : memref<8x8x128xf32, #tpu.memory_space<vmem>>, vector<1x8x128xf32>,
    %c0_80 = arith.constant 0 : index
    %c0_81 = arith.constant 0 : index
    %c0_82 = arith.constant 0 : index
    %174 = vector.load %arg16[%c0_80, %c0_81, %c0_82] : memref<2x8x128xf32, #tpu.memory_space<vmem>>, vector<1x8x128xf32>
    %175 = vector.shape_cast %174 : vector<1x8x128xf32> to vector<8x128xf32>
    %176 = arith.truncf %175 : vector<8x128xf32> to vector<8x128xbf16>
    %c0_83 = arith.constant 0 : index
    %c0_84 = arith.constant 0 : index
    %177 = vector.load %arg4[%c0_83, %c0_84] : memref<128x384xbf16, #tpu.memory_space<vmem>>, vector<128x384xbf16>
    %cst_85 = arith.constant dense<0.000000e+00> : vector<8x384xf32>
    %178 = tpu.matmul %176, %177, %cst_85 {dimension_numbers = #tpu.dot_dimension_numbers<[1], [0], [0], [1], [0, 0, 1, 1], [], []>} : vector<8x128xbf16>, vector<128x384xbf16>, vector<8x384xf32> -> vector<8x384xf32>
    %179 = arith.addf %178, %53 : vector<8x384xf32>
    %c3_86 = arith.constant 3 : index
    %c0_87 = arith.constant 0 : index
    %c0_88 = arith.constant 0 : index
    %180 = vector.load %arg14[%c3_86, %c0_87, %c0_88] : memref<8x8x384xf32, #tpu.memory_space<vmem>>, vector<1x8x384xf32>
    %181 = vector.shape_cast %180 : vector<1x8x384xf32> to vector<8x384xf32>
    %182 = vector.extract_strided_slice %181 {offsets = [0, 0], sizes = [8, 128], strides = [1, 1]} : vector<8x384xf32> to vector<8x128xf32>
    %183 = vector.extract_strided_slice %179 {offsets = [0, 0], sizes = [8, 128], strides = [1, 1]} : vector<8x384xf32> to vector<8x128xf32>
    %184 = arith.addf %182, %183 : vector<8x128xf32>
    %185 = arith.negf %184 : vector<8x128xf32>
    %186 = math.exp %185 : vector<8x128xf32>
    %cst_89 = arith.constant 1.000000e+00 : f32
    %187 = vector.broadcast %cst_89 : f32 to vector<8x128xf32>
    %188 = arith.addf %187, %186 : vector<8x128xf32>
    %189 = arith.divf %187, %188 : vector<8x128xf32>
    %190 = vector.extract_strided_slice %181 {offsets = [0, 128], sizes = [8, 128], strides = [1, 1]} : vector<8x384xf32> to vector<8x128xf32>
    %191 = vector.extract_strided_slice %179 {offsets = [0, 128], sizes = [8, 128], strides = [1, 1]} : vector<8x384xf32> to vector<8x128xf32>
    %192 = arith.addf %190, %191 : vector<8x128xf32>
    %193 = arith.negf %192 : vector<8x128xf32>
    %194 = math.exp %193 : vector<8x128xf32>
    %cst_90 = arith.constant 1.000000e+00 : f32
    %195 = vector.broadcast %cst_90 : f32 to vector<8x128xf32>
    %196 = arith.addf %195, %194 : vector<8x128xf32>
    %197 = arith.divf %195, %196 : vector<8x128xf32>
    %198 = vector.extract_strided_slice %181 {offsets = [0, 256], sizes = [8, 128], strides = [1, 1]} : vector<8x384xf32> to vector<8x128xf32>
    %199 = vector.extract_strided_slice %179 {offsets = [0, 256], sizes = [8, 128], strides = [1, 1]} : vector<8x384xf32> to vector<8x128xf32>
    %200 = arith.mulf %189, %199 : vector<8x128xf32>
    %201 = arith.addf %198, %200 : vector<8x128xf32>
    %202 = math.tanh %201 : vector<8x128xf32>
    %cst_91 = arith.constant 1.000000e+00 : f32
    %203 = vector.broadcast %cst_91 : f32 to vector<8x128xf32>
    %204 = arith.subf %203, %197 : vector<8x128xf32>
    %205 = arith.mulf %204, %202 : vector<8x128xf32>
    %206 = arith.mulf %197, %175 : vector<8x128xf32>
    %207 = arith.addf %205, %206 : vector<8x128xf32>
    %c0_92 = arith.constant 0 : index
    %c0_93 = arith.constant 0 : index
    %c0_94 = arith.constant 0 : index
    %208 = vector.load %arg16[%c0_92, %c0_93, %c0_94] : memref<2x8x128xf32, #tpu.memory_space<vmem>>, vector<1x8x128xf32>
    %209 = vector.shape_cast %208 : vector<1x8x128xf32> to vector<8x128xf32>
    %210 = vector.shape_cast %207 : vector<8x128xf32> to vector<1x8x128xf32>
    tpu.vector_store %arg16[%c0_92, %c0_93, %c0_94], %210 {strides = array<i32>} : memref<2x8x128xf32, #tpu.memory_space<vmem>>, vector<1x8x128xf32>,
    %c3_95 = arith.constant 3 : index
    %c0_96 = arith.constant 0 : index
    %c0_97 = arith.constant 0 : index
    %211 = vector.load %arg15[%c3_95, %c0_96, %c0_97] : memref<8x8x128xf32, #tpu.memory_space<vmem>>, vector<1x8x128xf32>
    %212 = vector.shape_cast %211 : vector<1x8x128xf32> to vector<8x128xf32>
    %213 = vector.shape_cast %207 : vector<8x128xf32> to vector<1x8x128xf32>
    tpu.vector_store %arg15[%c3_95, %c0_96, %c0_97], %213 {strides = array<i32>} : memref<8x8x128xf32, #tpu.memory_space<vmem>>, vector<1x8x128xf32>,
    %c0_98 = arith.constant 0 : index
    %c0_99 = arith.constant 0 : index
    %c0_100 = arith.constant 0 : index
    %214 = vector.load %arg16[%c0_98, %c0_99, %c0_100] : memref<2x8x128xf32, #tpu.memory_space<vmem>>, vector<1x8x128xf32>
    %215 = vector.shape_cast %214 : vector<1x8x128xf32> to vector<8x128xf32>
    %216 = arith.truncf %215 : vector<8x128xf32> to vector<8x128xbf16>
    %c0_101 = arith.constant 0 : index
    %c0_102 = arith.constant 0 : index
    %217 = vector.load %arg4[%c0_101, %c0_102] : memref<128x384xbf16, #tpu.memory_space<vmem>>, vector<128x384xbf16>
    %cst_103 = arith.constant dense<0.000000e+00> : vector<8x384xf32>
    %218 = tpu.matmul %216, %217, %cst_103 {dimension_numbers = #tpu.dot_dimension_numbers<[1], [0], [0], [1], [0, 0, 1, 1], [], []>} : vector<8x128xbf16>, vector<128x384xbf16>, vector<8x384xf32> -> vector<8x384xf32>
    %219 = arith.addf %218, %53 : vector<8x384xf32>
    %c4_104 = arith.constant 4 : index
    %c0_105 = arith.constant 0 : index
    %c0_106 = arith.constant 0 : index
    %220 = vector.load %arg14[%c4_104, %c0_105, %c0_106] : memref<8x8x384xf32, #tpu.memory_space<vmem>>, vector<1x8x384xf32>
    %221 = vector.shape_cast %220 : vector<1x8x384xf32> to vector<8x384xf32>
    %222 = vector.extract_strided_slice %221 {offsets = [0, 0], sizes = [8, 128], strides = [1, 1]} : vector<8x384xf32> to vector<8x128xf32>
    %223 = vector.extract_strided_slice %219 {offsets = [0, 0], sizes = [8, 128], strides = [1, 1]} : vector<8x384xf32> to vector<8x128xf32>
    %224 = arith.addf %222, %223 : vector<8x128xf32>
    %225 = arith.negf %224 : vector<8x128xf32>
    %226 = math.exp %225 : vector<8x128xf32>
    %cst_107 = arith.constant 1.000000e+00 : f32
    %227 = vector.broadcast %cst_107 : f32 to vector<8x128xf32>
    %228 = arith.addf %227, %226 : vector<8x128xf32>
    %229 = arith.divf %227, %228 : vector<8x128xf32>
    %230 = vector.extract_strided_slice %221 {offsets = [0, 128], sizes = [8, 128], strides = [1, 1]} : vector<8x384xf32> to vector<8x128xf32>
    %231 = vector.extract_strided_slice %219 {offsets = [0, 128], sizes = [8, 128], strides = [1, 1]} : vector<8x384xf32> to vector<8x128xf32>
    %232 = arith.addf %230, %231 : vector<8x128xf32>
    %233 = arith.negf %232 : vector<8x128xf32>
    %234 = math.exp %233 : vector<8x128xf32>
    %cst_108 = arith.constant 1.000000e+00 : f32
    %235 = vector.broadcast %cst_108 : f32 to vector<8x128xf32>
    %236 = arith.addf %235, %234 : vector<8x128xf32>
    %237 = arith.divf %235, %236 : vector<8x128xf32>
    %238 = vector.extract_strided_slice %221 {offsets = [0, 256], sizes = [8, 128], strides = [1, 1]} : vector<8x384xf32> to vector<8x128xf32>
    %239 = vector.extract_strided_slice %219 {offsets = [0, 256], sizes = [8, 128], strides = [1, 1]} : vector<8x384xf32> to vector<8x128xf32>
    %240 = arith.mulf %229, %239 : vector<8x128xf32>
    %241 = arith.addf %238, %240 : vector<8x128xf32>
    %242 = math.tanh %241 : vector<8x128xf32>
    %cst_109 = arith.constant 1.000000e+00 : f32
    %243 = vector.broadcast %cst_109 : f32 to vector<8x128xf32>
    %244 = arith.subf %243, %237 : vector<8x128xf32>
    %245 = arith.mulf %244, %242 : vector<8x128xf32>
    %246 = arith.mulf %237, %215 : vector<8x128xf32>
    %247 = arith.addf %245, %246 : vector<8x128xf32>
    %c0_110 = arith.constant 0 : index
    %c0_111 = arith.constant 0 : index
    %c0_112 = arith.constant 0 : index
    %248 = vector.load %arg16[%c0_110, %c0_111, %c0_112] : memref<2x8x128xf32, #tpu.memory_space<vmem>>, vector<1x8x128xf32>
    %249 = vector.shape_cast %248 : vector<1x8x128xf32> to vector<8x128xf32>
    %250 = vector.shape_cast %247 : vector<8x128xf32> to vector<1x8x128xf32>
    tpu.vector_store %arg16[%c0_110, %c0_111, %c0_112], %250 {strides = array<i32>} : memref<2x8x128xf32, #tpu.memory_space<vmem>>, vector<1x8x128xf32>,
    %c4_113 = arith.constant 4 : index
    %c0_114 = arith.constant 0 : index
    %c0_115 = arith.constant 0 : index
    %251 = vector.load %arg15[%c4_113, %c0_114, %c0_115] : memref<8x8x128xf32, #tpu.memory_space<vmem>>, vector<1x8x128xf32>
    %252 = vector.shape_cast %251 : vector<1x8x128xf32> to vector<8x128xf32>
    %253 = vector.shape_cast %247 : vector<8x128xf32> to vector<1x8x128xf32>
    tpu.vector_store %arg15[%c4_113, %c0_114, %c0_115], %253 {strides = array<i32>} : memref<8x8x128xf32, #tpu.memory_space<vmem>>, vector<1x8x128xf32>,
    %c0_116 = arith.constant 0 : index
    %c0_117 = arith.constant 0 : index
    %c0_118 = arith.constant 0 : index
    %254 = vector.load %arg16[%c0_116, %c0_117, %c0_118] : memref<2x8x128xf32, #tpu.memory_space<vmem>>, vector<1x8x128xf32>
    %255 = vector.shape_cast %254 : vector<1x8x128xf32> to vector<8x128xf32>
    %256 = arith.truncf %255 : vector<8x128xf32> to vector<8x128xbf16>
    %c0_119 = arith.constant 0 : index
    %c0_120 = arith.constant 0 : index
    %257 = vector.load %arg4[%c0_119, %c0_120] : memref<128x384xbf16, #tpu.memory_space<vmem>>, vector<128x384xbf16>
    %cst_121 = arith.constant dense<0.000000e+00> : vector<8x384xf32>
    %258 = tpu.matmul %256, %257, %cst_121 {dimension_numbers = #tpu.dot_dimension_numbers<[1], [0], [0], [1], [0, 0, 1, 1], [], []>} : vector<8x128xbf16>, vector<128x384xbf16>, vector<8x384xf32> -> vector<8x384xf32>
    %259 = arith.addf %258, %53 : vector<8x384xf32>
    %c5_122 = arith.constant 5 : index
    %c0_123 = arith.constant 0 : index
    %c0_124 = arith.constant 0 : index
    %260 = vector.load %arg14[%c5_122, %c0_123, %c0_124] : memref<8x8x384xf32, #tpu.memory_space<vmem>>, vector<1x8x384xf32>
    %261 = vector.shape_cast %260 : vector<1x8x384xf32> to vector<8x384xf32>
    %262 = vector.extract_strided_slice %261 {offsets = [0, 0], sizes = [8, 128], strides = [1, 1]} : vector<8x384xf32> to vector<8x128xf32>
    %263 = vector.extract_strided_slice %259 {offsets = [0, 0], sizes = [8, 128], strides = [1, 1]} : vector<8x384xf32> to vector<8x128xf32>
    %264 = arith.addf %262, %263 : vector<8x128xf32>
    %265 = arith.negf %264 : vector<8x128xf32>
    %266 = math.exp %265 : vector<8x128xf32>
    %cst_125 = arith.constant 1.000000e+00 : f32
    %267 = vector.broadcast %cst_125 : f32 to vector<8x128xf32>
    %268 = arith.addf %267, %266 : vector<8x128xf32>
    %269 = arith.divf %267, %268 : vector<8x128xf32>
    %270 = vector.extract_strided_slice %261 {offsets = [0, 128], sizes = [8, 128], strides = [1, 1]} : vector<8x384xf32> to vector<8x128xf32>
    %271 = vector.extract_strided_slice %259 {offsets = [0, 128], sizes = [8, 128], strides = [1, 1]} : vector<8x384xf32> to vector<8x128xf32>
    %272 = arith.addf %270, %271 : vector<8x128xf32>
    %273 = arith.negf %272 : vector<8x128xf32>
    %274 = math.exp %273 : vector<8x128xf32>
    %cst_126 = arith.constant 1.000000e+00 : f32
    %275 = vector.broadcast %cst_126 : f32 to vector<8x128xf32>
    %276 = arith.addf %275, %274 : vector<8x128xf32>
    %277 = arith.divf %275, %276 : vector<8x128xf32>
    %278 = vector.extract_strided_slice %261 {offsets = [0, 256], sizes = [8, 128], strides = [1, 1]} : vector<8x384xf32> to vector<8x128xf32>
    %279 = vector.extract_strided_slice %259 {offsets = [0, 256], sizes = [8, 128], strides = [1, 1]} : vector<8x384xf32> to vector<8x128xf32>
    %280 = arith.mulf %269, %279 : vector<8x128xf32>
    %281 = arith.addf %278, %280 : vector<8x128xf32>
    %282 = math.tanh %281 : vector<8x128xf32>
    %cst_127 = arith.constant 1.000000e+00 : f32
    %283 = vector.broadcast %cst_127 : f32 to vector<8x128xf32>
    %284 = arith.subf %283, %277 : vector<8x128xf32>
    %285 = arith.mulf %284, %282 : vector<8x128xf32>
    %286 = arith.mulf %277, %255 : vector<8x128xf32>
    %287 = arith.addf %285, %286 : vector<8x128xf32>
    %c0_128 = arith.constant 0 : index
    %c0_129 = arith.constant 0 : index
    %c0_130 = arith.constant 0 : index
    %288 = vector.load %arg16[%c0_128, %c0_129, %c0_130] : memref<2x8x128xf32, #tpu.memory_space<vmem>>, vector<1x8x128xf32>
    %289 = vector.shape_cast %288 : vector<1x8x128xf32> to vector<8x128xf32>
    %290 = vector.shape_cast %287 : vector<8x128xf32> to vector<1x8x128xf32>
    tpu.vector_store %arg16[%c0_128, %c0_129, %c0_130], %290 {strides = array<i32>} : memref<2x8x128xf32, #tpu.memory_space<vmem>>, vector<1x8x128xf32>,
    %c5_131 = arith.constant 5 : index
    %c0_132 = arith.constant 0 : index
    %c0_133 = arith.constant 0 : index
    %291 = vector.load %arg15[%c5_131, %c0_132, %c0_133] : memref<8x8x128xf32, #tpu.memory_space<vmem>>, vector<1x8x128xf32>
    %292 = vector.shape_cast %291 : vector<1x8x128xf32> to vector<8x128xf32>
    %293 = vector.shape_cast %287 : vector<8x128xf32> to vector<1x8x128xf32>
    tpu.vector_store %arg15[%c5_131, %c0_132, %c0_133], %293 {strides = array<i32>} : memref<8x8x128xf32, #tpu.memory_space<vmem>>, vector<1x8x128xf32>,
    %c0_134 = arith.constant 0 : index
    %c0_135 = arith.constant 0 : index
    %c0_136 = arith.constant 0 : index
    %294 = vector.load %arg16[%c0_134, %c0_135, %c0_136] : memref<2x8x128xf32, #tpu.memory_space<vmem>>, vector<1x8x128xf32>
    %295 = vector.shape_cast %294 : vector<1x8x128xf32> to vector<8x128xf32>
    %296 = arith.truncf %295 : vector<8x128xf32> to vector<8x128xbf16>
    %c0_137 = arith.constant 0 : index
    %c0_138 = arith.constant 0 : index
    %297 = vector.load %arg4[%c0_137, %c0_138] : memref<128x384xbf16, #tpu.memory_space<vmem>>, vector<128x384xbf16>
    %cst_139 = arith.constant dense<0.000000e+00> : vector<8x384xf32>
    %298 = tpu.matmul %296, %297, %cst_139 {dimension_numbers = #tpu.dot_dimension_numbers<[1], [0], [0], [1], [0, 0, 1, 1], [], []>} : vector<8x128xbf16>, vector<128x384xbf16>, vector<8x384xf32> -> vector<8x384xf32>
    %299 = arith.addf %298, %53 : vector<8x384xf32>
    %c6_140 = arith.constant 6 : index
    %c0_141 = arith.constant 0 : index
    %c0_142 = arith.constant 0 : index
    %300 = vector.load %arg14[%c6_140, %c0_141, %c0_142] : memref<8x8x384xf32, #tpu.memory_space<vmem>>, vector<1x8x384xf32>
    %301 = vector.shape_cast %300 : vector<1x8x384xf32> to vector<8x384xf32>
    %302 = vector.extract_strided_slice %301 {offsets = [0, 0], sizes = [8, 128], strides = [1, 1]} : vector<8x384xf32> to vector<8x128xf32>
    %303 = vector.extract_strided_slice %299 {offsets = [0, 0], sizes = [8, 128], strides = [1, 1]} : vector<8x384xf32> to vector<8x128xf32>
    %304 = arith.addf %302, %303 : vector<8x128xf32>
    %305 = arith.negf %304 : vector<8x128xf32>
    %306 = math.exp %305 : vector<8x128xf32>
    %cst_143 = arith.constant 1.000000e+00 : f32
    %307 = vector.broadcast %cst_143 : f32 to vector<8x128xf32>
    %308 = arith.addf %307, %306 : vector<8x128xf32>
    %309 = arith.divf %307, %308 : vector<8x128xf32>
    %310 = vector.extract_strided_slice %301 {offsets = [0, 128], sizes = [8, 128], strides = [1, 1]} : vector<8x384xf32> to vector<8x128xf32>
    %311 = vector.extract_strided_slice %299 {offsets = [0, 128], sizes = [8, 128], strides = [1, 1]} : vector<8x384xf32> to vector<8x128xf32>
    %312 = arith.addf %310, %311 : vector<8x128xf32>
    %313 = arith.negf %312 : vector<8x128xf32>
    %314 = math.exp %313 : vector<8x128xf32>
    %cst_144 = arith.constant 1.000000e+00 : f32
    %315 = vector.broadcast %cst_144 : f32 to vector<8x128xf32>
    %316 = arith.addf %315, %314 : vector<8x128xf32>
    %317 = arith.divf %315, %316 : vector<8x128xf32>
    %318 = vector.extract_strided_slice %301 {offsets = [0, 256], sizes = [8, 128], strides = [1, 1]} : vector<8x384xf32> to vector<8x128xf32>
    %319 = vector.extract_strided_slice %299 {offsets = [0, 256], sizes = [8, 128], strides = [1, 1]} : vector<8x384xf32> to vector<8x128xf32>
    %320 = arith.mulf %309, %319 : vector<8x128xf32>
    %321 = arith.addf %318, %320 : vector<8x128xf32>
    %322 = math.tanh %321 : vector<8x128xf32>
    %cst_145 = arith.constant 1.000000e+00 : f32
    %323 = vector.broadcast %cst_145 : f32 to vector<8x128xf32>
    %324 = arith.subf %323, %317 : vector<8x128xf32>
    %325 = arith.mulf %324, %322 : vector<8x128xf32>
    %326 = arith.mulf %317, %295 : vector<8x128xf32>
    %327 = arith.addf %325, %326 : vector<8x128xf32>
    %c0_146 = arith.constant 0 : index
    %c0_147 = arith.constant 0 : index
    %c0_148 = arith.constant 0 : index
    %328 = vector.load %arg16[%c0_146, %c0_147, %c0_148] : memref<2x8x128xf32, #tpu.memory_space<vmem>>, vector<1x8x128xf32>
    %329 = vector.shape_cast %328 : vector<1x8x128xf32> to vector<8x128xf32>
    %330 = vector.shape_cast %327 : vector<8x128xf32> to vector<1x8x128xf32>
    tpu.vector_store %arg16[%c0_146, %c0_147, %c0_148], %330 {strides = array<i32>} : memref<2x8x128xf32, #tpu.memory_space<vmem>>, vector<1x8x128xf32>,
    %c6_149 = arith.constant 6 : index
    %c0_150 = arith.constant 0 : index
    %c0_151 = arith.constant 0 : index
    %331 = vector.load %arg15[%c6_149, %c0_150, %c0_151] : memref<8x8x128xf32, #tpu.memory_space<vmem>>, vector<1x8x128xf32>
    %332 = vector.shape_cast %331 : vector<1x8x128xf32> to vector<8x128xf32>
    %333 = vector.shape_cast %327 : vector<8x128xf32> to vector<1x8x128xf32>
    tpu.vector_store %arg15[%c6_149, %c0_150, %c0_151], %333 {strides = array<i32>} : memref<8x8x128xf32, #tpu.memory_space<vmem>>, vector<1x8x128xf32>,
    %c0_152 = arith.constant 0 : index
    %c0_153 = arith.constant 0 : index
    %c0_154 = arith.constant 0 : index
    %334 = vector.load %arg16[%c0_152, %c0_153, %c0_154] : memref<2x8x128xf32, #tpu.memory_space<vmem>>, vector<1x8x128xf32>
    %335 = vector.shape_cast %334 : vector<1x8x128xf32> to vector<8x128xf32>
    %336 = arith.truncf %335 : vector<8x128xf32> to vector<8x128xbf16>
    %c0_155 = arith.constant 0 : index
    %c0_156 = arith.constant 0 : index
    %337 = vector.load %arg4[%c0_155, %c0_156] : memref<128x384xbf16, #tpu.memory_space<vmem>>, vector<128x384xbf16>
    %cst_157 = arith.constant dense<0.000000e+00> : vector<8x384xf32>
    %338 = tpu.matmul %336, %337, %cst_157 {dimension_numbers = #tpu.dot_dimension_numbers<[1], [0], [0], [1], [0, 0, 1, 1], [], []>} : vector<8x128xbf16>, vector<128x384xbf16>, vector<8x384xf32> -> vector<8x384xf32>
    %339 = arith.addf %338, %53 : vector<8x384xf32>
    %c7_158 = arith.constant 7 : index
    %c0_159 = arith.constant 0 : index
    %c0_160 = arith.constant 0 : index
    %340 = vector.load %arg14[%c7_158, %c0_159, %c0_160] : memref<8x8x384xf32, #tpu.memory_space<vmem>>, vector<1x8x384xf32>
    %341 = vector.shape_cast %340 : vector<1x8x384xf32> to vector<8x384xf32>
    %342 = vector.extract_strided_slice %341 {offsets = [0, 0], sizes = [8, 128], strides = [1, 1]} : vector<8x384xf32> to vector<8x128xf32>
    %343 = vector.extract_strided_slice %339 {offsets = [0, 0], sizes = [8, 128], strides = [1, 1]} : vector<8x384xf32> to vector<8x128xf32>
    %344 = arith.addf %342, %343 : vector<8x128xf32>
    %345 = arith.negf %344 : vector<8x128xf32>
    %346 = math.exp %345 : vector<8x128xf32>
    %cst_161 = arith.constant 1.000000e+00 : f32
    %347 = vector.broadcast %cst_161 : f32 to vector<8x128xf32>
    %348 = arith.addf %347, %346 : vector<8x128xf32>
    %349 = arith.divf %347, %348 : vector<8x128xf32>
    %350 = vector.extract_strided_slice %341 {offsets = [0, 128], sizes = [8, 128], strides = [1, 1]} : vector<8x384xf32> to vector<8x128xf32>
    %351 = vector.extract_strided_slice %339 {offsets = [0, 128], sizes = [8, 128], strides = [1, 1]} : vector<8x384xf32> to vector<8x128xf32>
    %352 = arith.addf %350, %351 : vector<8x128xf32>
    %353 = arith.negf %352 : vector<8x128xf32>
    %354 = math.exp %353 : vector<8x128xf32>
    %cst_162 = arith.constant 1.000000e+00 : f32
    %355 = vector.broadcast %cst_162 : f32 to vector<8x128xf32>
    %356 = arith.addf %355, %354 : vector<8x128xf32>
    %357 = arith.divf %355, %356 : vector<8x128xf32>
    %358 = vector.extract_strided_slice %341 {offsets = [0, 256], sizes = [8, 128], strides = [1, 1]} : vector<8x384xf32> to vector<8x128xf32>
    %359 = vector.extract_strided_slice %339 {offsets = [0, 256], sizes = [8, 128], strides = [1, 1]} : vector<8x384xf32> to vector<8x128xf32>
    %360 = arith.mulf %349, %359 : vector<8x128xf32>
    %361 = arith.addf %358, %360 : vector<8x128xf32>
    %362 = math.tanh %361 : vector<8x128xf32>
    %cst_163 = arith.constant 1.000000e+00 : f32
    %363 = vector.broadcast %cst_163 : f32 to vector<8x128xf32>
    %364 = arith.subf %363, %357 : vector<8x128xf32>
    %365 = arith.mulf %364, %362 : vector<8x128xf32>
    %366 = arith.mulf %357, %335 : vector<8x128xf32>
    %367 = arith.addf %365, %366 : vector<8x128xf32>
    %c0_164 = arith.constant 0 : index
    %c0_165 = arith.constant 0 : index
    %c0_166 = arith.constant 0 : index
    %368 = vector.load %arg16[%c0_164, %c0_165, %c0_166] : memref<2x8x128xf32, #tpu.memory_space<vmem>>, vector<1x8x128xf32>
    %369 = vector.shape_cast %368 : vector<1x8x128xf32> to vector<8x128xf32>
    %370 = vector.shape_cast %367 : vector<8x128xf32> to vector<1x8x128xf32>
    tpu.vector_store %arg16[%c0_164, %c0_165, %c0_166], %370 {strides = array<i32>} : memref<2x8x128xf32, #tpu.memory_space<vmem>>, vector<1x8x128xf32>,
    %c7_167 = arith.constant 7 : index
    %c0_168 = arith.constant 0 : index
    %c0_169 = arith.constant 0 : index
    %371 = vector.load %arg15[%c7_167, %c0_168, %c0_169] : memref<8x8x128xf32, #tpu.memory_space<vmem>>, vector<1x8x128xf32>
    %372 = vector.shape_cast %371 : vector<1x8x128xf32> to vector<8x128xf32>
    %373 = vector.shape_cast %367 : vector<8x128xf32> to vector<1x8x128xf32>
    tpu.vector_store %arg15[%c7_167, %c0_168, %c0_169], %373 {strides = array<i32>} : memref<8x8x128xf32, #tpu.memory_space<vmem>>, vector<1x8x128xf32>,
    %c0_170 = arith.constant 0 : index
    %c0_171 = arith.constant 0 : index
    %c0_172 = arith.constant 0 : index
    %374 = vector.load %arg15[%c0_170, %c0_171, %c0_172] : memref<8x8x128xf32, #tpu.memory_space<vmem>>, vector<8x8x128xf32>
    %375 = arith.truncf %374 : vector<8x8x128xf32> to vector<8x8x128xbf16>
    %376 = vector.shape_cast %375 : vector<8x8x128xbf16> to vector<64x128xbf16>
    %c0_173 = arith.constant 0 : index
    %c0_174 = arith.constant 0 : index
    %377 = vector.load %arg7[%c0_173, %c0_174] : memref<128x384xbf16, #tpu.memory_space<vmem>>, vector<128x384xbf16>
    %cst_175 = arith.constant dense<0.000000e+00> : vector<64x384xf32>
    %378 = tpu.matmul %376, %377, %cst_175 {dimension_numbers = #tpu.dot_dimension_numbers<[1], [0], [0], [1], [0, 0, 1, 1], [], []>} : vector<64x128xbf16>, vector<128x384xbf16>, vector<64x384xf32> -> vector<64x384xf32>
    %c0_176 = arith.constant 0 : index
    %c0_177 = arith.constant 0 : index
    %379 = vector.load %arg9[%c0_176, %c0_177] : memref<1x384xf32, #tpu.memory_space<vmem>>, vector<1x384xf32>
    %380 = vector.broadcast %379 : vector<1x384xf32> to vector<64x384xf32>
    %381 = arith.addf %378, %380 : vector<64x384xf32>
    %382 = vector.shape_cast %381 : vector<64x384xf32> to vector<8x8x384xf32>
    %c0_178 = arith.constant 0 : index
    %c0_179 = arith.constant 0 : index
    %c0_180 = arith.constant 0 : index
    %383 = vector.load %arg14[%c0_178, %c0_179, %c0_180] : memref<8x8x384xf32, #tpu.memory_space<vmem>>, vector<8x8x384xf32>
    tpu.vector_store %arg14[%c0_178, %c0_179, %c0_180], %382 {strides = array<i32>} : memref<8x8x384xf32, #tpu.memory_space<vmem>>, vector<8x8x384xf32>,
    %c0_181 = arith.constant 0 : index
    %c0_182 = arith.constant 0 : index
    %384 = vector.load %arg10[%c0_181, %c0_182] : memref<1x384xf32, #tpu.memory_space<vmem>>, vector<1x384xf32>
    %385 = vector.shape_cast %384 : vector<1x384xf32> to vector<1x384xf32>
    %386 = vector.broadcast %385 : vector<1x384xf32> to vector<8x384xf32>
    %c1_183 = arith.constant 1 : index
    %c0_184 = arith.constant 0 : index
    %c0_185 = arith.constant 0 : index
    %387 = vector.load %arg16[%c1_183, %c0_184, %c0_185] : memref<2x8x128xf32, #tpu.memory_space<vmem>>, vector<1x8x128xf32>
    %388 = vector.shape_cast %387 : vector<1x8x128xf32> to vector<8x128xf32>
    %389 = arith.truncf %388 : vector<8x128xf32> to vector<8x128xbf16>
    %c0_186 = arith.constant 0 : index
    %c0_187 = arith.constant 0 : index
    %390 = vector.load %arg8[%c0_186, %c0_187] : memref<128x384xbf16, #tpu.memory_space<vmem>>, vector<128x384xbf16>
    %cst_188 = arith.constant dense<0.000000e+00> : vector<8x384xf32>
    %391 = tpu.matmul %389, %390, %cst_188 {dimension_numbers = #tpu.dot_dimension_numbers<[1], [0], [0], [1], [0, 0, 1, 1], [], []>} : vector<8x128xbf16>, vector<128x384xbf16>, vector<8x384xf32> -> vector<8x384xf32>
    %392 = arith.addf %391, %386 : vector<8x384xf32>
    %c0_189 = arith.constant 0 : index
    %c0_190 = arith.constant 0 : index
    %c0_191 = arith.constant 0 : index
    %393 = vector.load %arg14[%c0_189, %c0_190, %c0_191] : memref<8x8x384xf32, #tpu.memory_space<vmem>>, vector<1x8x384xf32>
    %394 = vector.shape_cast %393 : vector<1x8x384xf32> to vector<8x384xf32>
    %395 = vector.extract_strided_slice %394 {offsets = [0, 0], sizes = [8, 128], strides = [1, 1]} : vector<8x384xf32> to vector<8x128xf32>
    %396 = vector.extract_strided_slice %392 {offsets = [0, 0], sizes = [8, 128], strides = [1, 1]} : vector<8x384xf32> to vector<8x128xf32>
    %397 = arith.addf %395, %396 : vector<8x128xf32>
    %398 = arith.negf %397 : vector<8x128xf32>
    %399 = math.exp %398 : vector<8x128xf32>
    %cst_192 = arith.constant 1.000000e+00 : f32
    %400 = vector.broadcast %cst_192 : f32 to vector<8x128xf32>
    %401 = arith.addf %400, %399 : vector<8x128xf32>
    %402 = arith.divf %400, %401 : vector<8x128xf32>
    %403 = vector.extract_strided_slice %394 {offsets = [0, 128], sizes = [8, 128], strides = [1, 1]} : vector<8x384xf32> to vector<8x128xf32>
    %404 = vector.extract_strided_slice %392 {offsets = [0, 128], sizes = [8, 128], strides = [1, 1]} : vector<8x384xf32> to vector<8x128xf32>
    %405 = arith.addf %403, %404 : vector<8x128xf32>
    %406 = arith.negf %405 : vector<8x128xf32>
    %407 = math.exp %406 : vector<8x128xf32>
    %cst_193 = arith.constant 1.000000e+00 : f32
    %408 = vector.broadcast %cst_193 : f32 to vector<8x128xf32>
    %409 = arith.addf %408, %407 : vector<8x128xf32>
    %410 = arith.divf %408, %409 : vector<8x128xf32>
    %411 = vector.extract_strided_slice %394 {offsets = [0, 256], sizes = [8, 128], strides = [1, 1]} : vector<8x384xf32> to vector<8x128xf32>
    %412 = vector.extract_strided_slice %392 {offsets = [0, 256], sizes = [8, 128], strides = [1, 1]} : vector<8x384xf32> to vector<8x128xf32>
    %413 = arith.mulf %402, %412 : vector<8x128xf32>
    %414 = arith.addf %411, %413 : vector<8x128xf32>
    %415 = math.tanh %414 : vector<8x128xf32>
    %cst_194 = arith.constant 1.000000e+00 : f32
    %416 = vector.broadcast %cst_194 : f32 to vector<8x128xf32>
    %417 = arith.subf %416, %410 : vector<8x128xf32>
    %418 = arith.mulf %417, %415 : vector<8x128xf32>
    %419 = arith.mulf %410, %388 : vector<8x128xf32>
    %420 = arith.addf %418, %419 : vector<8x128xf32>
    %c1_195 = arith.constant 1 : index
    %c0_196 = arith.constant 0 : index
    %c0_197 = arith.constant 0 : index
    %421 = vector.load %arg16[%c1_195, %c0_196, %c0_197] : memref<2x8x128xf32, #tpu.memory_space<vmem>>, vector<1x8x128xf32>
    %422 = vector.shape_cast %421 : vector<1x8x128xf32> to vector<8x128xf32>
    %423 = vector.shape_cast %420 : vector<8x128xf32> to vector<1x8x128xf32>
    tpu.vector_store %arg16[%c1_195, %c0_196, %c0_197], %423 {strides = array<i32>} : memref<2x8x128xf32, #tpu.memory_space<vmem>>, vector<1x8x128xf32>,
    %c1_198 = arith.constant 1 : index
    %c0_199 = arith.constant 0 : index
    %c0_200 = arith.constant 0 : index
    %424 = vector.load %arg16[%c1_198, %c0_199, %c0_200] : memref<2x8x128xf32, #tpu.memory_space<vmem>>, vector<1x8x128xf32>
    %425 = vector.shape_cast %424 : vector<1x8x128xf32> to vector<8x128xf32>
    %426 = arith.truncf %425 : vector<8x128xf32> to vector<8x128xbf16>
    %c0_201 = arith.constant 0 : index
    %c0_202 = arith.constant 0 : index
    %427 = vector.load %arg8[%c0_201, %c0_202] : memref<128x384xbf16, #tpu.memory_space<vmem>>, vector<128x384xbf16>
    %cst_203 = arith.constant dense<0.000000e+00> : vector<8x384xf32>
    %428 = tpu.matmul %426, %427, %cst_203 {dimension_numbers = #tpu.dot_dimension_numbers<[1], [0], [0], [1], [0, 0, 1, 1], [], []>} : vector<8x128xbf16>, vector<128x384xbf16>, vector<8x384xf32> -> vector<8x384xf32>
    %429 = arith.addf %428, %386 : vector<8x384xf32>
    %c1_204 = arith.constant 1 : index
    %c0_205 = arith.constant 0 : index
    %c0_206 = arith.constant 0 : index
    %430 = vector.load %arg14[%c1_204, %c0_205, %c0_206] : memref<8x8x384xf32, #tpu.memory_space<vmem>>, vector<1x8x384xf32>
    %431 = vector.shape_cast %430 : vector<1x8x384xf32> to vector<8x384xf32>
    %432 = vector.extract_strided_slice %431 {offsets = [0, 0], sizes = [8, 128], strides = [1, 1]} : vector<8x384xf32> to vector<8x128xf32>
    %433 = vector.extract_strided_slice %429 {offsets = [0, 0], sizes = [8, 128], strides = [1, 1]} : vector<8x384xf32> to vector<8x128xf32>
    %434 = arith.addf %432, %433 : vector<8x128xf32>
    %435 = arith.negf %434 : vector<8x128xf32>
    %436 = math.exp %435 : vector<8x128xf32>
    %cst_207 = arith.constant 1.000000e+00 : f32
    %437 = vector.broadcast %cst_207 : f32 to vector<8x128xf32>
    %438 = arith.addf %437, %436 : vector<8x128xf32>
    %439 = arith.divf %437, %438 : vector<8x128xf32>
    %440 = vector.extract_strided_slice %431 {offsets = [0, 128], sizes = [8, 128], strides = [1, 1]} : vector<8x384xf32> to vector<8x128xf32>
    %441 = vector.extract_strided_slice %429 {offsets = [0, 128], sizes = [8, 128], strides = [1, 1]} : vector<8x384xf32> to vector<8x128xf32>
    %442 = arith.addf %440, %441 : vector<8x128xf32>
    %443 = arith.negf %442 : vector<8x128xf32>
    %444 = math.exp %443 : vector<8x128xf32>
    %cst_208 = arith.constant 1.000000e+00 : f32
    %445 = vector.broadcast %cst_208 : f32 to vector<8x128xf32>
    %446 = arith.addf %445, %444 : vector<8x128xf32>
    %447 = arith.divf %445, %446 : vector<8x128xf32>
    %448 = vector.extract_strided_slice %431 {offsets = [0, 256], sizes = [8, 128], strides = [1, 1]} : vector<8x384xf32> to vector<8x128xf32>
    %449 = vector.extract_strided_slice %429 {offsets = [0, 256], sizes = [8, 128], strides = [1, 1]} : vector<8x384xf32> to vector<8x128xf32>
    %450 = arith.mulf %439, %449 : vector<8x128xf32>
    %451 = arith.addf %448, %450 : vector<8x128xf32>
    %452 = math.tanh %451 : vector<8x128xf32>
    %cst_209 = arith.constant 1.000000e+00 : f32
    %453 = vector.broadcast %cst_209 : f32 to vector<8x128xf32>
    %454 = arith.subf %453, %447 : vector<8x128xf32>
    %455 = arith.mulf %454, %452 : vector<8x128xf32>
    %456 = arith.mulf %447, %425 : vector<8x128xf32>
    %457 = arith.addf %455, %456 : vector<8x128xf32>
    %c1_210 = arith.constant 1 : index
    %c0_211 = arith.constant 0 : index
    %c0_212 = arith.constant 0 : index
    %458 = vector.load %arg16[%c1_210, %c0_211, %c0_212] : memref<2x8x128xf32, #tpu.memory_space<vmem>>, vector<1x8x128xf32>
    %459 = vector.shape_cast %458 : vector<1x8x128xf32> to vector<8x128xf32>
    %460 = vector.shape_cast %457 : vector<8x128xf32> to vector<1x8x128xf32>
    tpu.vector_store %arg16[%c1_210, %c0_211, %c0_212], %460 {strides = array<i32>} : memref<2x8x128xf32, #tpu.memory_space<vmem>>, vector<1x8x128xf32>,
    %c1_213 = arith.constant 1 : index
    %c0_214 = arith.constant 0 : index
    %c0_215 = arith.constant 0 : index
    %461 = vector.load %arg16[%c1_213, %c0_214, %c0_215] : memref<2x8x128xf32, #tpu.memory_space<vmem>>, vector<1x8x128xf32>
    %462 = vector.shape_cast %461 : vector<1x8x128xf32> to vector<8x128xf32>
    %463 = arith.truncf %462 : vector<8x128xf32> to vector<8x128xbf16>
    %c0_216 = arith.constant 0 : index
    %c0_217 = arith.constant 0 : index
    %464 = vector.load %arg8[%c0_216, %c0_217] : memref<128x384xbf16, #tpu.memory_space<vmem>>, vector<128x384xbf16>
    %cst_218 = arith.constant dense<0.000000e+00> : vector<8x384xf32>
    %465 = tpu.matmul %463, %464, %cst_218 {dimension_numbers = #tpu.dot_dimension_numbers<[1], [0], [0], [1], [0, 0, 1, 1], [], []>} : vector<8x128xbf16>, vector<128x384xbf16>, vector<8x384xf32> -> vector<8x384xf32>
    %466 = arith.addf %465, %386 : vector<8x384xf32>
    %c2_219 = arith.constant 2 : index
    %c0_220 = arith.constant 0 : index
    %c0_221 = arith.constant 0 : index
    %467 = vector.load %arg14[%c2_219, %c0_220, %c0_221] : memref<8x8x384xf32, #tpu.memory_space<vmem>>, vector<1x8x384xf32>
    %468 = vector.shape_cast %467 : vector<1x8x384xf32> to vector<8x384xf32>
    %469 = vector.extract_strided_slice %468 {offsets = [0, 0], sizes = [8, 128], strides = [1, 1]} : vector<8x384xf32> to vector<8x128xf32>
    %470 = vector.extract_strided_slice %466 {offsets = [0, 0], sizes = [8, 128], strides = [1, 1]} : vector<8x384xf32> to vector<8x128xf32>
    %471 = arith.addf %469, %470 : vector<8x128xf32>
    %472 = arith.negf %471 : vector<8x128xf32>
    %473 = math.exp %472 : vector<8x128xf32>
    %cst_222 = arith.constant 1.000000e+00 : f32
    %474 = vector.broadcast %cst_222 : f32 to vector<8x128xf32>
    %475 = arith.addf %474, %473 : vector<8x128xf32>
    %476 = arith.divf %474, %475 : vector<8x128xf32>
    %477 = vector.extract_strided_slice %468 {offsets = [0, 128], sizes = [8, 128], strides = [1, 1]} : vector<8x384xf32> to vector<8x128xf32>
    %478 = vector.extract_strided_slice %466 {offsets = [0, 128], sizes = [8, 128], strides = [1, 1]} : vector<8x384xf32> to vector<8x128xf32>
    %479 = arith.addf %477, %478 : vector<8x128xf32>
    %480 = arith.negf %479 : vector<8x128xf32>
    %481 = math.exp %480 : vector<8x128xf32>
    %cst_223 = arith.constant 1.000000e+00 : f32
    %482 = vector.broadcast %cst_223 : f32 to vector<8x128xf32>
    %483 = arith.addf %482, %481 : vector<8x128xf32>
    %484 = arith.divf %482, %483 : vector<8x128xf32>
    %485 = vector.extract_strided_slice %468 {offsets = [0, 256], sizes = [8, 128], strides = [1, 1]} : vector<8x384xf32> to vector<8x128xf32>
    %486 = vector.extract_strided_slice %466 {offsets = [0, 256], sizes = [8, 128], strides = [1, 1]} : vector<8x384xf32> to vector<8x128xf32>
    %487 = arith.mulf %476, %486 : vector<8x128xf32>
    %488 = arith.addf %485, %487 : vector<8x128xf32>
    %489 = math.tanh %488 : vector<8x128xf32>
    %cst_224 = arith.constant 1.000000e+00 : f32
    %490 = vector.broadcast %cst_224 : f32 to vector<8x128xf32>
    %491 = arith.subf %490, %484 : vector<8x128xf32>
    %492 = arith.mulf %491, %489 : vector<8x128xf32>
    %493 = arith.mulf %484, %462 : vector<8x128xf32>
    %494 = arith.addf %492, %493 : vector<8x128xf32>
    %c1_225 = arith.constant 1 : index
    %c0_226 = arith.constant 0 : index
    %c0_227 = arith.constant 0 : index
    %495 = vector.load %arg16[%c1_225, %c0_226, %c0_227] : memref<2x8x128xf32, #tpu.memory_space<vmem>>, vector<1x8x128xf32>
    %496 = vector.shape_cast %495 : vector<1x8x128xf32> to vector<8x128xf32>
    %497 = vector.shape_cast %494 : vector<8x128xf32> to vector<1x8x128xf32>
    tpu.vector_store %arg16[%c1_225, %c0_226, %c0_227], %497 {strides = array<i32>} : memref<2x8x128xf32, #tpu.memory_space<vmem>>, vector<1x8x128xf32>,
    %c1_228 = arith.constant 1 : index
    %c0_229 = arith.constant 0 : index
    %c0_230 = arith.constant 0 : index
    %498 = vector.load %arg16[%c1_228, %c0_229, %c0_230] : memref<2x8x128xf32, #tpu.memory_space<vmem>>, vector<1x8x128xf32>
    %499 = vector.shape_cast %498 : vector<1x8x128xf32> to vector<8x128xf32>
    %500 = arith.truncf %499 : vector<8x128xf32> to vector<8x128xbf16>
    %c0_231 = arith.constant 0 : index
    %c0_232 = arith.constant 0 : index
    %501 = vector.load %arg8[%c0_231, %c0_232] : memref<128x384xbf16, #tpu.memory_space<vmem>>, vector<128x384xbf16>
    %cst_233 = arith.constant dense<0.000000e+00> : vector<8x384xf32>
    %502 = tpu.matmul %500, %501, %cst_233 {dimension_numbers = #tpu.dot_dimension_numbers<[1], [0], [0], [1], [0, 0, 1, 1], [], []>} : vector<8x128xbf16>, vector<128x384xbf16>, vector<8x384xf32> -> vector<8x384xf32>
    %503 = arith.addf %502, %386 : vector<8x384xf32>
    %c3_234 = arith.constant 3 : index
    %c0_235 = arith.constant 0 : index
    %c0_236 = arith.constant 0 : index
    %504 = vector.load %arg14[%c3_234, %c0_235, %c0_236] : memref<8x8x384xf32, #tpu.memory_space<vmem>>, vector<1x8x384xf32>
    %505 = vector.shape_cast %504 : vector<1x8x384xf32> to vector<8x384xf32>
    %506 = vector.extract_strided_slice %505 {offsets = [0, 0], sizes = [8, 128], strides = [1, 1]} : vector<8x384xf32> to vector<8x128xf32>
    %507 = vector.extract_strided_slice %503 {offsets = [0, 0], sizes = [8, 128], strides = [1, 1]} : vector<8x384xf32> to vector<8x128xf32>
    %508 = arith.addf %506, %507 : vector<8x128xf32>
    %509 = arith.negf %508 : vector<8x128xf32>
    %510 = math.exp %509 : vector<8x128xf32>
    %cst_237 = arith.constant 1.000000e+00 : f32
    %511 = vector.broadcast %cst_237 : f32 to vector<8x128xf32>
    %512 = arith.addf %511, %510 : vector<8x128xf32>
    %513 = arith.divf %511, %512 : vector<8x128xf32>
    %514 = vector.extract_strided_slice %505 {offsets = [0, 128], sizes = [8, 128], strides = [1, 1]} : vector<8x384xf32> to vector<8x128xf32>
    %515 = vector.extract_strided_slice %503 {offsets = [0, 128], sizes = [8, 128], strides = [1, 1]} : vector<8x384xf32> to vector<8x128xf32>
    %516 = arith.addf %514, %515 : vector<8x128xf32>
    %517 = arith.negf %516 : vector<8x128xf32>
    %518 = math.exp %517 : vector<8x128xf32>
    %cst_238 = arith.constant 1.000000e+00 : f32
    %519 = vector.broadcast %cst_238 : f32 to vector<8x128xf32>
    %520 = arith.addf %519, %518 : vector<8x128xf32>
    %521 = arith.divf %519, %520 : vector<8x128xf32>
    %522 = vector.extract_strided_slice %505 {offsets = [0, 256], sizes = [8, 128], strides = [1, 1]} : vector<8x384xf32> to vector<8x128xf32>
    %523 = vector.extract_strided_slice %503 {offsets = [0, 256], sizes = [8, 128], strides = [1, 1]} : vector<8x384xf32> to vector<8x128xf32>
    %524 = arith.mulf %513, %523 : vector<8x128xf32>
    %525 = arith.addf %522, %524 : vector<8x128xf32>
    %526 = math.tanh %525 : vector<8x128xf32>
    %cst_239 = arith.constant 1.000000e+00 : f32
    %527 = vector.broadcast %cst_239 : f32 to vector<8x128xf32>
    %528 = arith.subf %527, %521 : vector<8x128xf32>
    %529 = arith.mulf %528, %526 : vector<8x128xf32>
    %530 = arith.mulf %521, %499 : vector<8x128xf32>
    %531 = arith.addf %529, %530 : vector<8x128xf32>
    %c1_240 = arith.constant 1 : index
    %c0_241 = arith.constant 0 : index
    %c0_242 = arith.constant 0 : index
    %532 = vector.load %arg16[%c1_240, %c0_241, %c0_242] : memref<2x8x128xf32, #tpu.memory_space<vmem>>, vector<1x8x128xf32>
    %533 = vector.shape_cast %532 : vector<1x8x128xf32> to vector<8x128xf32>
    %534 = vector.shape_cast %531 : vector<8x128xf32> to vector<1x8x128xf32>
    tpu.vector_store %arg16[%c1_240, %c0_241, %c0_242], %534 {strides = array<i32>} : memref<2x8x128xf32, #tpu.memory_space<vmem>>, vector<1x8x128xf32>,
    %c1_243 = arith.constant 1 : index
    %c0_244 = arith.constant 0 : index
    %c0_245 = arith.constant 0 : index
    %535 = vector.load %arg16[%c1_243, %c0_244, %c0_245] : memref<2x8x128xf32, #tpu.memory_space<vmem>>, vector<1x8x128xf32>
    %536 = vector.shape_cast %535 : vector<1x8x128xf32> to vector<8x128xf32>
    %537 = arith.truncf %536 : vector<8x128xf32> to vector<8x128xbf16>
    %c0_246 = arith.constant 0 : index
    %c0_247 = arith.constant 0 : index
    %538 = vector.load %arg8[%c0_246, %c0_247] : memref<128x384xbf16, #tpu.memory_space<vmem>>, vector<128x384xbf16>
    %cst_248 = arith.constant dense<0.000000e+00> : vector<8x384xf32>
    %539 = tpu.matmul %537, %538, %cst_248 {dimension_numbers = #tpu.dot_dimension_numbers<[1], [0], [0], [1], [0, 0, 1, 1], [], []>} : vector<8x128xbf16>, vector<128x384xbf16>, vector<8x384xf32> -> vector<8x384xf32>
    %540 = arith.addf %539, %386 : vector<8x384xf32>
    %c4_249 = arith.constant 4 : index
    %c0_250 = arith.constant 0 : index
    %c0_251 = arith.constant 0 : index
    %541 = vector.load %arg14[%c4_249, %c0_250, %c0_251] : memref<8x8x384xf32, #tpu.memory_space<vmem>>, vector<1x8x384xf32>
    %542 = vector.shape_cast %541 : vector<1x8x384xf32> to vector<8x384xf32>
    %543 = vector.extract_strided_slice %542 {offsets = [0, 0], sizes = [8, 128], strides = [1, 1]} : vector<8x384xf32> to vector<8x128xf32>
    %544 = vector.extract_strided_slice %540 {offsets = [0, 0], sizes = [8, 128], strides = [1, 1]} : vector<8x384xf32> to vector<8x128xf32>
    %545 = arith.addf %543, %544 : vector<8x128xf32>
    %546 = arith.negf %545 : vector<8x128xf32>
    %547 = math.exp %546 : vector<8x128xf32>
    %cst_252 = arith.constant 1.000000e+00 : f32
    %548 = vector.broadcast %cst_252 : f32 to vector<8x128xf32>
    %549 = arith.addf %548, %547 : vector<8x128xf32>
    %550 = arith.divf %548, %549 : vector<8x128xf32>
    %551 = vector.extract_strided_slice %542 {offsets = [0, 128], sizes = [8, 128], strides = [1, 1]} : vector<8x384xf32> to vector<8x128xf32>
    %552 = vector.extract_strided_slice %540 {offsets = [0, 128], sizes = [8, 128], strides = [1, 1]} : vector<8x384xf32> to vector<8x128xf32>
    %553 = arith.addf %551, %552 : vector<8x128xf32>
    %554 = arith.negf %553 : vector<8x128xf32>
    %555 = math.exp %554 : vector<8x128xf32>
    %cst_253 = arith.constant 1.000000e+00 : f32
    %556 = vector.broadcast %cst_253 : f32 to vector<8x128xf32>
    %557 = arith.addf %556, %555 : vector<8x128xf32>
    %558 = arith.divf %556, %557 : vector<8x128xf32>
    %559 = vector.extract_strided_slice %542 {offsets = [0, 256], sizes = [8, 128], strides = [1, 1]} : vector<8x384xf32> to vector<8x128xf32>
    %560 = vector.extract_strided_slice %540 {offsets = [0, 256], sizes = [8, 128], strides = [1, 1]} : vector<8x384xf32> to vector<8x128xf32>
    %561 = arith.mulf %550, %560 : vector<8x128xf32>
    %562 = arith.addf %559, %561 : vector<8x128xf32>
    %563 = math.tanh %562 : vector<8x128xf32>
    %cst_254 = arith.constant 1.000000e+00 : f32
    %564 = vector.broadcast %cst_254 : f32 to vector<8x128xf32>
    %565 = arith.subf %564, %558 : vector<8x128xf32>
    %566 = arith.mulf %565, %563 : vector<8x128xf32>
    %567 = arith.mulf %558, %536 : vector<8x128xf32>
    %568 = arith.addf %566, %567 : vector<8x128xf32>
    %c1_255 = arith.constant 1 : index
    %c0_256 = arith.constant 0 : index
    %c0_257 = arith.constant 0 : index
    %569 = vector.load %arg16[%c1_255, %c0_256, %c0_257] : memref<2x8x128xf32, #tpu.memory_space<vmem>>, vector<1x8x128xf32>
    %570 = vector.shape_cast %569 : vector<1x8x128xf32> to vector<8x128xf32>
    %571 = vector.shape_cast %568 : vector<8x128xf32> to vector<1x8x128xf32>
    tpu.vector_store %arg16[%c1_255, %c0_256, %c0_257], %571 {strides = array<i32>} : memref<2x8x128xf32, #tpu.memory_space<vmem>>, vector<1x8x128xf32>,
    %c1_258 = arith.constant 1 : index
    %c0_259 = arith.constant 0 : index
    %c0_260 = arith.constant 0 : index
    %572 = vector.load %arg16[%c1_258, %c0_259, %c0_260] : memref<2x8x128xf32, #tpu.memory_space<vmem>>, vector<1x8x128xf32>
    %573 = vector.shape_cast %572 : vector<1x8x128xf32> to vector<8x128xf32>
    %574 = arith.truncf %573 : vector<8x128xf32> to vector<8x128xbf16>
    %c0_261 = arith.constant 0 : index
    %c0_262 = arith.constant 0 : index
    %575 = vector.load %arg8[%c0_261, %c0_262] : memref<128x384xbf16, #tpu.memory_space<vmem>>, vector<128x384xbf16>
    %cst_263 = arith.constant dense<0.000000e+00> : vector<8x384xf32>
    %576 = tpu.matmul %574, %575, %cst_263 {dimension_numbers = #tpu.dot_dimension_numbers<[1], [0], [0], [1], [0, 0, 1, 1], [], []>} : vector<8x128xbf16>, vector<128x384xbf16>, vector<8x384xf32> -> vector<8x384xf32>
    %577 = arith.addf %576, %386 : vector<8x384xf32>
    %c5_264 = arith.constant 5 : index
    %c0_265 = arith.constant 0 : index
    %c0_266 = arith.constant 0 : index
    %578 = vector.load %arg14[%c5_264, %c0_265, %c0_266] : memref<8x8x384xf32, #tpu.memory_space<vmem>>, vector<1x8x384xf32>
    %579 = vector.shape_cast %578 : vector<1x8x384xf32> to vector<8x384xf32>
    %580 = vector.extract_strided_slice %579 {offsets = [0, 0], sizes = [8, 128], strides = [1, 1]} : vector<8x384xf32> to vector<8x128xf32>
    %581 = vector.extract_strided_slice %577 {offsets = [0, 0], sizes = [8, 128], strides = [1, 1]} : vector<8x384xf32> to vector<8x128xf32>
    %582 = arith.addf %580, %581 : vector<8x128xf32>
    %583 = arith.negf %582 : vector<8x128xf32>
    %584 = math.exp %583 : vector<8x128xf32>
    %cst_267 = arith.constant 1.000000e+00 : f32
    %585 = vector.broadcast %cst_267 : f32 to vector<8x128xf32>
    %586 = arith.addf %585, %584 : vector<8x128xf32>
    %587 = arith.divf %585, %586 : vector<8x128xf32>
    %588 = vector.extract_strided_slice %579 {offsets = [0, 128], sizes = [8, 128], strides = [1, 1]} : vector<8x384xf32> to vector<8x128xf32>
    %589 = vector.extract_strided_slice %577 {offsets = [0, 128], sizes = [8, 128], strides = [1, 1]} : vector<8x384xf32> to vector<8x128xf32>
    %590 = arith.addf %588, %589 : vector<8x128xf32>
    %591 = arith.negf %590 : vector<8x128xf32>
    %592 = math.exp %591 : vector<8x128xf32>
    %cst_268 = arith.constant 1.000000e+00 : f32
    %593 = vector.broadcast %cst_268 : f32 to vector<8x128xf32>
    %594 = arith.addf %593, %592 : vector<8x128xf32>
    %595 = arith.divf %593, %594 : vector<8x128xf32>
    %596 = vector.extract_strided_slice %579 {offsets = [0, 256], sizes = [8, 128], strides = [1, 1]} : vector<8x384xf32> to vector<8x128xf32>
    %597 = vector.extract_strided_slice %577 {offsets = [0, 256], sizes = [8, 128], strides = [1, 1]} : vector<8x384xf32> to vector<8x128xf32>
    %598 = arith.mulf %587, %597 : vector<8x128xf32>
    %599 = arith.addf %596, %598 : vector<8x128xf32>
    %600 = math.tanh %599 : vector<8x128xf32>
    %cst_269 = arith.constant 1.000000e+00 : f32
    %601 = vector.broadcast %cst_269 : f32 to vector<8x128xf32>
    %602 = arith.subf %601, %595 : vector<8x128xf32>
    %603 = arith.mulf %602, %600 : vector<8x128xf32>
    %604 = arith.mulf %595, %573 : vector<8x128xf32>
    %605 = arith.addf %603, %604 : vector<8x128xf32>
    %c1_270 = arith.constant 1 : index
    %c0_271 = arith.constant 0 : index
    %c0_272 = arith.constant 0 : index
    %606 = vector.load %arg16[%c1_270, %c0_271, %c0_272] : memref<2x8x128xf32, #tpu.memory_space<vmem>>, vector<1x8x128xf32>
    %607 = vector.shape_cast %606 : vector<1x8x128xf32> to vector<8x128xf32>
    %608 = vector.shape_cast %605 : vector<8x128xf32> to vector<1x8x128xf32>
    tpu.vector_store %arg16[%c1_270, %c0_271, %c0_272], %608 {strides = array<i32>} : memref<2x8x128xf32, #tpu.memory_space<vmem>>, vector<1x8x128xf32>,
    %c1_273 = arith.constant 1 : index
    %c0_274 = arith.constant 0 : index
    %c0_275 = arith.constant 0 : index
    %609 = vector.load %arg16[%c1_273, %c0_274, %c0_275] : memref<2x8x128xf32, #tpu.memory_space<vmem>>, vector<1x8x128xf32>
    %610 = vector.shape_cast %609 : vector<1x8x128xf32> to vector<8x128xf32>
    %611 = arith.truncf %610 : vector<8x128xf32> to vector<8x128xbf16>
    %c0_276 = arith.constant 0 : index
    %c0_277 = arith.constant 0 : index
    %612 = vector.load %arg8[%c0_276, %c0_277] : memref<128x384xbf16, #tpu.memory_space<vmem>>, vector<128x384xbf16>
    %cst_278 = arith.constant dense<0.000000e+00> : vector<8x384xf32>
    %613 = tpu.matmul %611, %612, %cst_278 {dimension_numbers = #tpu.dot_dimension_numbers<[1], [0], [0], [1], [0, 0, 1, 1], [], []>} : vector<8x128xbf16>, vector<128x384xbf16>, vector<8x384xf32> -> vector<8x384xf32>
    %614 = arith.addf %613, %386 : vector<8x384xf32>
    %c6_279 = arith.constant 6 : index
    %c0_280 = arith.constant 0 : index
    %c0_281 = arith.constant 0 : index
    %615 = vector.load %arg14[%c6_279, %c0_280, %c0_281] : memref<8x8x384xf32, #tpu.memory_space<vmem>>, vector<1x8x384xf32>
    %616 = vector.shape_cast %615 : vector<1x8x384xf32> to vector<8x384xf32>
    %617 = vector.extract_strided_slice %616 {offsets = [0, 0], sizes = [8, 128], strides = [1, 1]} : vector<8x384xf32> to vector<8x128xf32>
    %618 = vector.extract_strided_slice %614 {offsets = [0, 0], sizes = [8, 128], strides = [1, 1]} : vector<8x384xf32> to vector<8x128xf32>
    %619 = arith.addf %617, %618 : vector<8x128xf32>
    %620 = arith.negf %619 : vector<8x128xf32>
    %621 = math.exp %620 : vector<8x128xf32>
    %cst_282 = arith.constant 1.000000e+00 : f32
    %622 = vector.broadcast %cst_282 : f32 to vector<8x128xf32>
    %623 = arith.addf %622, %621 : vector<8x128xf32>
    %624 = arith.divf %622, %623 : vector<8x128xf32>
    %625 = vector.extract_strided_slice %616 {offsets = [0, 128], sizes = [8, 128], strides = [1, 1]} : vector<8x384xf32> to vector<8x128xf32>
    %626 = vector.extract_strided_slice %614 {offsets = [0, 128], sizes = [8, 128], strides = [1, 1]} : vector<8x384xf32> to vector<8x128xf32>
    %627 = arith.addf %625, %626 : vector<8x128xf32>
    %628 = arith.negf %627 : vector<8x128xf32>
    %629 = math.exp %628 : vector<8x128xf32>
    %cst_283 = arith.constant 1.000000e+00 : f32
    %630 = vector.broadcast %cst_283 : f32 to vector<8x128xf32>
    %631 = arith.addf %630, %629 : vector<8x128xf32>
    %632 = arith.divf %630, %631 : vector<8x128xf32>
    %633 = vector.extract_strided_slice %616 {offsets = [0, 256], sizes = [8, 128], strides = [1, 1]} : vector<8x384xf32> to vector<8x128xf32>
    %634 = vector.extract_strided_slice %614 {offsets = [0, 256], sizes = [8, 128], strides = [1, 1]} : vector<8x384xf32> to vector<8x128xf32>
    %635 = arith.mulf %624, %634 : vector<8x128xf32>
    %636 = arith.addf %633, %635 : vector<8x128xf32>
    %637 = math.tanh %636 : vector<8x128xf32>
    %cst_284 = arith.constant 1.000000e+00 : f32
    %638 = vector.broadcast %cst_284 : f32 to vector<8x128xf32>
    %639 = arith.subf %638, %632 : vector<8x128xf32>
    %640 = arith.mulf %639, %637 : vector<8x128xf32>
    %641 = arith.mulf %632, %610 : vector<8x128xf32>
    %642 = arith.addf %640, %641 : vector<8x128xf32>
    %c1_285 = arith.constant 1 : index
    %c0_286 = arith.constant 0 : index
    %c0_287 = arith.constant 0 : index
    %643 = vector.load %arg16[%c1_285, %c0_286, %c0_287] : memref<2x8x128xf32, #tpu.memory_space<vmem>>, vector<1x8x128xf32>
    %644 = vector.shape_cast %643 : vector<1x8x128xf32> to vector<8x128xf32>
    %645 = vector.shape_cast %642 : vector<8x128xf32> to vector<1x8x128xf32>
    tpu.vector_store %arg16[%c1_285, %c0_286, %c0_287], %645 {strides = array<i32>} : memref<2x8x128xf32, #tpu.memory_space<vmem>>, vector<1x8x128xf32>,
    %c1_288 = arith.constant 1 : index
    %c0_289 = arith.constant 0 : index
    %c0_290 = arith.constant 0 : index
    %646 = vector.load %arg16[%c1_288, %c0_289, %c0_290] : memref<2x8x128xf32, #tpu.memory_space<vmem>>, vector<1x8x128xf32>
    %647 = vector.shape_cast %646 : vector<1x8x128xf32> to vector<8x128xf32>
    %648 = arith.truncf %647 : vector<8x128xf32> to vector<8x128xbf16>
    %c0_291 = arith.constant 0 : index
    %c0_292 = arith.constant 0 : index
    %649 = vector.load %arg8[%c0_291, %c0_292] : memref<128x384xbf16, #tpu.memory_space<vmem>>, vector<128x384xbf16>
    %cst_293 = arith.constant dense<0.000000e+00> : vector<8x384xf32>
    %650 = tpu.matmul %648, %649, %cst_293 {dimension_numbers = #tpu.dot_dimension_numbers<[1], [0], [0], [1], [0, 0, 1, 1], [], []>} : vector<8x128xbf16>, vector<128x384xbf16>, vector<8x384xf32> -> vector<8x384xf32>
    %651 = arith.addf %650, %386 : vector<8x384xf32>
    %c7_294 = arith.constant 7 : index
    %c0_295 = arith.constant 0 : index
    %c0_296 = arith.constant 0 : index
    %652 = vector.load %arg14[%c7_294, %c0_295, %c0_296] : memref<8x8x384xf32, #tpu.memory_space<vmem>>, vector<1x8x384xf32>
    %653 = vector.shape_cast %652 : vector<1x8x384xf32> to vector<8x384xf32>
    %654 = vector.extract_strided_slice %653 {offsets = [0, 0], sizes = [8, 128], strides = [1, 1]} : vector<8x384xf32> to vector<8x128xf32>
    %655 = vector.extract_strided_slice %651 {offsets = [0, 0], sizes = [8, 128], strides = [1, 1]} : vector<8x384xf32> to vector<8x128xf32>
    %656 = arith.addf %654, %655 : vector<8x128xf32>
    %657 = arith.negf %656 : vector<8x128xf32>
    %658 = math.exp %657 : vector<8x128xf32>
    %cst_297 = arith.constant 1.000000e+00 : f32
    %659 = vector.broadcast %cst_297 : f32 to vector<8x128xf32>
    %660 = arith.addf %659, %658 : vector<8x128xf32>
    %661 = arith.divf %659, %660 : vector<8x128xf32>
    %662 = vector.extract_strided_slice %653 {offsets = [0, 128], sizes = [8, 128], strides = [1, 1]} : vector<8x384xf32> to vector<8x128xf32>
    %663 = vector.extract_strided_slice %651 {offsets = [0, 128], sizes = [8, 128], strides = [1, 1]} : vector<8x384xf32> to vector<8x128xf32>
    %664 = arith.addf %662, %663 : vector<8x128xf32>
    %665 = arith.negf %664 : vector<8x128xf32>
    %666 = math.exp %665 : vector<8x128xf32>
    %cst_298 = arith.constant 1.000000e+00 : f32
    %667 = vector.broadcast %cst_298 : f32 to vector<8x128xf32>
    %668 = arith.addf %667, %666 : vector<8x128xf32>
    %669 = arith.divf %667, %668 : vector<8x128xf32>
    %670 = vector.extract_strided_slice %653 {offsets = [0, 256], sizes = [8, 128], strides = [1, 1]} : vector<8x384xf32> to vector<8x128xf32>
    %671 = vector.extract_strided_slice %651 {offsets = [0, 256], sizes = [8, 128], strides = [1, 1]} : vector<8x384xf32> to vector<8x128xf32>
    %672 = arith.mulf %661, %671 : vector<8x128xf32>
    %673 = arith.addf %670, %672 : vector<8x128xf32>
    %674 = math.tanh %673 : vector<8x128xf32>
    %cst_299 = arith.constant 1.000000e+00 : f32
    %675 = vector.broadcast %cst_299 : f32 to vector<8x128xf32>
    %676 = arith.subf %675, %669 : vector<8x128xf32>
    %677 = arith.mulf %676, %674 : vector<8x128xf32>
    %678 = arith.mulf %669, %647 : vector<8x128xf32>
    %679 = arith.addf %677, %678 : vector<8x128xf32>
    %c1_300 = arith.constant 1 : index
    %c0_301 = arith.constant 0 : index
    %c0_302 = arith.constant 0 : index
    %680 = vector.load %arg16[%c1_300, %c0_301, %c0_302] : memref<2x8x128xf32, #tpu.memory_space<vmem>>, vector<1x8x128xf32>
    %681 = vector.shape_cast %680 : vector<1x8x128xf32> to vector<8x128xf32>
    %682 = vector.shape_cast %679 : vector<8x128xf32> to vector<1x8x128xf32>
    tpu.vector_store %arg16[%c1_300, %c0_301, %c0_302], %682 {strides = array<i32>} : memref<2x8x128xf32, #tpu.memory_space<vmem>>, vector<1x8x128xf32>,
    %c1_i32 = arith.constant 1 : i32
    %683 = arith.cmpi eq, %arg1, %c1_i32 : i32
    %684 = arith.extui %683 : i1 to i32
    %c0_i32_303 = arith.constant 0 : i32
    %685 = arith.cmpi ne, %684, %c0_i32_303 : i32
    scf.if %685 {
      %c1_304 = arith.constant 1 : index
      %c0_305 = arith.constant 0 : index
      %c0_306 = arith.constant 0 : index
      %686 = vector.load %arg16[%c1_304, %c0_305, %c0_306] : memref<2x8x128xf32, #tpu.memory_space<vmem>>, vector<1x8x128xf32>
      %687 = vector.shape_cast %686 : vector<1x8x128xf32> to vector<8x128xf32>
      %688 = arith.truncf %687 : vector<8x128xf32> to vector<8x128xbf16>
      %c0_307 = arith.constant 0 : index
      %c0_308 = arith.constant 0 : index
      %689 = vector.load %arg11[%c0_307, %c0_308] : memref<128x4xbf16, #tpu.memory_space<vmem>>, vector<128x4xbf16>
      %cst_309 = arith.constant dense<0.000000e+00> : vector<8x4xf32>
      %690 = tpu.matmul %688, %689, %cst_309 {dimension_numbers = #tpu.dot_dimension_numbers<[1], [0], [0], [1], [0, 0, 1, 1], [], []>} : vector<8x128xbf16>, vector<128x4xbf16>, vector<8x4xf32> -> vector<8x4xf32>
      %c0_310 = arith.constant 0 : index
      %c0_311 = arith.constant 0 : index
      %691 = vector.load %arg12[%c0_310, %c0_311] : memref<1x4xf32, #tpu.memory_space<vmem>>, vector<1x4xf32>
      %692 = vector.broadcast %691 : vector<1x4xf32> to vector<8x4xf32>
      %693 = arith.addf %690, %692 : vector<8x4xf32>
      %c0_312 = arith.constant 0 : index
      %c0_313 = arith.constant 0 : index
      %694 = vector.load %arg13[%c0_312, %c0_313] : memref<8x4xf32, #tpu.memory_space<vmem>>, vector<8x4xf32>
      tpu.vector_store %arg13[%c0_312, %c0_313], %693 {strides = array<i32>} : memref<8x4xf32, #tpu.memory_space<vmem>>, vector<8x4xf32>,
    } else {
    }
    return
  }
  func.func @transform_0(%arg0: i32, %arg1: i32) -> (i32, i32, i32) {
    %c0_i32 = arith.constant 0 : i32
    %c0_i32_0 = arith.constant 0 : i32
    return %arg0, %arg1, %c0_i32 : i32, i32, i32
  }
  func.func @transform_1(%arg0: i32, %arg1: i32) -> (i32, i32) {
    %c0_i32 = arith.constant 0 : i32
    %c0_i32_0 = arith.constant 0 : i32
    %c0_i32_1 = arith.constant 0 : i32
    return %c0_i32, %c0_i32_0 : i32, i32
  }
  func.func @transform_2(%arg0: i32, %arg1: i32) -> (i32, i32) {
    %c0_i32 = arith.constant 0 : i32
    %c0_i32_0 = arith.constant 0 : i32
    %c0_i32_1 = arith.constant 0 : i32
    return %c0_i32, %c0_i32_0 : i32, i32
  }
  func.func @transform_3(%arg0: i32, %arg1: i32) -> (i32, i32) {
    %c0_i32 = arith.constant 0 : i32
    %c0_i32_0 = arith.constant 0 : i32
    %c0_i32_1 = arith.constant 0 : i32
    return %c0_i32, %c0_i32_0 : i32, i32
  }
  func.func @transform_4(%arg0: i32, %arg1: i32) -> (i32, i32) {
    %c0_i32 = arith.constant 0 : i32
    %c0_i32_0 = arith.constant 0 : i32
    %c0_i32_1 = arith.constant 0 : i32
    return %c0_i32, %c0_i32_0 : i32, i32
  }
  func.func @transform_5(%arg0: i32, %arg1: i32) -> (i32, i32) {
    %c0_i32 = arith.constant 0 : i32
    %c0_i32_0 = arith.constant 0 : i32
    %c0_i32_1 = arith.constant 0 : i32
    return %c0_i32, %c0_i32_0 : i32, i32
  }
  func.func @transform_6(%arg0: i32, %arg1: i32) -> (i32, i32) {
    %c0_i32 = arith.constant 0 : i32
    %c0_i32_0 = arith.constant 0 : i32
    %c0_i32_1 = arith.constant 0 : i32
    return %c0_i32, %c0_i32_0 : i32, i32
  }
  func.func @transform_7(%arg0: i32, %arg1: i32) -> (i32, i32) {
    %c0_i32 = arith.constant 0 : i32
    %c0_i32_0 = arith.constant 0 : i32
    %c0_i32_1 = arith.constant 0 : i32
    return %c0_i32, %c0_i32_0 : i32, i32
  }
  func.func @transform_8(%arg0: i32, %arg1: i32) -> (i32, i32) {
    %c0_i32 = arith.constant 0 : i32
    %c0_i32_0 = arith.constant 0 : i32
    %c0_i32_1 = arith.constant 0 : i32
    return %c0_i32, %c0_i32_0 : i32, i32
  }
  func.func @transform_9(%arg0: i32, %arg1: i32) -> (i32, i32) {
    %c0_i32 = arith.constant 0 : i32
    %c0_i32_0 = arith.constant 0 : i32
    %c0_i32_1 = arith.constant 0 : i32
    return %c0_i32, %c0_i32_0 : i32, i32
  }
  func.func @transform_10(%arg0: i32, %arg1: i32) -> (i32, i32) {
    %c0_i32 = arith.constant 0 : i32
    %c0_i32_0 = arith.constant 0 : i32
    %c0_i32_1 = arith.constant 0 : i32
    return %c0_i32, %c0_i32_0 : i32, i32
  }
  func.func @transform_11(%arg0: i32, %arg1: i32) -> (i32, i32) {
    %c0_i32 = arith.constant 0 : i32
    %c0_i32_0 = arith.constant 0 : i32
    return %arg0, %c0_i32 : i32, i32
  }
}

</mosaic_0001>

<bundles_post_ra>
// kernel: tpu_custom_call.1
= control target key start
LH: loop header
LB: loop body
LE: loop exit
PB: predicated region body
PF: predicated region fallthrough
CT: control target
= control target key end

     0   :  { %s9570_s0 = inlined_call_operand.vmem [shape: bf16[8,16,128], index: 0, kind: input, shape index: {}]   ;;  %s9571_s1 = inlined_call_operand.hbm [shape: bf16[128,384], index: 1, kind: input, shape index: {}]   ;;  %s9572_s2 = inlined_call_operand.hbm [shape: bf16[128,384], index: 2, kind: input, shape index: {}]   ;;  %s9573_s3 = inlined_call_operand.vmem [shape: f32[1,384], index: 3, kind: input, shape index: {}]   ;;  %s9574_s4 = inlined_call_operand.vmem [shape: f32[1,384], index: 4, kind: input, shape index: {}]   ;;  %s9575_s5 = inlined_call_operand.hbm [shape: bf16[128,384], index: 5, kind: input, shape index: {}]   ;;  %s9576_s6 = inlined_call_operand.hbm [shape: bf16[128,384], index: 6, kind: input, shape index: {}]   ;;  %s9577_s7 = inlined_call_operand.vmem [shape: f32[1,384], index: 7, kind: input, shape index: {}]   ;;  %s9578_s8 = inlined_call_operand.vmem [shape: f32[1,384], index: 8, kind: input, shape index: {}]   ;;  %s9579_s9 = inlined_call_operand.vmem [shape: bf16[128,4], index: 9, kind: input, shape index: {}]   ;;  %s9580_s10 = inlined_call_operand.vmem [shape: f32[1,4], index: 10, kind: input, shape index: {}]   ;;  %s9581_s11 = inlined_call_operand.vmem [shape: f32[8,4], index: 11, kind: output, shape index: {}]  }
   0x1   :  { %9593 = sst [smem:[#allocation22_spill]] %s9571_s1 }
   0x2   :  { %16 = vsyncpa [#allocation7], 0 }
   0x3   :  { %17 = vsyncpa [#allocation9], 0 }
   0x4   :  { %18 = vsyncpa [#allocation12], 0  ;;  %s8140_s17 = smov 0   ;;  %s8142_s18 = smov 0  }
   0x5   :  { %s8144_s19 = smov 0   ;;  %s8146_s20 = smov 0  }
   0x6   :  { %s8148_s21 = smov 0  }
   0x7 LB: > { %s6253_s22 = sadd.s32 4294967295, %s8066_s21   ;;  %s33_s23 = sadd.s32 1, %s8062_s20  ;;  %s8066_s21 = sphi %s8148_s21, %s24_s21   ;;  %s8062_s20 = sphi %s8146_s20, %s9620_s20   ;;  %s8058_s19 = sphi %s8144_s19, %s9619_s19   ;;  %s8054_s18 = sphi %s8142_s18, %s9618_s18   ;;  %s8050_s17 = sphi %s8140_s17, %s9617_s17  }
   0x8   : > { %p34_p0 = scmp.ge.s32.totalorder %s33_s23, 2  ;;  %s45_s24 = sadd.s32 1, %s8054_s18 }
   0x9   : > { %p52_p1 = scmp.ne.s32.totalorder %s8054_s18, %s8050_s17  ;;  %p53_p2 = scmp.eq.s32.totalorder %s8066_s21, 0 }
   0xa   : > { %s9622_s23 = smov (%p34_p0, %s33_s23), 0  ;;  %p6254_p4 = scmp.ge.s32.totalorder %s8066_s21, 1 }
   0xb   : > { %9594 = sst [smem:[#allocation16_spill]] %s9622_s23  ;;  %p8173_p3 = por %p53_p2, %p52_p1 }
   0xc   : > { %s41_s26 = ssub.s32 %s8062_s20, %s9622_s23  ;;  %p305_p5 = scmp.lt.s32.totalorder %s8066_s21, 3 }
   0xd   : > { %p43_p6 = scmp.eq.s32.totalorder %s41_s26, 0  ;;  %p8185_p8 = scmp.eq.s32.totalorder %s6253_s22, 0 }
   0xe   : > { %p8181_p7 = pnand %p6254_p4, %p305_p5  ;;  %s8068_s12 = smov [#allocation8]  }
   0xf   : > { %s8190_s29 = scalar_select %p43_p6, %s8054_s18, %s45_s24  }
  0x10   : > { %p7339_p9 = pneg %p8181_p7  ;;  %s330_s13 = sshll.u32 %s8068_s12, 4  ;;  %s331_s13 = int_to_ptr.vmem [resolvable:$true] %s330_s13 }
  0x11   : > { %9598 = sst [smem:[#allocation17_spill]] %s8190_s29  ;;  %s7923_s14 = scalar_lea.vmem %s331_s13, 3072 }
  0x12   : > { %p8196_p10 = pnand %p8185_p8, %p7339_p9  ;;  %p7924_p12 = scmp.ne.s32.totalorder %s331_s13, %s7923_s14 }
  0x13   : > { %p7931_p1 = scmp.lt.s32.totalorder %s331_s13, %s331_s13  ;;  %p7932_p2 = scmp.lt.s32.totalorder %s7923_s14, %s7923_s14 }
  0x14   : > { %p7914_p11 = pneg %p8196_p10 }
  0x15   : > { %p7933_p4 = por %p7932_p2, %p7931_p1 }
  0x16   : > { %p7926_p13 = pnand %p7924_p12, %p7914_p11 }
  0x18   : > { %p7927_p0 = pneg %p7926_p13 }
  0x1a   : > { %p7934_p5 = pnand %p7933_p4, %p7927_p0 }
  0x1c   : > { %7937 = shalt.err (!%p7934_p5)
}
  0x1d   : > { %s8069_s15 = smov 192   ;;  %s8070_s16 = smov 12  }
  0x1e   : > { %7345 = dma.hbm_to_vmem [thread:$0]  (!%p8196_p10), %s9572_s2, 3072, %s331_s13, [#allocation9], %s8069_s15, %s8069_s15, %s8070_s16  }
  0x1f   : > { %s8071_s26 = smov [#allocation6]   ;;  %s8072_s23 = smov [#allocation10]  }
  0x20   : > { %s317_s12 = sshll.u32 %s8071_s26, 4  ;;  %s349_s29 = sshll.u32 %s8072_s23, 4  ;;  %s318_s12 = int_to_ptr.vmem [resolvable:$true] %s317_s12  ;;  %s350_s29 = int_to_ptr.vmem [resolvable:$true] %s349_s29 }
  0x21   : > { %s7949_s14 = scalar_lea.vmem %s318_s12, 3072  ;;  %p7957_p13 = scmp.lt.s32.totalorder %s318_s12, %s318_s12 }
  0x22   : > { %p7950_p6 = scmp.ne.s32.totalorder %s318_s12, %s7949_s14  ;;  %p7958_p0 = scmp.lt.s32.totalorder %s7949_s14, %s7949_s14 }
  0x24   : > { %p7952_p9 = pnand %p7950_p6, %p7914_p11  ;;  %p7959_p1 = por %p7958_p0, %p7957_p13 }
  0x26   : > { %p7953_p12 = pneg %p7952_p9 }
  0x28   : > { %p7960_p2 = pnand %p7959_p1, %p7953_p12 }
  0x2a   : > { %7963 = shalt.err (!%p7960_p2)
}
  0x2b   : > { %s9600_s1 = sld [smem:[#allocation22_spill]]  ;;  %s7975_s22 = scalar_lea.vmem %s350_s29, 3072 }
  0x2c   : > { %p7976_p4 = scmp.ne.s32.totalorder %s350_s29, %s7975_s22  ;;  %p7983_p9 = scmp.lt.s32.totalorder %s350_s29, %s350_s29 }
  0x2d   : > { %p7984_p13 = scmp.lt.s32.totalorder %s7975_s22, %s7975_s22 }
  0x2e   : > { %p7978_p5 = pnand %p7976_p4, %p7914_p11 }
  0x2f   : > { %p7985_p12 = por %p7984_p13, %p7983_p9 }
  0x30   : > { %p7979_p6 = pneg %p7978_p5 }
  0x31   : > { %7342 = dma.hbm_to_vmem [thread:$0]  (!%p8196_p10), %s9600_s1, 3072, %s318_s12, [#allocation7], %s8069_s15, %s8069_s15, %s8070_s16  }
  0x32   : > { %p7986_p0 = pnand %p7985_p12, %p7979_p6 }
  0x34   : > { %7989 = shalt.err (!%p7986_p0)
}
  0x35   : > { %7348 = dma.hbm_to_vmem [thread:$0]  (!%p8196_p10), %s9575_s5, 3072, %s350_s29, [#allocation9], %s8069_s15, %s8069_s15, %s8070_s16  }
  0x36   : > { %s8073_s12 = smov [#allocation11]  }
  0x37   : > { %s362_s14 = sshll.u32 %s8073_s12, 4  ;;  %s363_s14 = int_to_ptr.vmem [resolvable:$true] %s362_s14 }
  0x38   : > { %s8001_s13 = scalar_lea.vmem %s363_s14, 3072  ;;  %p8009_p5 = scmp.lt.s32.totalorder %s363_s14, %s363_s14 }
  0x39   : > { %p8002_p1 = scmp.ne.s32.totalorder %s363_s14, %s8001_s13  ;;  %p8010_p6 = scmp.lt.s32.totalorder %s8001_s13, %s8001_s13 }
  0x3b   : > { %p8004_p2 = pnand %p8002_p1, %p7914_p11  ;;  %p8011_p9 = por %p8010_p6, %p8009_p5 }
  0x3d   : > { %p8005_p4 = pneg %p8004_p2 }
  0x3f   : > { %p8012_p13 = pnand %p8011_p9, %p8005_p4 }
  0x41   : > { %8015 = shalt.err (!%p8012_p13)
}
  0x42   : > { %7351 = dma.hbm_to_vmem [thread:$0]  (!%p8196_p10), %s9576_s6, 3072, %s363_s14, [#allocation12], %s8069_s15, %s8069_s15, %s8070_s16  }
  0x43   : > { %p6259_p12 = scmp.ge.s32.totalorder %s8066_s21, 2 }
  0x45   : > { %384 = sbr.rel (%p6259_p12) target bundleno = 83 (0x53), region = 56 }
  0x4a   : > { %387 = sbr.rel (!%p8173_p3) target bundleno = 83 (0x53), region = 60  ;;  %s389_s22 = sand.u32 (%p8173_p3), 1, %s8054_s18  }
  0x4b   : > { %s6261_s24 = sshll.u32 (%p8173_p3), %s8062_s20, 2  ;;  %s6260_s26 = sshll.u32 (%p8173_p3), %s389_s22, 5 }
  0x4c   : > { %s396_s13 = scalar_lea.vmem (%p8173_p3), %s9570_s0, %s6261_s24  ;;  %s391_s1 = scalar_lea.vmem (%p8173_p3), [#allocation5], %s6260_s26 }
  0x4d   : > { %v413_v0 = vld [vmem:[%s396_s13] sm:$0xf] (%p8173_p3)  ;;  %v415_v1 = vld [vmem:[%s396_s13 + $0x8] sm:$0xf] (%p8173_p3)  ;;  %v417_v2 = vld [vmem:[%s396_s13 + $0x10] sm:$0xf] (%p8173_p3) }
  0x4e   : > { %414 = vst [vmem:[%s391_s1] sm:$0xf] (%p8173_p3), %v413_v0  ;;  %416 = vst [vmem:[%s391_s1 + $0x4] sm:$0xf] (%p8173_p3), %v415_v1  ;;  %v419_v3 = vld [vmem:[%s396_s13 + $0x18] sm:$0xf] (%p8173_p3) }
  0x4f   : > { %v421_v4 = vld [vmem:[%s396_s13 + $0x20] sm:$0xf]  ;;  %418 = vst [vmem:[%s391_s1 + $0x8] sm:$0xf] %v417_v2  ;;  %420 = vst [vmem:[%s391_s1 + $0xc] sm:$0xf] %v419_v3 }
  0x50   : > { %422 = vst [vmem:[%s391_s1 + $0x10] sm:$0xf] %v421_v4  ;;  %v423_v5 = vld [vmem:[%s396_s13 + $0x28] sm:$0xf]  ;;  %v425_v6 = vld [vmem:[%s396_s13 + $0x30] sm:$0xf] }
  0x51   : > { %v427_v7 = vld [vmem:[%s396_s13 + $0x38] sm:$0xf]  ;;  %424 = vst [vmem:[%s391_s1 + $0x14] sm:$0xf] %v423_v5  ;;  %426 = vst [vmem:[%s391_s1 + $0x18] sm:$0xf] %v425_v6 }
  0x52   : > { %428 = vst [vmem:[%s391_s1 + $0x1c] sm:$0xf] %v427_v7 }
  0x53 PF: > { %471 = sbr.rel (%p8181_p7) target bundleno = 4457 (0x1169), region = 101 }
  0x58   : > { %s474_s25 = sand.u32 1, %s8050_s17  }
  0x59   : > { %s6263_s15 = sshll.u32 %s474_s25, 5 }
  0x5a   : > { %s8257_s16 = scalar_lea.vmem [#allocation5], %s6263_s15 }
  0x5b   : > { %8037 = dma.done.wait (%p8185_p8), [#allocation7], 3072  }
  0x5c   : > { %8039 = vsyncadd (%p8185_p8), [#allocation7], 4294964224 }
  0x5d   : > { %8041 = dma.done.wait (%p8185_p8), [#allocation9], 6144  }
  0x5e   : > { %8043 = vsyncadd (%p8185_p8), [#allocation9], 4294961152 }
  0x5f   : > { %8045 = dma.done.wait (%p8185_p8), [#allocation12], 3072  }
  0x60   : > { %8047 = vsyncadd (%p8185_p8), [#allocation12], 4294964224  ;;  %p6268_p3 = scmp.ne.s32.totalorder %s8058_s19, 0 }
  0x62   : > { %537 = sbr.rel (%p6268_p3) target bundleno = 105 (0x69), region = 125 }
  0x67   : > { %v8074_v8 = vmov 0.0  }
  0x68   : > { %538 = vst [vmem:[#allocation4] sm:$0xff] %v8074_v8  ;;  %539 = vst [vmem:[#allocation4 + $0x8] sm:$0xff] %v8074_v8 }
  0x69 PF: > { %v7412_v9 = vld [vmem:[#allocation6 + $0xac] ss:$12 sps:$4 sm:$0xff]   ;;  %v7414_v10 = vld [vmem:[#allocation6 + $0xa8] ss:$12 sps:$4 sm:$0xff]   ;;  %v9585_v11 = vmov 0   ;;  %v7439_v24 = vld [vmem:[%s8257_s16] sm:$0xff]  }
  0x6a   : > { %781 = vmatprep.mubr.bf16.mxu0 %v9585_v11  ;;  %749 = vmatprep.subr.bf16.mxu0 %v7412_v9  ;;  %v7415_v12 = vld [vmem:[#allocation6 + $0x94] ss:$12 sps:$4 sm:$0xff]   ;;  %v7417_v13 = vld [vmem:[#allocation6 + $0x90] ss:$12 sps:$4 sm:$0xff]   ;;  %v7420_v15 = vld [vmem:[#allocation6 + $0x78] ss:$12 sps:$4 sm:$0xff]  }
  0x6b   : > { %750 = vmatpush1.bf16.msra.mxu0 %v7414_v10  ;;  %v7418_v14 = vld [vmem:[#allocation6 + $0x7c] ss:$12 sps:$4 sm:$0xff]   ;;  %v7421_v16 = vld [vmem:[#allocation6 + $0x64] ss:$12 sps:$4 sm:$0xff]   ;;  %v7423_v18 = vld [vmem:[#allocation6 + $0x60] ss:$12 sps:$4 sm:$0xff]   ;;  %6951 = vmatprep.mubr.bf16.mxu1 %v7439_v24  ;;  %v582_v10 = vlaneseq }
  0x6c   : > { %751 = vmatprep.subr.bf16.mxu0 %v7415_v12  ;;  %v7430_v17 = vld [vmem:[#allocation6 + $0xb0] ss:$12 sps:$4 sm:$0xff]   ;;  %v7434_v19 = vld [vmem:[#allocation6 + $0x98] ss:$12 sps:$4 sm:$0xff]   ;;  %v7438_v21 = vld [vmem:[#allocation6 + $0x80] ss:$12 sps:$4 sm:$0xff]  }
  0x6d   : > { %6935 = vmatprep.subr.bf16.mxu1 %v7430_v17  ;;  %v7424_v20 = vld [vmem:[#allocation6 + $0x4c] ss:$12 sps:$4 sm:$0xff]   ;;  %v7426_v22 = vld [vmem:[#allocation6 + $0x48] ss:$12 sps:$4 sm:$0xff]   ;;  %v7429_v26 = vld [vmem:[#allocation6 + $0x30] ss:$12 sps:$4 sm:$0xff]  }
  0x6e   : > { %6936 = vmatpush3.bf16.msra.mxu1 %v7430_v17  ;;  %v7427_v23 = vld [vmem:[#allocation6 + $0x34] ss:$12 sps:$4 sm:$0xff]   ;;  %v7431_v27 = vld [vmem:[#allocation6 + $0x1c] ss:$12 sps:$4 sm:$0xff]   ;;  %v7433_v29 = vld [vmem:[#allocation6 + $0x18] ss:$12 sps:$4 sm:$0xff]  }
  0x6f   : > { %752 = vmatpush1.bf16.msra.mxu0 %v7417_v13  ;;  %6937 = vmatprep.subr.bf16.mxu1 %v7434_v19  ;;  %v7443_v25 = vld [vmem:[#allocation6 + $0x68] ss:$12 sps:$4 sm:$0xff]   ;;  %v7447_v28 = vld [vmem:[#allocation6 + $0x50] ss:$12 sps:$4 sm:$0xff]   ;;  %v7452_v31 = vld [vmem:[#allocation6 + $0x38] ss:$12 sps:$4 sm:$0xff]  }
  0x70   : > { %753 = vmatprep.subr.bf16.mxu0 %v7418_v14  ;;  %v7435_v30 = vld [vmem:[#allocation6 + $0x4] ss:$12 sps:$4 sm:$0xff]   ;;  %v7437_v32 = vld [vmem:[#allocation6] ss:$12 sps:$4 sm:$0xff]   ;;  %v8276_v35 = vld [vmem:[#allocation8 + $0xa8] ss:$12 sps:$4 sm:$0xff]  }
  0x71   : > { %v8274_v33 = vld [vmem:[#allocation8 + $0xac] ss:$12 sps:$4 sm:$0xff]   ;;  %v8279_v36 = vld [vmem:[#allocation8 + $0x94] ss:$12 sps:$4 sm:$0xff]   ;;  %v8282_v38 = vld [vmem:[#allocation8 + $0x90] ss:$12 sps:$4 sm:$0xff]  }
  0x72   : > { %6938 = vmatpush3.bf16.msra.mxu1 %v7434_v19  ;;  %v7456_v34 = vld [vmem:[#allocation6 + $0x20] ss:$12 sps:$4 sm:$0xff]   ;;  %v7461_v37 = vld [vmem:[#allocation6 + $0x8] ss:$12 sps:$4 sm:$0xff]   ;;  %v8290_v41 = vld [vmem:[#allocation8 + $0x78] ss:$12 sps:$4 sm:$0xff]  }
  0x73   : > { %754 = vmatpush1.bf16.msra.mxu0 %v7420_v15  ;;  %6939 = vmatprep.subr.bf16.mxu1 %v7438_v21  ;;  %v8286_v39 = vld [vmem:[#allocation8 + $0x7c] ss:$12 sps:$4 sm:$0xff]   ;;  %v8293_v42 = vld [vmem:[#allocation8 + $0x64] ss:$12 sps:$4 sm:$0xff]   ;;  %v8295_v43 = vld [vmem:[#allocation8 + $0x60] ss:$12 sps:$4 sm:$0xff]  }
  0x74   : > { %755 = vmatprep.subr.bf16.mxu0 %v7421_v16  ;;  %v7448_v40 = vld [vmem:[%s8257_s16 + $0x8] sm:$0xff]   ;;  %v7457_v44 = vld [vmem:[%s8257_s16 + $0x10] sm:$0xff]   ;;  %v9583_v45 = vmov 0.0   ;;  %v7473_v48 = vld [vmem:[#allocation8 + $0x98] ss:$12 sps:$4 sm:$0xff]   ;;  %vm8077_vm0 = vmmov 0  }
  0x75   : > { %v7472_v46 = vld [vmem:[#allocation8 + $0xb0] ss:$12 sps:$4 sm:$0xff]   ;;  %v8299_v47 = vld [vmem:[#allocation8 + $0x4c] ss:$12 sps:$4 sm:$0xff]   ;;  %v7458_v49 = vld [vmem:[#allocation8 + $0x48] ss:$12 sps:$4 sm:$0xff]  }
  0x76   : > { %6940 = vmatpush3.bf16.msra.mxu1 %v7438_v21  ;;  %v7464_v50 = vld [vmem:[#allocation8 + $0x34] ss:$12 sps:$4 sm:$0xff]   ;;  %v7465_v52 = vld [vmem:[%s8257_s16 + $0x18] sm:$0xff]   ;;  %v7471_v57 = vld [vmem:[#allocation8 + $0x4] ss:$12 sps:$4 sm:$0xff]   ;;  %v8340_v14 = vshrl.u32 %v582_v10, 7 }
  0x77   : > { %756 = vmatpush1.bf16.msra.mxu0 %v7423_v18  ;;  %6941 = vmatprep.subr.bf16.mxu1 %v7443_v25  ;;  %v7474_v51 = vld [vmem:[#allocation8 + $0x80] ss:$12 sps:$4 sm:$0xff]   ;;  %v7462_v53 = vld [vmem:[#allocation8 + $0x30] ss:$12 sps:$4 sm:$0xff]   ;;  %v7475_v55 = vld [vmem:[#allocation8 + $0x68] ss:$12 sps:$4 sm:$0xff]  }
  0x78   : > { %757 = vmatprep.subr.bf16.mxu0 %v7424_v20  ;;  %v7468_v54 = vld [vmem:[#allocation8 + $0x1c] ss:$12 sps:$4 sm:$0xff]   ;;  %v7466_v56 = vld [vmem:[#allocation8 + $0x18] ss:$12 sps:$4 sm:$0xff]   ;;  %v7469_v59 = vld [vmem:[#allocation8] ss:$12 sps:$4 sm:$0xff]  }
  0x79   : > { %v7476_v58 = vld [vmem:[#allocation8 + $0x50] ss:$12 sps:$4 sm:$0xff]   ;;  %v7477_v61 = vld [vmem:[#allocation8 + $0x38] ss:$12 sps:$4 sm:$0xff]   ;;  %v7478_v63 = vld [vmem:[#allocation8 + $0x20] ss:$12 sps:$4 sm:$0xff]  }
  0x7a   : > { %6942 = vmatpush3.bf16.msra.mxu1 %v7443_v25  ;;  %v1326_v60 = vld [vmem:[#allocation4] sm:$0xff]  ;;  %v7481_v2 = vld [vmem:[#allocation8 + $0x98] ss:$12 sps:$4 sm:$0xff]   ;;  %v7482_v3 = vld [vmem:[#allocation8 + $0x80] ss:$12 sps:$4 sm:$0xff]   ;;  %v8343_v17 = vsub.s32 0, %v8340_v14 }
  0x7b   : > { %758 = vmatpush1.bf16.msra.mxu0 %v7426_v22  ;;  %6943 = vmatprep.subr.bf16.mxu1 %v7447_v28  ;;  %v1327_v62 = vpack.c.bf16 %v1326_v60, %v1326_v60  ;;  %v7479_v0 = vld [vmem:[#allocation8 + $0x8] ss:$12 sps:$4 sm:$0xff]   ;;  %v7480_v1 = vld [vmem:[#allocation8 + $0xb0] ss:$12 sps:$4 sm:$0xff]   ;;  %v7485_v6 = vld [vmem:[#allocation8 + $0x38] ss:$12 sps:$4 sm:$0xff]  }
  0x7c   : > { %759 = vmatprep.subr.bf16.mxu0 %v7427_v23  ;;  %v7483_v4 = vld [vmem:[#allocation8 + $0x68] ss:$12 sps:$4 sm:$0xff]   ;;  %v7484_v5 = vld [vmem:[#allocation8 + $0x50] ss:$12 sps:$4 sm:$0xff]   ;;  %v7486_v7 = vld [vmem:[#allocation8 + $0x20] ss:$12 sps:$4 sm:$0xff]  }
  0x7d   : > { %v7487_v8 = vld [vmem:[#allocation8 + $0x8] ss:$12 sps:$4 sm:$0xff]   ;;  %9601 = vst [vmem:[#allocation18_spill] sm:$0xff] %v8343_v17  ;;  %v8348_v18 = vld [vmem:[%s9573_s3] sm:$0x7]  ;;  %v8355_v23 = vsub.s32 1, %v8340_v14 }
  0x7e   : > { %6944 = vmatpush3.bf16.msra.mxu1 %v7447_v28  ;;  %v585_v22 = vrot.slane %v8348_v18, %v8343_v17  ;;  %vm912_vm1 = vcmask 1041409   ;;  %vm915_vm2 = vcmask 1042434   ;;  %vm918_vm3 = vcmask 1043459   ;;  %p6741_p7 = scmp.ne.s32.totalorder %s8058_s19, 1 }
  0x7f   : > { %760 = vmatpush1.bf16.msra.mxu0 %v7429_v26  ;;  %6945 = vmatprep.subr.bf16.mxu1 %v7452_v31  ;;  %9602 = vst [vmem:[#allocation19_spill] sm:$0xff] %v8355_v23  ;;  %vm921_vm4 = vcmask 1044484   ;;  %vm924_vm5 = vcmask 1045509   ;;  %vm927_vm6 = vcmask 1046534   ;;  %vm930_vm7 = vcmask 1047559  }
  0x80   : > { %761 = vmatprep.subr.bf16.mxu0 %v7431_v27 }
  0x82   : > { %6946 = vmatpush3.bf16.msra.mxu1 %v7452_v31 }
  0x83   : > { %762 = vmatpush1.bf16.msra.mxu0 %v7433_v29  ;;  %6947 = vmatprep.subr.bf16.mxu1 %v7456_v34  ;;  %v8365_v29 = vrot.slane %v8348_v18, %v8355_v23 }
  0x84   : > { %763 = vmatprep.subr.bf16.mxu0 %v7435_v30 }
  0x86   : > { %6948 = vmatpush3.bf16.msra.mxu1 %v7456_v34 }
  0x87   : > { %764 = vmatpush1.bf16.msra.mxu0 %v7437_v32  ;;  %6949 = vmatprep.subr.bf16.mxu1 %v7461_v37  ;;  %v8372_v32 = vld [vmem:[%s9574_s4] sm:$0x7] }
  0x88   : > { %1488 = vmatprep.subr.bf16.mxu0 %v8274_v33 }
  0x8a   : > { %782 = vmatmul.mubr.bf16.vlgmr.msra.gmra.mxu0 %v7439_v24  ;;  %6950 = vmatpush3.bf16.msra.mxu1 %v7461_v37 }
  0x8b   : > { %1489 = vmatpush1.bf16.msra.mxu0 %v8276_v35  ;;  %791 = vmatprep.mubr.bf16.mxu0 %v9585_v11 }
  0x8c   : > { %1490 = vmatprep.subr.bf16.mxu0 %v8279_v36  ;;  %6959 = vmatprep.subr.bf16.mxu1 %v9583_v45 }
  0x8d   : > { %6952 = vmatmul.mubr.bf16.vlgmr.msra.gmra.mxu1 %v7448_v40 }
  0x8e   : > { %6955 = vmatprep.mubr.bf16.mxu1 %v7457_v44  ;;  %6960 = vmatpush3.bf16.msra.mxu1 %v7472_v46  ;;  %v8395_v46 = vrot.slane %v8372_v32, %v8355_v23 }
  0x8f   : > { %1491 = vmatpush1.bf16.msra.mxu0 %v8282_v38  ;;  %6961 = vmatprep.subr.bf16.mxu1 %v9583_v45 }
  0x90   : > { %1492 = vmatprep.subr.bf16.mxu0 %v8286_v39 }
  0x92   : > { %792 = vmatmul.mubr.bf16.gmra.mxu0 %v7448_v40  ;;  %6962 = vmatpush3.bf16.msra.mxu1 %v7473_v48 }
  0x93   : > { %1493 = vmatpush1.bf16.msra.mxu0 %v8290_v41  ;;  %801 = vmatprep.mubr.bf16.mxu0 %v9585_v11 }
  0x94   : > { %1494 = vmatprep.subr.bf16.mxu0 %v8293_v42  ;;  %6963 = vmatprep.subr.bf16.mxu1 %v9583_v45 }
  0x95   : > { %6956 = vmatmul.mubr.bf16.gmra.mxu1 %v7465_v52 }
  0x96   : > { %6964 = vmatpush3.bf16.msra.mxu1 %v7474_v51  ;;  %6975 = vmatprep.mubr.msk.bf16.mxu1 %vm8077_vm0, %v9583_v45 }
  0x97   : > { %1495 = vmatpush1.bf16.msra.mxu0 %v8295_v43  ;;  %6965 = vmatprep.subr.bf16.mxu1 %v9583_v45 }
  0x98   : > { %1496 = vmatprep.subr.bf16.mxu0 %v8299_v47 }
  0x9a   : > { %802 = vmatmul.mubr.bf16.gmra.mxu0 %v7457_v44  ;;  %6966 = vmatpush3.bf16.msra.mxu1 %v7475_v55 }
  0x9b   : > { %1497 = vmatpush1.bf16.msra.mxu0 %v7458_v49  ;;  %811 = vmatprep.mubr.bf16.mxu0 %v9585_v11 }
  0x9c   : > { %1498 = vmatprep.subr.bf16.mxu0 %v7464_v50  ;;  %6967 = vmatprep.subr.bf16.mxu1 %v9583_v45 }
  0x9e   : > { %6968 = vmatpush3.bf16.msra.mxu1 %v7476_v58 }
  0x9f   : > { %1499 = vmatpush1.bf16.msra.mxu0 %v7462_v53  ;;  %6969 = vmatprep.subr.bf16.mxu1 %v9583_v45 }
  0xa0   : > { %1500 = vmatprep.subr.bf16.mxu0 %v7468_v54 }
  0xa2   : > { %812 = vmatmul.mubr.bf16.gmra.mxu0 %v7465_v52  ;;  %6970 = vmatpush3.bf16.msra.mxu1 %v7477_v61 }
  0xa3   : > { %1501 = vmatpush1.bf16.msra.mxu0 %v7466_v56  ;;  %1520 = vmatprep.mubr.bf16.mxu0 %v9585_v11 }
  0xa4   : > { %1502 = vmatprep.subr.bf16.mxu0 %v7471_v57  ;;  %6971 = vmatprep.subr.bf16.mxu1 %v9583_v45 }
  0xa6   : > { %6972 = vmatpush3.bf16.msra.mxu1 %v7478_v63 }
  0xa7   : > { %1503 = vmatpush1.bf16.msra.mxu0 %v7469_v59  ;;  %6973 = vmatprep.subr.bf16.mxu1 %v9583_v45 }
  0xa8   : > { %1757 = vmatprep.subr.bf16.mxu0 %v8274_v33 }
  0xaa   : > { %1521 = vmatmul.mubr.bf16.vlgmr.msra.gmra.mxu0 %v1327_v62  ;;  %6974 = vmatpush3.bf16.msra.mxu1 %v7479_v0 }
  0xab   : > { %1758 = vmatpush1.bf16.msra.mxu0 %v8276_v35  ;;  %1789 = vmatprep.mubr.bf16.mxu0 %v9585_v11 }
  0xac   : > { %1759 = vmatprep.subr.bf16.mxu0 %v8279_v36  ;;  %6979 = vmatprep.subr.bf16.mxu1 %v9583_v45 }
  0xad   : > { %6976 = vmatmul.mubr.bf16.vlgmr.msra.gmra.mxu1 %v1327_v62 }
  0xae   : > { %6995 = vmatprep.mubr.msk.bf16.mxu1 %vm8077_vm0, %v9583_v45  ;;  %6980 = vmatpush3.bf16.msra.mxu1 %v7480_v1 }
  0xaf   : > { %1760 = vmatpush1.bf16.msra.mxu0 %v8282_v38  ;;  %6981 = vmatprep.subr.bf16.mxu1 %v9583_v45 }
  0xb0   : > { %1761 = vmatprep.subr.bf16.mxu0 %v8286_v39 }
  0xb2   : > { %6982 = vmatpush3.bf16.msra.mxu1 %v7481_v2 }
  0xb3   : > { %1762 = vmatpush1.bf16.msra.mxu0 %v8290_v41  ;;  %6983 = vmatprep.subr.bf16.mxu1 %v9583_v45  ;;  %v8389_v41 = vrot.slane %v8372_v32, %v8343_v17 }
  0xb4   : > { %1763 = vmatprep.subr.bf16.mxu0 %v8293_v42 }
  0xb6   : > { %6984 = vmatpush3.bf16.msra.mxu1 %v7482_v3 }
  0xb7   : > { %1764 = vmatpush1.bf16.msra.mxu0 %v8295_v43  ;;  %6985 = vmatprep.subr.bf16.mxu1 %v9583_v45 }
  0xb8   : > { %1765 = vmatprep.subr.bf16.mxu0 %v8299_v47 }
  0xba   : > { %6986 = vmatpush3.bf16.msra.mxu1 %v7483_v4 }
  0xbb   : > { %1766 = vmatpush1.bf16.msra.mxu0 %v7458_v49  ;;  %6987 = vmatprep.subr.bf16.mxu1 %v9583_v45 }
  0xbc   : > { %1767 = vmatprep.subr.bf16.mxu0 %v7464_v50 }
  0xbe   : > { %6988 = vmatpush3.bf16.msra.mxu1 %v7484_v5 }
  0xbf   : > { %1768 = vmatpush1.bf16.msra.mxu0 %v7462_v53  ;;  %6989 = vmatprep.subr.bf16.mxu1 %v9583_v45 }
  0xc0   : > { %1769 = vmatprep.subr.bf16.mxu0 %v7468_v54 }
  0xc2   : > { %6990 = vmatpush3.bf16.msra.mxu1 %v7485_v6 }
  0xc3   : > { %1770 = vmatpush1.bf16.msra.mxu0 %v7466_v56  ;;  %6991 = vmatprep.subr.bf16.mxu1 %v9583_v45 }
  0xc4   : > { %1771 = vmatprep.subr.bf16.mxu0 %v7471_v57 }
  0xc6   : > { %6992 = vmatpush3.bf16.msra.mxu1 %v7486_v7 }
  0xc7   : > { %1772 = vmatpush1.bf16.msra.mxu0 %v7469_v59  ;;  %6993 = vmatprep.subr.bf16.mxu1 %v9583_v45 }
  0xc8   : > { %2027 = vmatprep.subr.bf16.mxu0 %v8274_v33 }
  0xca   : > { %6994 = vmatpush3.bf16.msra.mxu1 %v7487_v8 }
  0xcb   : > { %6999 = vmatprep.subr.bf16.mxu1 %v9583_v45 }
 0x14a   : > { %v783_v9 = vpop.f32.mrf.mxu0 }
 0x14b   : > { %v8361_v28 = vadd.f32 %v783_v9, %v585_v22 }
 0x14c   : > { %v785_v12 = vpop.f32.mrf.mxu0 }
 0x14d   : > { %v8350_v21 = vpop.f32.mrf.mxu1  ;;  %v966_v42 = vrot.slane %v8361_v28, 1  ;;  %v1015_v48 = vrot.slane %v8361_v28, 2  ;;  %v8400_v49 = vadd.f32 %v785_v12, %v8365_v29 }
 0x14e   : > { %v787_v13 = vpop.f32.mrf.mxu0 }
 0x14f   : > { %v8357_v25 = vadd.f32 %v787_v13, %v585_v22  ;;  %v8359_v27 = vpop.f32.mrf.mxu1 }
 0x150   : > { %v789_v15 = vpop.f32.mrf.mxu0 }
 0x151   : > { %v8377_v34 = vadd.f32 %v789_v15, %v8365_v29  ;;  %v8381_v37 = vpop.f32.mrf.mxu1  ;;  %v911_v38 = vrot.slane %v8357_v25, 7  ;;  %v1016_v39 = vrot.slane %v8357_v25, 1  ;;  %v967_v51 = vsel %vm912_vm1, %v8357_v25, %v966_v42 }
 0x152   : > { %v793_v16 = vpop.f32.mrf.mxu0 }
 0x153   : > { %v8367_v30 = vadd.f32 %v793_v16, %v585_v22  ;;  %v8408_v54 = vpop.f32.mrf.mxu1  ;;  %v913_v55 = vsel %vm912_vm1, %v911_v38, %v8361_v28  ;;  %v932_v56 = vrot.slane %v8377_v34, 7  ;;  %v1017_v58 = vsel %vm912_vm1, %v1016_v39, %v1015_v48 }
 0x154   : > { %v795_v19 = vpop.f32.mrf.mxu0 }
 0x155   : > { %v914_v44 = vrot.slane %v8367_v30, 6  ;;  %v968_v47 = vrot.slane %v8367_v30, 7  ;;  %v8403_v50 = vadd.f32 %v795_v19, %v8365_v29  ;;  %v8437_v10 = vpop.f32.mrf.mxu1 }
 0x156   : > { %v797_v20 = vpop.f32.mrf.mxu0 }
 0x157   : > { %v8374_v33 = vadd.f32 %v797_v20, %v585_v22  ;;  %v916_v1 = vsel %vm915_vm2, %v914_v44, %v913_v55  ;;  %v969_v3 = vsel %vm915_vm2, %v968_v47, %v967_v51  ;;  %v934_v6 = vrot.slane %v8403_v50, 6  ;;  %v8458_v47 = vpop.f32.mrf.mxu1 }
 0x158   : > { %v799_v24 = vpop.f32.mrf.mxu0 }
 0x159   : > { %v970_v52 = vrot.slane %v8374_v33, 6  ;;  %v8416_v59 = vadd.f32 %v799_v24, %v8365_v29  ;;  %v917_v61 = vrot.slane %v8374_v33, 5 }
 0x15a   : > { %v803_v26 = vpop.f32.mrf.mxu0 }
 0x15b   : > { %v8379_v35 = vadd.f32 %v803_v26, %v585_v22  ;;  %v971_v7 = vsel %vm918_vm3, %v970_v52, %v969_v3  ;;  %v919_v19 = vsel %vm918_vm3, %v917_v61, %v916_v1  ;;  %v936_v20 = vrot.slane %v8416_v59, 5 }
 0x15c   : > { %v805_v31 = vpop.f32.mrf.mxu0  ;;  %v1019_v61 = vrot.slane %v8374_v33, 7 }
 0x15d   : > { %v972_v57 = vrot.slane %v8379_v35, 5  ;;  %v8423_v63 = vadd.f32 %v805_v31, %v8365_v29  ;;  %v920_v2 = vrot.slane %v8379_v35, 4 }
 0x15e   : > { %v807_v36 = vpop.f32.mrf.mxu0 }
 0x15f   : > { %v8385_v40 = vadd.f32 %v807_v36, %v585_v22  ;;  %v973_v13 = vsel %vm921_vm4, %v972_v57, %v971_v7  ;;  %v922_v31 = vsel %vm921_vm4, %v920_v2, %v919_v19  ;;  %v933_v36 = vsel %vm912_vm1, %v932_v56, %v8400_v49 }
 0x160   : > { %v809_v43 = vpop.f32.mrf.mxu0  ;;  %v938_v38 = vrot.slane %v8423_v63, 4  ;;  %v935_v52 = vsel %vm915_vm2, %v934_v6, %v933_v36  ;;  %v8474_v6 = vpop.f32.mrf.mxu1 }
 0x161   : > { %v974_v62 = vrot.slane %v8385_v40, 4  ;;  %v8429_v4 = vadd.f32 %v809_v43, %v8365_v29  ;;  %v923_v5 = vrot.slane %v8385_v40, 3  ;;  %v937_v57 = vsel %vm918_vm3, %v936_v20, %v935_v52 }
 0x162   : > { %v813_v53 = vpop.f32.mrf.mxu0 }
 0x163   : > { %v8418_v60 = vadd.f32 %v813_v53, %v585_v22  ;;  %v975_v24 = vsel %vm924_vm5, %v974_v62, %v973_v13  ;;  %v940_v44 = vrot.slane %v8429_v4, 3  ;;  %v939_v62 = vsel %vm921_vm4, %v938_v38, %v937_v57 }
 0x164   : > { %v815_v0 = vpop.f32.mrf.mxu0  ;;  %v1021_v13 = vrot.slane %v8379_v35, 6 }
 0x165   : > { %v8435_v8 = vadd.f32 %v815_v0, %v8365_v29  ;;  %v926_v12 = vrot.slane %v8418_v60, 2  ;;  %v976_v15 = vrot.slane %v8418_v60, 3 }
 0x166   : > { %v817_v9 = vpop.f32.mrf.mxu0 }
 0x167   : > { %v8442_v16 = vadd.f32 %v817_v9, %v585_v22  ;;  %v977_v39 = vsel %vm927_vm6, %v976_v15, %v975_v24  ;;  %v925_v22 = vsel %vm924_vm5, %v923_v5, %v922_v31  ;;  %v942_v53 = vrot.slane %v8435_v8, 2 }
 0x168   : > { %v819_v26 = vpop.f32.mrf.mxu0  ;;  %v928_v48 = vsel %vm927_vm6, %v926_v12, %v925_v22  ;;  %v941_v5 = vsel %vm924_vm5, %v940_v44, %v939_v62  ;;  %v1018_v12 = vsel %vm915_vm2, %v8367_v30, %v1017_v58  ;;  %v1023_v15 = vrot.slane %v8385_v40, 5 }
 0x169   : > { %v8453_v42 = vadd.f32 %v819_v26, %v8365_v29  ;;  %v929_v43 = vrot.slane %v8442_v16, 1  ;;  %v978_v55 = vrot.slane %v8442_v16, 2  ;;  %v943_v7 = vsel %vm927_vm6, %v942_v53, %v941_v5 }
 0x16a   : > { %v1522_v51 = vpop.f32.mrf.mxu0  ;;  %v1020_v24 = vsel %vm918_vm3, %v1019_v61, %v1018_v12  ;;  %v1025_v26 = vrot.slane %v8418_v60, 4  ;;  %v8485_v31 = vsub.s32 2, %v8340_v14  ;;  %v1027_v58 = vrot.slane %v8442_v16, 3 }
 0x16b   : > { %v931_v29 = vsel %vm930_vm7, %v929_v43, %v928_v48  ;;  %v1523_v56 = vadd.f32 %v1522_v51, %v8389_v41  ;;  %v944_v0 = vrot.slane %v8453_v42, 1  ;;  %v8471_v2 = vsel %vm930_vm7, %v978_v55, %v977_v39  ;;  %v875_v43 = vpop.f32.mrf.mxu1 }
 0x16c   : > { %v1524_v1 = vpop.f32.mrf.mxu0  ;;  %9603 = vst [vmem:[#allocation20_spill] sm:$0xff] %v8485_v31  ;;  %v1022_v39 = vsel %vm921_vm4, %v1021_v13, %v1020_v24  ;;  %v1065_v48 = vrot.slane %v8357_v25, 2  ;;  %v1067_v14 = vrot.slane %v8367_v30, 1  ;;  %v593_v53 = vrot.slane %v8348_v18, %v8485_v31 }
 0x16d   : > { %v1572_v3 = vadd.f32 %v1523_v56, %v931_v29  ;;  %v1525_v20 = vadd.f32 %v1524_v1, %v8395_v46  ;;  %v945_v36 = vsel %vm930_vm7, %v944_v0, %v943_v7  ;;  %v1024_v22 = vsel %vm924_vm5, %v1023_v15, %v1022_v39  ;;  %v1563_v55 = vpop.f32.mrf.mxu1 }
 0x16e   : > { %v1526_v9 = vpop.f32.mrf.mxu0  ;;  %v1026_v44 = vsel %vm927_vm6, %v1025_v26, %v1024_v22  ;;  %v1064_v29 = vrot.slane %v8361_v28, 3  ;;  %v1070_v0 = vrot.slane %v8379_v35, 7  ;;  %v8504_v1 = vadd.f32 %v8408_v54, %v593_v53 }
 0x16f   : > { %v6321_v19 = vmul.f32 -1.442695, %v1572_v3  ;;  %v1579_v51 = vadd.f32 %v1525_v20, %v945_v36  ;;  %v8494_v52 = vsel %vm930_vm7, %v1027_v58, %v1026_v44  ;;  %v6977_v56 = vpop.f32.mrf.mxu1  ;;  %v1072_v18 = vrot.slane %v8385_v40, 6 }
 0x170   : > { %v1527_v38 = vpop.f32.mrf.mxu0  ;;  %v1066_v57 = vsel %vm912_vm1, %v1065_v48, %v1064_v29  ;;  %v1074_v9 = vrot.slane %v8418_v60, 5  ;;  %v946_v12 = vrot.slane %v8504_v1, 7  ;;  %v8515_v54 = vadd.f32 %v8350_v21, %v593_v53 }
 0x171   : > { %7728 = vpow2.f32 %v6321_v19  ;;  %v6322_v61 = vmul.f32 -1.442695, %v1579_v51  ;;  %v1068_v62 = vsel %vm915_vm2, %v1067_v14, %v1066_v57  ;;  %v1566_v3 = vpop.f32.mrf.mxu1  ;;  %v1076_v19 = vrot.slane %v8442_v16, 4 }
 0x172   : > { %v1069_v5 = vsel %vm918_vm3, %v8374_v33, %v1068_v62  ;;  %v8519_v24 = vadd.f32 %v8359_v27, %v593_v53  ;;  %v8522_v26 = vadd.f32 %v8381_v37, %v593_v53  ;;  %v948_v38 = vrot.slane %v8515_v54, 6 }
 0x173   : > { %v1071_v7 = vsel %vm921_vm4, %v1070_v0, %v1069_v5  ;;  %v6978_v13 = vpop.f32.mrf.mxu1  ;;  %7730 = vpow2.f32 %v6322_v61  ;;  %v1114_v39 = vrot.slane %v8357_v25, 3  ;;  %v1113_v44 = vrot.slane %v8361_v28, 4 }
 0x174   : > { %v1073_v15 = vsel %vm924_vm5, %v1072_v18, %v1071_v7  ;;  %v947_v21 = vsel %vm912_vm1, %v946_v12, %v8519_v24  ;;  %v950_v27 = vrot.slane %v8522_v26, 5  ;;  %v1116_v48 = vrot.slane %v8367_v30, 2 }
 0x175   : > { %v1075_v20 = vsel %vm927_vm6, %v1074_v9, %v1073_v15  ;;  %v1118_v37 = vrot.slane %v8374_v33, 1  ;;  %v8536_v51 = vadd.f32 %v8458_v47, %v593_v53  ;;  %v949_v14 = vsel %vm915_vm2, %v948_v38, %v947_v21 }
 0x176   : > { %v8525_v36 = vsel %vm930_vm7, %v1076_v19, %v1075_v20  ;;  %v1115_v29 = vsel %vm912_vm1, %v1114_v39, %v1113_v44  ;;  %v1121_v57 = vrot.slane %v8385_v40, 7  ;;  %v8542_v61 = vadd.f32 %v875_v43, %v593_v53 }
 0x177   : > { %v1117_v56 = vsel %vm915_vm2, %v1116_v48, %v1115_v29  ;;  %v952_v62 = vrot.slane %v8536_v51, 4  ;;  %v951_v3 = vsel %vm918_vm3, %v950_v27, %v949_v14  ;;  %v1123_v5 = vrot.slane %v8418_v60, 6 }
 0x178   : > { %v1119_v0 = vsel %vm918_vm3, %v1118_v37, %v1117_v56  ;;  %v1125_v18 = vrot.slane %v8442_v16, 5  ;;  %v954_v9 = vrot.slane %v8542_v61, 3  ;;  %v8555_v43 = vrot.slane %v8372_v32, %v8485_v31 }
 0x179   : > { %v1120_v47 = vsel %vm921_vm4, %v8379_v35, %v1119_v0  ;;  %v8559_v13 = vadd.f32 %v8437_v10, %v593_v53  ;;  %v953_v15 = vsel %vm921_vm4, %v952_v62, %v951_v3  ;;  %v1163_v20 = vrot.slane %v8357_v25, 4 }
 0x17a   : > { %v1122_v7 = vsel %vm924_vm5, %v1121_v57, %v1120_v47  ;;  %v8569_v32 = vadd.f32 %v8474_v6, %v593_v53  ;;  %v955_v21 = vsel %vm924_vm5, %v954_v9, %v953_v15  ;;  %v1564_v10 = vadd.f32 %v1563_v55, %v8555_v43 }
 0x17b   : > { %v1124_v12 = vsel %vm927_vm6, %v1123_v5, %v1122_v7  ;;  %v956_v39 = vrot.slane %v8559_v13, 2  ;;  %v1167_v48 = vrot.slane %v8374_v33, 2  ;;  %v1169_v37 = vrot.slane %v8379_v35, 1 }
 0x17c   : > { %v8563_v19 = vsel %vm930_vm7, %v1125_v18, %v1124_v12  ;;  %v958_v14 = vrot.slane %v8569_v32, 1  ;;  %v1172_v6 = vrot.slane %v8418_v60, 7  ;;  %v1174_v55 = vrot.slane %v8442_v16, 6 }
 0x17d   : > { %v957_v53 = vsel %vm927_vm6, %v956_v39, %v955_v21  ;;  %v1212_v9 = vrot.slane %v8357_v25, 5  ;;  %v1211_v12 = vrot.slane %v8361_v28, 6  ;;  %v1214_v15 = vrot.slane %v8367_v30, 4 }
 0x17e   : > { %v7729_v58 = vpop.eup %7728  ;;  %v959_v47 = vsel %vm930_vm7, %v958_v14, %v957_v53  ;;  %v1218_v39 = vrot.slane %v8379_v35, 2  ;;  %v1261_v53 = vrot.slane %v8357_v25, 6 }
 0x17f   : > { %v1576_v22 = vadd.f32 1.0, %v7729_v58  ;;  %v1162_v58 = vrot.slane %v8361_v28, 5 }
 0x180   : > { %v7731_v38 = vpop.eup %7730 }
 0x181   : > { %7732 = vrcp.f32 %v1576_v22  ;;  %v1165_v22 = vrot.slane %v8367_v30, 3  ;;  %v1583_v44 = vadd.f32 1.0, %v7731_v38  ;;  %v1164_v27 = vsel %vm912_vm1, %v1163_v20, %v1162_v58 }
 0x182   : > { %v1216_v20 = vrot.slane %v8374_v33, 3  ;;  %v1213_v38 = vsel %vm912_vm1, %v1212_v9, %v1211_v12  ;;  %v1220_v58 = vrot.slane %v8385_v40, 1  ;;  %v1269_v9 = vrot.slane %v8385_v40, 2 }
 0x183   : > { %v1166_v29 = vsel %vm915_vm2, %v1165_v22, %v1164_v27  ;;  %7734 = vrcp.f32 %v1583_v44  ;;  %v1215_v21 = vsel %vm915_vm2, %v1214_v15, %v1213_v38  ;;  %v1223_v22 = vrot.slane %v8442_v16, 7  ;;  %v7891_v38 = vld [vmem:[#allocation8 + $0x90] ss:$12 sps:$4 sm:$0xff]  }
 0x184   : > { %v1168_v56 = vsel %vm918_vm3, %v1167_v48, %v1166_v29 }
 0x185   : > { %v1170_v62 = vsel %vm921_vm4, %v1169_v37, %v1168_v56  ;;  %v1263_v56 = vrot.slane %v8367_v30, 5 }
 0x186   : > { %v1171_v3 = vsel %vm924_vm5, %v8385_v40, %v1170_v62  ;;  %v1267_v62 = vrot.slane %v8379_v35, 3 }
 0x187   : > { %v1173_v5 = vsel %vm927_vm6, %v1172_v6, %v1171_v3  ;;  %v1260_v6 = vrot.slane %v8361_v28, 7  ;;  %v1271_v28 = vrot.slane %v8418_v60, 1 }
 0x188   : > { %v8589_v7 = vsel %vm930_vm7, %v1174_v55, %v1173_v5 }
 0x189   : > { %v1262_v5 = vsel %vm912_vm1, %v1261_v53, %v1260_v6  ;;  %v7903_v6 = vld [vmem:[#allocation8] ss:$12 sps:$4 sm:$0xff]   ;;  %v7488_v53 = vld [vmem:[#allocation8 + $0xb0] ss:$12 sps:$4 sm:$0xff]  }
 0x18e   : > { %v7733_v57 = vpop.eup %7732 }
 0x18f   : > { %v1586_v0 = vmul.f32 %v7733_v57, %v1564_v10  ;;  %v1217_v10 = vsel %vm918_vm3, %v1216_v20, %v1215_v21  ;;  %v1265_v57 = vrot.slane %v8374_v33, 4  ;;  %v7890_v20 = vld [vmem:[#allocation8 + $0x94] ss:$12 sps:$4 sm:$0xff]   ;;  %v7894_v21 = vld [vmem:[#allocation8 + $0x64] ss:$12 sps:$4 sm:$0xff]  }
 0x190   : > { %v1219_v44 = vsel %vm921_vm4, %v1218_v39, %v1217_v10  ;;  %v7735_v48 = vpop.eup %7734  ;;  %v7892_v39 = vld [vmem:[#allocation8 + $0x7c] ss:$12 sps:$4 sm:$0xff]   ;;  %v7895_v10 = vld [vmem:[#allocation8 + $0x60] ss:$12 sps:$4 sm:$0xff]  }
 0x191   : > { %v1587_v18 = vadd.f32 %v1586_v0, %v959_v47  ;;  %v1221_v27 = vsel %vm924_vm5, %v1220_v58, %v1219_v44  ;;  %v1589_v29 = vsub.f32 1.0, %v7735_v48  ;;  %v7888_v0 = vld [vmem:[#allocation4] sm:$0xff]  ;;  %v7893_v58 = vld [vmem:[#allocation8 + $0x78] ss:$12 sps:$4 sm:$0xff]  }
 0x192   : > { %v1222_v37 = vsel %vm927_vm6, %v8418_v60, %v1221_v27  ;;  %v1591_v3 = vmul.f32 %v7888_v0, %v7735_v48  ;;  %v7889_v60 = vld [vmem:[#allocation8 + $0xa8] ss:$12 sps:$4 sm:$0xff]   ;;  %v7899_v27 = vld [vmem:[#allocation8 + $0x30] ss:$12 sps:$4 sm:$0xff]   ;;  %v7493_v0 = vld [vmem:[#allocation8 + $0x38] ss:$12 sps:$4 sm:$0xff]  }
 0x193   : > { %7736 = vtanh.f32 %v1587_v18  ;;  %v8606_v14 = vsel %vm930_vm7, %v1223_v22, %v1222_v37  ;;  %v1264_v18 = vsel %vm915_vm2, %v1263_v56, %v1262_v5  ;;  %v7897_v22 = vld [vmem:[#allocation8 + $0x48] ss:$12 sps:$4 sm:$0xff]   ;;  %v7901_v37 = vld [vmem:[#allocation8 + $0x18] ss:$12 sps:$4 sm:$0xff]   ;;  %v982_v5 = vrot.slane %v8403_v50, 7 }
 0x194   : > { %v1266_v25 = vsel %vm918_vm3, %v1265_v57, %v1264_v18  ;;  %v7898_v44 = vld [vmem:[#allocation8 + $0x34] ss:$12 sps:$4 sm:$0xff]   ;;  %v7900_v48 = vld [vmem:[#allocation8 + $0x1c] ss:$12 sps:$4 sm:$0xff]   ;;  %v7489_v56 = vld [vmem:[#allocation8 + $0x98] ss:$12 sps:$4 sm:$0xff]  }
 0x195   : > { %v1268_v30 = vsel %vm921_vm4, %v1267_v62, %v1266_v25  ;;  %v7491_v57 = vld [vmem:[#allocation8 + $0x68] ss:$12 sps:$4 sm:$0xff]   ;;  %v7492_v62 = vld [vmem:[#allocation8 + $0x50] ss:$12 sps:$4 sm:$0xff]   ;;  %v984_v25 = vrot.slane %v8416_v59, 6 }
 0x196   : > { %v1270_v35 = vsel %vm924_vm5, %v1269_v9, %v1268_v30 }
 0x197   : > { %v1272_v15 = vsel %vm927_vm6, %v1271_v28, %v1270_v35  ;;  %v980_v28 = vrot.slane %v8400_v49, 1 }
 0x198   : > { %v8627_v40 = vsel %vm930_vm7, %v8442_v16, %v1272_v15  ;;  %v7896_v16 = vld [vmem:[#allocation8 + $0x4c] ss:$12 sps:$4 sm:$0xff]   ;;  %v988_v15 = vrot.slane %v8429_v4, 4 }
 0x199   : > { %9604 = vst [vmem:[#allocation21_spill] sm:$0xff] %v8627_v40  ;;  %v981_v35 = vsel %vm912_vm1, %v8377_v34, %v980_v28  ;;  %v1000_v28 = vrot.slane %v8536_v51, 5  ;;  %v1092_v40 = vrot.slane %v8519_v24, 3 }
 0x1a0   : > { %v7737_v55 = vpop.eup %7736 }
 0x1a1   : > { %v1590_v47 = vmul.f32 %v7737_v55, %v1589_v29  ;;  %v7902_v29 = vld [vmem:[#allocation8 + $0x4] ss:$12 sps:$4 sm:$0xff]   ;;  %v7490_v55 = vld [vmem:[#allocation8 + $0x80] ss:$12 sps:$4 sm:$0xff]  }
 0x1a3   : > { %v8617_v12 = vadd.f32 %v1591_v3, %v1590_v47  ;;  %v7494_v3 = vld [vmem:[#allocation8 + $0x20] ss:$12 sps:$4 sm:$0xff]   ;;  %v7495_v47 = vld [vmem:[#allocation8 + $0x8] ss:$12 sps:$4 sm:$0xff]  }
 0x1a5   : > { %v1596_v33 = vpack.c.bf16 %v8617_v12, %v8617_v12 }
 0x1a7   : > { %1790 = vmatmul.mubr.bf16.vlgmr.msra.gmra.mxu0 %v1596_v33  ;;  %6996 = vmatmul.mubr.bf16.vlgmr.msra.gmra.mxu1 %v1596_v33  ;;  %v986_v33 = vrot.slane %v8423_v63, 5 }
 0x1a8   : > { %2028 = vmatpush1.bf16.msra.mxu0 %v7889_v60  ;;  %2059 = vmatprep.mubr.bf16.mxu0 %v9585_v11 }
 0x1a9   : > { %2029 = vmatprep.subr.bf16.mxu0 %v7890_v20  ;;  %7015 = vmatprep.mubr.msk.bf16.mxu1 %vm8077_vm0, %v9583_v45 }
 0x1aa   : > { %7000 = vmatpush3.bf16.msra.mxu1 %v7488_v53 }
 0x1ab   : > { %7001 = vmatprep.subr.bf16.mxu1 %v9583_v45 }
 0x1ac   : > { %2030 = vmatpush1.bf16.msra.mxu0 %v7891_v38 }
 0x1ad   : > { %2031 = vmatprep.subr.bf16.mxu0 %v7892_v39  ;;  %v983_v39 = vsel %vm915_vm2, %v982_v5, %v981_v35  ;;  %v998_v5 = vrot.slane %v8522_v26, 6 }
 0x1ae   : > { %7002 = vmatpush3.bf16.msra.mxu1 %v7489_v56 }
 0x1af   : > { %7003 = vmatprep.subr.bf16.mxu1 %v9583_v45 }
 0x1b0   : > { %2032 = vmatpush1.bf16.msra.mxu0 %v7893_v58  ;;  %v990_v58 = vrot.slane %v8435_v8, 3 }
 0x1b1   : > { %2033 = vmatprep.subr.bf16.mxu0 %v7894_v21  ;;  %v985_v21 = vsel %vm918_vm3, %v984_v25, %v983_v39 }
 0x1b2   : > { %7004 = vmatpush3.bf16.msra.mxu1 %v7490_v55 }
 0x1b3   : > { %7005 = vmatprep.subr.bf16.mxu1 %v9583_v45 }
 0x1b4   : > { %2034 = vmatpush1.bf16.msra.mxu0 %v7895_v10  ;;  %v992_v10 = vrot.slane %v8453_v42, 2 }
 0x1b5   : > { %2035 = vmatprep.subr.bf16.mxu0 %v7896_v16 }
 0x1b6   : > { %7006 = vmatpush3.bf16.msra.mxu1 %v7491_v57  ;;  %v994_v57 = vrot.slane %v8519_v24, 1 }
 0x1b7   : > { %7007 = vmatprep.subr.bf16.mxu1 %v9583_v45 }
 0x1b8   : > { %2036 = vmatpush1.bf16.msra.mxu0 %v7897_v22 }
 0x1b9   : > { %2037 = vmatprep.subr.bf16.mxu0 %v7898_v44 }
 0x1ba   : > { %7008 = vmatpush3.bf16.msra.mxu1 %v7492_v62  ;;  %v996_v62 = vrot.slane %v8515_v54, 7 }
 0x1bb   : > { %7009 = vmatprep.subr.bf16.mxu1 %v9583_v45 }
 0x1bc   : > { %2038 = vmatpush1.bf16.msra.mxu0 %v7899_v27  ;;  %v987_v27 = vsel %vm921_vm4, %v986_v33, %v985_v21 }
 0x1bd   : > { %2039 = vmatprep.subr.bf16.mxu0 %v7900_v48 }
 0x1be   : > { %7010 = vmatpush3.bf16.msra.mxu1 %v7493_v0 }
 0x1bf   : > { %7011 = vmatprep.subr.bf16.mxu1 %v9583_v45 }
 0x1c0   : > { %2040 = vmatpush1.bf16.msra.mxu0 %v7901_v37  ;;  %v989_v37 = vsel %vm924_vm5, %v988_v15, %v987_v27  ;;  %v1004_v15 = vrot.slane %v8559_v13, 3 }
 0x1c1   : > { %2041 = vmatprep.subr.bf16.mxu0 %v7902_v29 }
 0x1c2   : > { %7012 = vmatpush3.bf16.msra.mxu1 %v7494_v3  ;;  %v995_v3 = vsel %vm912_vm1, %v8504_v1, %v994_v57  ;;  %v8690_v57 = vld [vmem:[#allocation8 + $0x90] ss:$12 sps:$4 sm:$0xff]  }
 0x1c3   : > { %7013 = vmatprep.subr.bf16.mxu1 %v9583_v45 }
 0x1c4   : > { %2042 = vmatpush1.bf16.msra.mxu0 %v7903_v6 }
 0x1c6   : > { %7014 = vmatpush3.bf16.msra.mxu1 %v7495_v47 }
 0x1c7   : > { %7019 = vmatprep.subr.bf16.mxu1 %v9583_v45 }
 0x267   : > { %v1791_v18 = vpop.f32.mrf.mxu0  ;;  %v1832_v9 = vpop.f32.mrf.mxu1 }
 0x268   : > { %v1792_v30 = vadd.f32 %v1791_v18, %v8389_v41  ;;  %v997_v18 = vsel %vm915_vm2, %v996_v62, %v995_v3  ;;  %v7503_v62 = vld [vmem:[#allocation8 + $0x98] ss:$12 sps:$4 sm:$0xff]  }
 0x269   : > { %v1793_v60 = vpop.f32.mrf.mxu0  ;;  %v6997_v20 = vpop.f32.mrf.mxu1  ;;  %v999_v25 = vsel %vm918_vm3, %v998_v5, %v997_v18  ;;  %v8697_v3 = vld [vmem:[#allocation8 + $0x78] ss:$12 sps:$4 sm:$0xff]   ;;  %v8704_v18 = vld [vmem:[#allocation8 + $0x60] ss:$12 sps:$4 sm:$0xff]  }
 0x26a   : > { %v1841_v38 = vadd.f32 %v1792_v30, %v8471_v2  ;;  %v1794_v48 = vadd.f32 %v1793_v60, %v8395_v46  ;;  %v991_v2 = vsel %vm927_vm6, %v990_v58, %v989_v37  ;;  %v1002_v30 = vrot.slane %v8542_v61, 4  ;;  %v8701_v5 = vld [vmem:[#allocation8 + $0x64] ss:$12 sps:$4 sm:$0xff]  }
 0x26b   : > { %v1795_v16 = vpop.f32.mrf.mxu0  ;;  %v1835_v22 = vpop.f32.mrf.mxu1  ;;  %v993_v53 = vsel %vm930_vm7, %v992_v10, %v991_v2  ;;  %v1001_v33 = vsel %vm921_vm4, %v1000_v28, %v999_v25  ;;  %v1833_v58 = vadd.f32 %v1832_v9, %v8555_v43  ;;  %v8682_v9 = vld [vmem:[#allocation8 + $0xac] ss:$12 sps:$4 sm:$0xff]   ;;  %v7511_v28 = vld [vmem:[#allocation8 + $0x68] ss:$12 sps:$4 sm:$0xff]  }
 0x26c   : > { %v6347_v44 = vmul.f32 -1.442695, %v1841_v38  ;;  %v1848_v56 = vadd.f32 %v1794_v48, %v993_v53  ;;  %v1003_v60 = vsel %vm924_vm5, %v1002_v30, %v1001_v33  ;;  %v1006_v38 = vrot.slane %v8569_v32, 2  ;;  %v8684_v53 = vld [vmem:[#allocation8 + $0xa8] ss:$12 sps:$4 sm:$0xff]   ;;  %2297 = vmatprep.subr.bf16.mxu0 %v8682_v9 }
 0x26d   : > { %v1796_v29 = vpop.f32.mrf.mxu0  ;;  %v6998_v6 = vpop.f32.mrf.mxu1  ;;  %v1005_v39 = vsel %vm927_vm6, %v1004_v15, %v1003_v60  ;;  %v8708_v25 = vld [vmem:[#allocation8 + $0x4c] ss:$12 sps:$4 sm:$0xff]   ;;  %v8711_v30 = vld [vmem:[#allocation8 + $0x48] ss:$12 sps:$4 sm:$0xff]   ;;  %v7515_v33 = vld [vmem:[#allocation8 + $0x50] ss:$12 sps:$4 sm:$0xff]  }
 0x26e   : > { %7738 = vpow2.f32 %v6347_v44  ;;  %v6348_v55 = vmul.f32 -1.442695, %v1848_v56  ;;  %v1007_v16 = vsel %vm930_vm7, %v1006_v38, %v1005_v39  ;;  %v7499_v56 = vld [vmem:[#allocation8 + $0xb0] ss:$12 sps:$4 sm:$0xff]   ;;  %v7519_v60 = vld [vmem:[#allocation8 + $0x38] ss:$12 sps:$4 sm:$0xff]  }
 0x26f   : > { %v8718_v15 = vld [vmem:[#allocation8 + $0x30] ss:$12 sps:$4 sm:$0xff]   ;;  %v8725_v38 = vld [vmem:[#allocation8 + $0x18] ss:$12 sps:$4 sm:$0xff]   ;;  %v7523_v39 = vld [vmem:[#allocation8 + $0x20] ss:$12 sps:$4 sm:$0xff]  }
 0x270   : > { %7740 = vpow2.f32 %v6348_v55  ;;  %v8687_v55 = vld [vmem:[#allocation8 + $0x94] ss:$12 sps:$4 sm:$0xff]  }
 0x27b   : > { %v7739_v0 = vpop.eup %7738 }
 0x27c   : > { %v1845_v47 = vadd.f32 1.0, %v7739_v0  ;;  %v8694_v0 = vld [vmem:[#allocation8 + $0x7c] ss:$12 sps:$4 sm:$0xff]  }
 0x27d   : > { %v7741_v35 = vpop.eup %7740 }
 0x27e   : > { %7742 = vrcp.f32 %v1845_v47  ;;  %v1852_v20 = vadd.f32 1.0, %v7741_v35  ;;  %v7507_v47 = vld [vmem:[#allocation8 + $0x80] ss:$12 sps:$4 sm:$0xff]  }
 0x27f   : > { %v8715_v35 = vld [vmem:[#allocation8 + $0x34] ss:$12 sps:$4 sm:$0xff]  }
 0x280   : > { %7744 = vrcp.f32 %v1852_v20  ;;  %v8722_v20 = vld [vmem:[#allocation8 + $0x1c] ss:$12 sps:$4 sm:$0xff]  }
 0x28b   : > { %v7743_v21 = vpop.eup %7742 }
 0x28c   : > { %v1855_v10 = vmul.f32 %v7743_v21, %v1833_v58  ;;  %v8729_v58 = vld [vmem:[#allocation8 + $0x4] ss:$12 sps:$4 sm:$0xff]   ;;  %v8732_v21 = vld [vmem:[#allocation8] ss:$12 sps:$4 sm:$0xff]  }
 0x28d   : > { %v7745_v44 = vpop.eup %7744 }
 0x28e   : > { %v1856_v22 = vadd.f32 %v1855_v10, %v1007_v16  ;;  %v1858_v27 = vsub.f32 1.0, %v7745_v44  ;;  %v1860_v29 = vmul.f32 %v7745_v44, %v8617_v12  ;;  %v7527_v10 = vld [vmem:[#allocation8 + $0x8] ss:$12 sps:$4 sm:$0xff]   ;;  %v1030_v16 = vrot.slane %v8377_v34, 1 }
 0x290   : > { %7746 = vtanh.f32 %v1856_v22  ;;  %v1029_v22 = vrot.slane %v8400_v49, 2 }
 0x29d   : > { %v7747_v48 = vpop.eup %7746 }
 0x29e   : > { %v1859_v37 = vmul.f32 %v7747_v48, %v1858_v27  ;;  %v1031_v48 = vsel %vm912_vm1, %v1030_v16, %v1029_v22 }
 0x2a0   : > { %v8675_v6 = vadd.f32 %v1860_v29, %v1859_v37  ;;  %v1033_v37 = vrot.slane %v8416_v59, 7 }
 0x2a2   : > { %v1866_v2 = vpack.c.bf16 %v8675_v6, %v8675_v6 }
 0x2a4   : > { %2060 = vmatmul.mubr.bf16.vlgmr.msra.gmra.mxu0 %v1866_v2  ;;  %7016 = vmatmul.mubr.bf16.vlgmr.msra.gmra.mxu1 %v1866_v2  ;;  %v1035_v2 = vrot.slane %v8423_v63, 6 }
 0x2a5   : > { %2329 = vmatprep.mubr.bf16.mxu0 %v9585_v11  ;;  %7035 = vmatprep.mubr.msk.bf16.mxu1 %vm8077_vm0, %v9583_v45 }
 0x2a6   : > { %2298 = vmatpush1.bf16.msra.mxu0 %v8684_v53  ;;  %7020 = vmatpush3.bf16.msra.mxu1 %v7499_v56  ;;  %v1037_v56 = vrot.slane %v8429_v4, 5 }
 0x2a7   : > { %2299 = vmatprep.subr.bf16.mxu0 %v8687_v55  ;;  %7021 = vmatprep.subr.bf16.mxu1 %v9583_v45 }
 0x2aa   : > { %2300 = vmatpush1.bf16.msra.mxu0 %v8690_v57  ;;  %7022 = vmatpush3.bf16.msra.mxu1 %v7503_v62 }
 0x2ab   : > { %2301 = vmatprep.subr.bf16.mxu0 %v8694_v0  ;;  %7023 = vmatprep.subr.bf16.mxu1 %v9583_v45 }
 0x2ae   : > { %2302 = vmatpush1.bf16.msra.mxu0 %v8697_v3  ;;  %7024 = vmatpush3.bf16.msra.mxu1 %v7507_v47 }
 0x2af   : > { %2303 = vmatprep.subr.bf16.mxu0 %v8701_v5  ;;  %7025 = vmatprep.subr.bf16.mxu1 %v9583_v45 }
 0x2b2   : > { %2304 = vmatpush1.bf16.msra.mxu0 %v8704_v18  ;;  %7026 = vmatpush3.bf16.msra.mxu1 %v7511_v28 }
 0x2b3   : > { %2305 = vmatprep.subr.bf16.mxu0 %v8708_v25  ;;  %7027 = vmatprep.subr.bf16.mxu1 %v9583_v45 }
 0x2b6   : > { %2306 = vmatpush1.bf16.msra.mxu0 %v8711_v30  ;;  %7028 = vmatpush3.bf16.msra.mxu1 %v7515_v33  ;;  %v1032_v33 = vsel %vm915_vm2, %v8403_v50, %v1031_v48 }
 0x2b7   : > { %2307 = vmatprep.subr.bf16.mxu0 %v8715_v35  ;;  %7029 = vmatprep.subr.bf16.mxu1 %v9583_v45 }
 0x2ba   : > { %2308 = vmatpush1.bf16.msra.mxu0 %v8718_v15  ;;  %7030 = vmatpush3.bf16.msra.mxu1 %v7519_v60  ;;  %v1039_v60 = vrot.slane %v8435_v8, 4 }
 0x2bb   : > { %2309 = vmatprep.subr.bf16.mxu0 %v8722_v20  ;;  %7031 = vmatprep.subr.bf16.mxu1 %v9583_v45 }
 0x2be   : > { %2310 = vmatpush1.bf16.msra.mxu0 %v8725_v38  ;;  %7032 = vmatpush3.bf16.msra.mxu1 %v7523_v39  ;;  %v1034_v39 = vsel %vm918_vm3, %v1033_v37, %v1032_v33  ;;  %v1043_v33 = vrot.slane %v8519_v24, 2 }
 0x2bf   : > { %2311 = vmatprep.subr.bf16.mxu0 %v8729_v58  ;;  %7033 = vmatprep.subr.bf16.mxu1 %v9583_v45 }
 0x2c2   : > { %2312 = vmatpush1.bf16.msra.mxu0 %v8732_v21  ;;  %7034 = vmatpush3.bf16.msra.mxu1 %v7527_v10  ;;  %v1041_v10 = vrot.slane %v8453_v42, 3 }
 0x2c3   : > { %2567 = vmatprep.subr.bf16.mxu0 %v8682_v9  ;;  %7039 = vmatprep.subr.bf16.mxu1 %v9583_v45  ;;  %v1036_v45 = vsel %vm921_vm4, %v1035_v2, %v1034_v39 }
 0x364   : > { %v2061_v44 = vpop.f32.mrf.mxu0  ;;  %v2102_v27 = vpop.f32.mrf.mxu1 }
 0x365   : > { %v2062_v29 = vadd.f32 %v2061_v44, %v8389_v41 }
 0x366   : > { %v2063_v62 = vpop.f32.mrf.mxu0  ;;  %v7017_v47 = vpop.f32.mrf.mxu1 }
 0x367   : > { %v2111_v28 = vadd.f32 %v2062_v29, %v8494_v52  ;;  %v2064_v11 = vadd.f32 %v2063_v62, %v8395_v46  ;;  %v1038_v47 = vsel %vm924_vm5, %v1037_v56, %v1036_v45  ;;  %v1047_v45 = vrot.slane %v8522_v26, 7 }
 0x368   : > { %v2065_v16 = vpop.f32.mrf.mxu0  ;;  %v2105_v22 = vpop.f32.mrf.mxu1  ;;  %v1040_v48 = vsel %vm927_vm6, %v1039_v60, %v1038_v47  ;;  %v1049_v56 = vrot.slane %v8536_v51, 6  ;;  %v1055_v47 = vrot.slane %v8569_v32, 3 }
 0x369   : > { %v6373_v44 = vmul.f32 -1.442695, %v2111_v28  ;;  %v1042_v29 = vsel %vm930_vm7, %v1041_v10, %v1040_v48  ;;  %v1044_v16 = vrot.slane %v8504_v1, 1  ;;  %v1053_v10 = vrot.slane %v8559_v13, 4 }
 0x36a   : > { %v2066_v31 = vpop.f32.mrf.mxu0  ;;  %v7018_v52 = vpop.f32.mrf.mxu1  ;;  %v2118_v23 = vadd.f32 %v2064_v11, %v1042_v29  ;;  %v2103_v48 = vadd.f32 %v2102_v27, %v8555_v43  ;;  %v9605_v27 = vmov 0  }
 0x36b   : > { %7748 = vpow2.f32 %v6373_v44  ;;  %v1045_v2 = vsel %vm912_vm1, %v1044_v16, %v1043_v33 }
 0x36c   : > { %v6374_v37 = vmul.f32 -1.442695, %v2118_v23  ;;  %v1046_v31 = vsel %vm915_vm2, %v8515_v54, %v1045_v2  ;;  %v1051_v23 = vrot.slane %v8542_v61, 5 }
 0x36d   : > { %v1048_v11 = vsel %vm918_vm3, %v1047_v45, %v1046_v31 }
 0x36e   : > { %7750 = vpow2.f32 %v6374_v37  ;;  %v1050_v60 = vsel %vm921_vm4, %v1049_v56, %v1048_v11 }
 0x36f   : > { %v1052_v22 = vsel %vm924_vm5, %v1051_v23, %v1050_v60  ;;  %v9606_v23 = vmov 0.0   ;;  %v7528_v60 = vld [vmem:[#allocation8 + $0xb0] ss:$12 sps:$4 sm:$0xff]  }
 0x370   : > { %v1054_v52 = vsel %vm927_vm6, %v1053_v10, %v1052_v22  ;;  %v7530_v10 = vld [vmem:[#allocation8 + $0x80] ss:$12 sps:$4 sm:$0xff]   ;;  %v7531_v22 = vld [vmem:[#allocation8 + $0x68] ss:$12 sps:$4 sm:$0xff]  }
 0x371   : > { %v1056_v33 = vsel %vm930_vm7, %v1055_v47, %v1054_v52  ;;  %v7533_v47 = vld [vmem:[#allocation8 + $0x38] ss:$12 sps:$4 sm:$0xff]   ;;  %v7534_v52 = vld [vmem:[#allocation8 + $0x20] ss:$12 sps:$4 sm:$0xff]  }
 0x378   : > { %v7749_v28 = vpop.eup %7748 }
 0x379   : > { %v2115_v62 = vadd.f32 1.0, %v7749_v28 }
 0x37b   : > { %7752 = vrcp.f32 %v2115_v62  ;;  %v7751_v39 = vpop.eup %7750 }
 0x37c   : > { %v2122_v44 = vadd.f32 1.0, %v7751_v39  ;;  %v7529_v39 = vld [vmem:[#allocation8 + $0x98] ss:$12 sps:$4 sm:$0xff]  }
 0x37e   : > { %7754 = vrcp.f32 %v2122_v44  ;;  %v7532_v44 = vld [vmem:[#allocation8 + $0x50] ss:$12 sps:$4 sm:$0xff]  }
 0x388   : > { %v7753_v29 = vpop.eup %7752 }
 0x389   : > { %v2125_v37 = vmul.f32 %v7753_v29, %v2103_v48  ;;  %v7535_v48 = vld [vmem:[#allocation8 + $0x8] ss:$12 sps:$4 sm:$0xff]   ;;  %v1079_v29 = vrot.slane %v8377_v34, 2 }
 0x38b   : > { %v2126_v16 = vadd.f32 %v2125_v37, %v1056_v33  ;;  %v7755_v28 = vpop.eup %7754  ;;  %v1081_v37 = vrot.slane %v8403_v50, 1  ;;  %v1078_v33 = vrot.slane %v8400_v49, 3 }
 0x38c   : > { %v2128_v2 = vsub.f32 1.0, %v7755_v28  ;;  %v2130_v31 = vmul.f32 %v7755_v28, %v8675_v6 }
 0x38d   : > { %7756 = vtanh.f32 %v2126_v16 }
 0x39a   : > { %v7757_v62 = vpop.eup %7756 }
 0x39b   : > { %v2129_v45 = vmul.f32 %v7757_v62, %v2128_v2  ;;  %v1080_v2 = vsel %vm912_vm1, %v1079_v29, %v1078_v33 }
 0x39d   : > { %v8774_v56 = vadd.f32 %v2130_v31, %v2129_v45  ;;  %v1082_v45 = vsel %vm915_vm2, %v1081_v37, %v1080_v2  ;;  %v1084_v31 = vrot.slane %v8423_v63, 7 }
 0x39f   : > { %v2136_v11 = vpack.c.bf16 %v8774_v56, %v8774_v56 }
 0x3a1   : > { %2330 = vmatmul.mubr.bf16.vlgmr.msra.gmra.mxu0 %v2136_v11  ;;  %7036 = vmatmul.mubr.bf16.vlgmr.msra.gmra.mxu1 %v2136_v11  ;;  %v1086_v11 = vrot.slane %v8429_v4, 6 }
 0x3a2   : > { %2568 = vmatpush1.bf16.msra.mxu0 %v8684_v53  ;;  %2599 = vmatprep.mubr.bf16.mxu0 %v9605_v27 }
 0x3a3   : > { %2569 = vmatprep.subr.bf16.mxu0 %v8687_v55  ;;  %7055 = vmatprep.mubr.msk.bf16.mxu1 %vm8077_vm0, %v9606_v23 }
 0x3a4   : > { %7040 = vmatpush3.bf16.msra.mxu1 %v7528_v60 }
 0x3a5   : > { %7041 = vmatprep.subr.bf16.mxu1 %v9606_v23 }
 0x3a6   : > { %2570 = vmatpush1.bf16.msra.mxu0 %v8690_v57 }
 0x3a7   : > { %2571 = vmatprep.subr.bf16.mxu0 %v8694_v0 }
 0x3a8   : > { %7042 = vmatpush3.bf16.msra.mxu1 %v7529_v39 }
 0x3a9   : > { %7043 = vmatprep.subr.bf16.mxu1 %v9606_v23 }
 0x3aa   : > { %2572 = vmatpush1.bf16.msra.mxu0 %v8697_v3 }
 0x3ab   : > { %2573 = vmatprep.subr.bf16.mxu0 %v8701_v5 }
 0x3ac   : > { %7044 = vmatpush3.bf16.msra.mxu1 %v7530_v10 }
 0x3ad   : > { %7045 = vmatprep.subr.bf16.mxu1 %v9606_v23 }
 0x3ae   : > { %2574 = vmatpush1.bf16.msra.mxu0 %v8704_v18 }
 0x3af   : > { %2575 = vmatprep.subr.bf16.mxu0 %v8708_v25 }
 0x3b0   : > { %7046 = vmatpush3.bf16.msra.mxu1 %v7531_v22  ;;  %v1088_v22 = vrot.slane %v8435_v8, 5 }
 0x3b1   : > { %7047 = vmatprep.subr.bf16.mxu1 %v9606_v23 }
 0x3b2   : > { %2576 = vmatpush1.bf16.msra.mxu0 %v8711_v30 }
 0x3b3   : > { %2577 = vmatprep.subr.bf16.mxu0 %v8715_v35 }
 0x3b4   : > { %7048 = vmatpush3.bf16.msra.mxu1 %v7532_v44  ;;  %v1083_v44 = vsel %vm918_vm3, %v8416_v59, %v1082_v45 }
 0x3b5   : > { %7049 = vmatprep.subr.bf16.mxu1 %v9606_v23  ;;  %v1085_v37 = vsel %vm921_vm4, %v1084_v31, %v1083_v44  ;;  %v1095_v31 = vrot.slane %v8515_v54, 1 }
 0x3b6   : > { %2578 = vmatpush1.bf16.msra.mxu0 %v8718_v15 }
 0x3b7   : > { %2579 = vmatprep.subr.bf16.mxu0 %v8722_v20 }
 0x3b8   : > { %7050 = vmatpush3.bf16.msra.mxu1 %v7533_v47  ;;  %v1090_v47 = vrot.slane %v8453_v42, 4 }
 0x3b9   : > { %7051 = vmatprep.subr.bf16.mxu1 %v9606_v23 }
 0x3ba   : > { %2580 = vmatpush1.bf16.msra.mxu0 %v8725_v38 }
 0x3bb   : > { %2581 = vmatprep.subr.bf16.mxu0 %v8729_v58 }
 0x3bc   : > { %7052 = vmatpush3.bf16.msra.mxu1 %v7534_v52 }
 0x3bd   : > { %7053 = vmatprep.subr.bf16.mxu1 %v9606_v23 }
 0x3be   : > { %2582 = vmatpush1.bf16.msra.mxu0 %v8732_v21 }
 0x3bf   : > { %2837 = vmatprep.subr.bf16.mxu0 %v8682_v9 }
 0x3c0   : > { %7054 = vmatpush3.bf16.msra.mxu1 %v7535_v48 }
 0x3c1   : > { %7059 = vmatprep.subr.bf16.mxu1 %v9606_v23 }
 0x461   : > { %v2331_v16 = vpop.f32.mrf.mxu0  ;;  %v2372_v28 = vpop.f32.mrf.mxu1 }
 0x462   : > { %v2332_v62 = vadd.f32 %v2331_v16, %v8389_v41  ;;  %v1087_v16 = vsel %vm924_vm5, %v1086_v11, %v1085_v37  ;;  %v1102_v37 = vrot.slane %v8559_v13, 5 }
 0x463   : > { %v2333_v60 = vpop.f32.mrf.mxu0  ;;  %v7037_v39 = vpop.f32.mrf.mxu1 }
 0x464   : > { %v2381_v10 = vadd.f32 %v2332_v62, %v8525_v36  ;;  %v2334_v33 = vadd.f32 %v2333_v60, %v8395_v46  ;;  %v1089_v36 = vsel %vm927_vm6, %v1088_v22, %v1087_v16  ;;  %v1098_v22 = vrot.slane %v8536_v51, 7 }
 0x465   : > { %v2335_v52 = vpop.f32.mrf.mxu0  ;;  %v2375_v48 = vpop.f32.mrf.mxu1  ;;  %v1091_v62 = vsel %vm930_vm7, %v1090_v47, %v1089_v36 }
 0x466   : > { %v6399_v29 = vmul.f32 -1.442695, %v2381_v10  ;;  %v2388_v17 = vadd.f32 %v2334_v33, %v1091_v62  ;;  %v1093_v52 = vrot.slane %v8504_v1, 2 }
 0x467   : > { %v2336_v2 = vpop.f32.mrf.mxu0  ;;  %v7038_v39 = vpop.f32.mrf.mxu1 }
 0x468   : > { %7758 = vpow2.f32 %v6399_v29  ;;  %v6400_v45 = vmul.f32 -1.442695, %v2388_v17  ;;  %v1094_v60 = vsel %vm912_vm1, %v1093_v52, %v1092_v40  ;;  %v1100_v17 = vrot.slane %v8542_v61, 6 }
 0x469   : > { %v1096_v44 = vsel %vm915_vm2, %v1095_v31, %v1094_v60  ;;  %v1104_v40 = vrot.slane %v8569_v32, 4  ;;  %v2373_v39 = vadd.f32 %v2372_v28, %v8555_v43  ;;  %v7536_v28 = vld [vmem:[#allocation8 + $0xb0] ss:$12 sps:$4 sm:$0xff]  }
 0x46a   : > { %7760 = vpow2.f32 %v6400_v45  ;;  %v1097_v47 = vsel %vm918_vm3, %v8522_v26, %v1096_v44 }
 0x46b   : > { %v1099_v48 = vsel %vm921_vm4, %v1098_v22, %v1097_v47 }
 0x46c   : > { %v1101_v33 = vsel %vm924_vm5, %v1100_v17, %v1099_v48  ;;  %v7537_v17 = vld [vmem:[#allocation8 + $0x98] ss:$12 sps:$4 sm:$0xff]   ;;  %v7538_v48 = vld [vmem:[#allocation8 + $0x80] ss:$12 sps:$4 sm:$0xff]  }
 0x46d   : > { %v1103_v2 = vsel %vm927_vm6, %v1102_v37, %v1101_v33  ;;  %v7540_v37 = vld [vmem:[#allocation8 + $0x50] ss:$12 sps:$4 sm:$0xff]   ;;  %v7541_v33 = vld [vmem:[#allocation8 + $0x38] ss:$12 sps:$4 sm:$0xff]  }
 0x46e   : > { %v1105_v45 = vsel %vm930_vm7, %v1104_v40, %v1103_v2  ;;  %v1128_v40 = vrot.slane %v8377_v34, 3  ;;  %v1130_v2 = vrot.slane %v8403_v50, 2 }
 0x475   : > { %v7759_v10 = vpop.eup %7758 }
 0x476   : > { %v2385_v11 = vadd.f32 1.0, %v7759_v10 }
 0x477   : > { %v7761_v29 = vpop.eup %7760 }
 0x478   : > { %7762 = vrcp.f32 %v2385_v11  ;;  %v2392_v16 = vadd.f32 1.0, %v7761_v29  ;;  %v7539_v29 = vld [vmem:[#allocation8 + $0x68] ss:$12 sps:$4 sm:$0xff]  }
 0x47a   : > { %7764 = vrcp.f32 %v2392_v16  ;;  %v7543_v16 = vld [vmem:[#allocation8 + $0x8] ss:$12 sps:$4 sm:$0xff]  }
 0x485   : > { %v7763_v36 = vpop.eup %7762 }
 0x486   : > { %v2395_v62 = vmul.f32 %v7763_v36, %v2373_v39  ;;  %v1127_v39 = vrot.slane %v8400_v49, 4  ;;  %v1132_v36 = vrot.slane %v8416_v59, 1 }
 0x487   : > { %v7765_v31 = vpop.eup %7764 }
 0x488   : > { %v2396_v52 = vadd.f32 %v2395_v62, %v1105_v45  ;;  %v2398_v10 = vsub.f32 1.0, %v7765_v31  ;;  %v2400_v44 = vmul.f32 %v7765_v31, %v8774_v56 }
 0x48a   : > { %7766 = vtanh.f32 %v2396_v52  ;;  %v1129_v52 = vsel %vm912_vm1, %v1128_v40, %v1127_v39 }
 0x497   : > { %v7767_v60 = vpop.eup %7766 }
 0x498   : > { %v2399_v11 = vmul.f32 %v7767_v60, %v2398_v10  ;;  %v1131_v10 = vsel %vm915_vm2, %v1130_v2, %v1129_v52 }
 0x499   : > { %v1133_v60 = vsel %vm918_vm3, %v1132_v36, %v1131_v10  ;;  %v1142_v10 = vrot.slane %v8504_v1, 3 }
 0x49a   : > { %v8840_v22 = vadd.f32 %v2400_v44, %v2399_v11  ;;  %v1135_v11 = vrot.slane %v8429_v4, 7 }
 0x49c   : > { %v2406_v47 = vpack.c.bf16 %v8840_v22, %v8840_v22 }
 0x49e   : > { %2600 = vmatmul.mubr.bf16.vlgmr.msra.gmra.mxu0 %v2406_v47  ;;  %7056 = vmatmul.mubr.bf16.vlgmr.msra.gmra.mxu1 %v2406_v47 }
 0x49f   : > { %2838 = vmatpush1.bf16.msra.mxu0 %v8684_v53  ;;  %2869 = vmatprep.mubr.bf16.mxu0 %v9605_v27 }
 0x4a0   : > { %2839 = vmatprep.subr.bf16.mxu0 %v8687_v55  ;;  %7075 = vmatprep.mubr.msk.bf16.mxu1 %vm8077_vm0, %v9606_v23 }
 0x4a1   : > { %7060 = vmatpush3.bf16.msra.mxu1 %v7536_v28 }
 0x4a2   : > { %7061 = vmatprep.subr.bf16.mxu1 %v9606_v23 }
 0x4a3   : > { %2840 = vmatpush1.bf16.msra.mxu0 %v8690_v57 }
 0x4a4   : > { %2841 = vmatprep.subr.bf16.mxu0 %v8694_v0 }
 0x4a5   : > { %7062 = vmatpush3.bf16.msra.mxu1 %v7537_v17  ;;  %v1137_v17 = vrot.slane %v8435_v8, 6 }
 0x4a6   : > { %7063 = vmatprep.subr.bf16.mxu1 %v9606_v23 }
 0x4a7   : > { %2842 = vmatpush1.bf16.msra.mxu0 %v8697_v3 }
 0x4a8   : > { %2843 = vmatprep.subr.bf16.mxu0 %v8701_v5 }
 0x4a9   : > { %7064 = vmatpush3.bf16.msra.mxu1 %v7538_v48  ;;  %v1139_v48 = vrot.slane %v8453_v42, 5 }
 0x4aa   : > { %7065 = vmatprep.subr.bf16.mxu1 %v9606_v23 }
 0x4ab   : > { %2844 = vmatpush1.bf16.msra.mxu0 %v8704_v18 }
 0x4ac   : > { %2845 = vmatprep.subr.bf16.mxu0 %v8708_v25 }
 0x4ad   : > { %7066 = vmatpush3.bf16.msra.mxu1 %v7539_v29 }
 0x4ae   : > { %7067 = vmatprep.subr.bf16.mxu1 %v9606_v23 }
 0x4af   : > { %2846 = vmatpush1.bf16.msra.mxu0 %v8711_v30 }
 0x4b0   : > { %2847 = vmatprep.subr.bf16.mxu0 %v8715_v35 }
 0x4b1   : > { %7068 = vmatpush3.bf16.msra.mxu1 %v7540_v37 }
 0x4b2   : > { %7069 = vmatprep.subr.bf16.mxu1 %v9606_v23 }
 0x4b3   : > { %2848 = vmatpush1.bf16.msra.mxu0 %v8718_v15 }
 0x4b4   : > { %2849 = vmatprep.subr.bf16.mxu0 %v8722_v20 }
 0x4b5   : > { %7070 = vmatpush3.bf16.msra.mxu1 %v7541_v33 }
 0x4b6   : > { %7071 = vmatprep.subr.bf16.mxu1 %v9606_v23 }
 0x4b7   : > { %2850 = vmatpush1.bf16.msra.mxu0 %v8725_v38 }
 0x4b8   : > { %2851 = vmatprep.subr.bf16.mxu0 %v8729_v58 }
 0x4bb   : > { %2852 = vmatpush1.bf16.msra.mxu0 %v8732_v21 }
 0x4bc   : > { %3107 = vmatprep.subr.bf16.mxu0 %v8682_v9  ;;  %v7542_v9 = vld [vmem:[#allocation8 + $0x20] ss:$12 sps:$4 sm:$0xff]  }
 0x4bd   : > { %7072 = vmatpush3.bf16.msra.mxu1 %v7542_v9  ;;  %v1134_v9 = vsel %vm921_vm4, %v8423_v63, %v1133_v60  ;;  %v1144_v60 = vrot.slane %v8515_v54, 2 }
 0x4be   : > { %7073 = vmatprep.subr.bf16.mxu1 %v9606_v23  ;;  %v1136_v40 = vsel %vm924_vm5, %v1135_v11, %v1134_v9  ;;  %v1151_v9 = vrot.slane %v8559_v13, 6 }
 0x4bf   : > { %v1138_v36 = vsel %vm927_vm6, %v1137_v17, %v1136_v40 }
 0x4c1   : > { %7074 = vmatpush3.bf16.msra.mxu1 %v7543_v16 }
 0x4c2   : > { %7079 = vmatprep.subr.bf16.mxu1 %v9606_v23 }
 0x55e   : > { %v2601_v62 = vpop.f32.mrf.mxu0  ;;  %v2642_v45 = vpop.f32.mrf.mxu1 }
 0x55f   : > { %v2602_v31 = vadd.f32 %v2601_v62, %v8389_v41 }
 0x560   : > { %v2603_v44 = vpop.f32.mrf.mxu0  ;;  %v7057_v47 = vpop.f32.mrf.mxu1 }
 0x561   : > { %v2651_v28 = vadd.f32 %v2602_v31, %v8563_v19  ;;  %v2604_v16 = vadd.f32 %v2603_v44, %v8395_v46  ;;  %v1140_v19 = vsel %vm930_vm7, %v1139_v48, %v1138_v36  ;;  %v1141_v31 = vrot.slane %v8519_v24, 4 }
 0x562   : > { %v2605_v29 = vpop.f32.mrf.mxu0  ;;  %v2645_v37 = vpop.f32.mrf.mxu1  ;;  %v2643_v36 = vadd.f32 %v2642_v45, %v8555_v43 }
 0x563   : > { %v6425_v33 = vmul.f32 -1.442695, %v2651_v28  ;;  %v2658_v62 = vadd.f32 %v2604_v16, %v1140_v19  ;;  %v1143_v44 = vsel %vm912_vm1, %v1142_v10, %v1141_v31  ;;  %v1146_v28 = vrot.slane %v8522_v26, 1 }
 0x564   : > { %v2606_v2 = vpop.f32.mrf.mxu0  ;;  %v7058_v39 = vpop.f32.mrf.mxu1  ;;  %v1145_v17 = vsel %vm915_vm2, %v1144_v60, %v1143_v44  ;;  %v1149_v29 = vrot.slane %v8542_v61, 7 }
 0x565   : > { %7768 = vpow2.f32 %v6425_v33  ;;  %v6426_v52 = vmul.f32 -1.442695, %v2658_v62  ;;  %v1147_v48 = vsel %vm918_vm3, %v1146_v28, %v1145_v17  ;;  %v1153_v2 = vrot.slane %v8569_v32, 5 }
 0x566   : > { %v1148_v37 = vsel %vm921_vm4, %v8536_v51, %v1147_v48 }
 0x567   : > { %7770 = vpow2.f32 %v6426_v52  ;;  %v1150_v16 = vsel %vm924_vm5, %v1149_v29, %v1148_v37 }
 0x568   : > { %v1152_v39 = vsel %vm927_vm6, %v1151_v9, %v1150_v16 }
 0x569   : > { %v1154_v52 = vsel %vm930_vm7, %v1153_v2, %v1152_v39  ;;  %v1186_v2 = vrot.slane %v8435_v8, 7  ;;  %v1188_v39 = vrot.slane %v8453_v42, 6 }
 0x572   : > { %v7769_v47 = vpop.eup %7768 }
 0x573   : > { %v2655_v11 = vadd.f32 1.0, %v7769_v47 }
 0x574   : > { %v7771_v33 = vpop.eup %7770 }
 0x575   : > { %7772 = vrcp.f32 %v2655_v11  ;;  %v2662_v40 = vadd.f32 1.0, %v7771_v33 }
 0x577   : > { %7774 = vrcp.f32 %v2662_v40 }
 0x582   : > { %v7773_v19 = vpop.eup %7772 }
 0x583   : > { %v2665_v62 = vmul.f32 %v7773_v19, %v2643_v36 }
 0x584   : > { %v7775_v10 = vpop.eup %7774 }
 0x585   : > { %v2666_v31 = vadd.f32 %v2665_v62, %v1154_v52  ;;  %v2668_v60 = vsub.f32 1.0, %v7775_v10  ;;  %v2670_v11 = vmul.f32 %v7775_v10, %v8840_v22 }
 0x587   : > { %7776 = vtanh.f32 %v2666_v31 }
 0x594   : > { %v7777_v47 = vpop.eup %7776 }
 0x595   : > { %v2669_v44 = vmul.f32 %v7777_v47, %v2668_v60 }
 0x597   : > { %v8906_v28 = vadd.f32 %v2670_v11, %v2669_v44 }
 0x599   : > { %v2676_v17 = vpack.c.bf16 %v8906_v28, %v8906_v28 }
 0x59b   : > { %2870 = vmatmul.mubr.bf16.vlgmr.msra.gmra.mxu0 %v2676_v17  ;;  %7076 = vmatmul.mubr.bf16.vlgmr.msra.gmra.mxu1 %v2676_v17  ;;  %v1190_v17 = vrot.slane %v8519_v24, 5 }
 0x59c   : > { %3108 = vmatpush1.bf16.msra.mxu0 %v8684_v53  ;;  %3139 = vmatprep.mubr.bf16.mxu0 %v9605_v27  ;;  %v7544_v53 = vld [vmem:[#allocation8 + $0xb0] ss:$12 sps:$4 sm:$0xff]  }
 0x59d   : > { %3109 = vmatprep.subr.bf16.mxu0 %v8687_v55  ;;  %7095 = vmatprep.mubr.msk.bf16.mxu1 %vm8077_vm0, %v9606_v23  ;;  %v7545_v55 = vld [vmem:[#allocation8 + $0x98] ss:$12 sps:$4 sm:$0xff]  }
 0x59e   : > { %7080 = vmatpush3.bf16.msra.mxu1 %v7544_v53  ;;  %v1191_v53 = vrot.slane %v8504_v1, 4 }
 0x59f   : > { %7081 = vmatprep.subr.bf16.mxu1 %v9606_v23 }
 0x5a0   : > { %3110 = vmatpush1.bf16.msra.mxu0 %v8690_v57  ;;  %v7546_v57 = vld [vmem:[#allocation8 + $0x80] ss:$12 sps:$4 sm:$0xff]  }
 0x5a1   : > { %3111 = vmatprep.subr.bf16.mxu0 %v8694_v0  ;;  %v7547_v0 = vld [vmem:[#allocation8 + $0x68] ss:$12 sps:$4 sm:$0xff]  }
 0x5a2   : > { %7082 = vmatpush3.bf16.msra.mxu1 %v7545_v55  ;;  %v1193_v55 = vrot.slane %v8515_v54, 3 }
 0x5a3   : > { %7083 = vmatprep.subr.bf16.mxu1 %v9606_v23 }
 0x5a4   : > { %3112 = vmatpush1.bf16.msra.mxu0 %v8697_v3  ;;  %v7548_v3 = vld [vmem:[#allocation8 + $0x50] ss:$12 sps:$4 sm:$0xff]  }
 0x5a5   : > { %3113 = vmatprep.subr.bf16.mxu0 %v8701_v5  ;;  %v7549_v5 = vld [vmem:[#allocation8 + $0x38] ss:$12 sps:$4 sm:$0xff]  }
 0x5a6   : > { %7084 = vmatpush3.bf16.msra.mxu1 %v7546_v57 }
 0x5a7   : > { %7085 = vmatprep.subr.bf16.mxu1 %v9606_v23 }
 0x5a8   : > { %3114 = vmatpush1.bf16.msra.mxu0 %v8704_v18  ;;  %v7550_v18 = vld [vmem:[#allocation8 + $0x20] ss:$12 sps:$4 sm:$0xff]  }
 0x5a9   : > { %3115 = vmatprep.subr.bf16.mxu0 %v8708_v25  ;;  %v7551_v25 = vld [vmem:[#allocation8 + $0x8] ss:$12 sps:$4 sm:$0xff]  }
 0x5aa   : > { %7086 = vmatpush3.bf16.msra.mxu1 %v7547_v0  ;;  %v1192_v0 = vsel %vm912_vm1, %v1191_v53, %v1190_v17  ;;  %v7560_v17 = vld [vmem:[#allocation8 + $0x78] ss:$12 sps:$4 sm:$0xff]  }
 0x5ab   : > { %7087 = vmatprep.subr.bf16.mxu1 %v9606_v23  ;;  %v7566_v53 = vld [vmem:[#allocation8 + $0x64] ss:$12 sps:$4 sm:$0xff]  }
 0x5ac   : > { %3116 = vmatpush1.bf16.msra.mxu0 %v8711_v30  ;;  %v1177_v30 = vrot.slane %v8377_v34, 4 }
 0x5ad   : > { %3117 = vmatprep.subr.bf16.mxu0 %v8715_v35  ;;  %v1179_v35 = vrot.slane %v8403_v50, 3 }
 0x5ae   : > { %7088 = vmatpush3.bf16.msra.mxu1 %v7548_v3 }
 0x5af   : > { %7089 = vmatprep.subr.bf16.mxu1 %v9606_v23 }
 0x5b0   : > { %3118 = vmatpush1.bf16.msra.mxu0 %v8718_v15  ;;  %v1176_v15 = vrot.slane %v8400_v49, 5 }
 0x5b1   : > { %3119 = vmatprep.subr.bf16.mxu0 %v8722_v20  ;;  %v1181_v20 = vrot.slane %v8416_v59, 2 }
 0x5b2   : > { %7090 = vmatpush3.bf16.msra.mxu1 %v7549_v5  ;;  %v1178_v45 = vsel %vm912_vm1, %v1177_v30, %v1176_v15  ;;  %v1195_v5 = vrot.slane %v8522_v26, 2 }
 0x5b3   : > { %7091 = vmatprep.subr.bf16.mxu1 %v9606_v23  ;;  %v1180_v29 = vsel %vm915_vm2, %v1179_v35, %v1178_v45  ;;  %v1202_v45 = vrot.slane %v8569_v32, 6 }
 0x5b4   : > { %3120 = vmatpush1.bf16.msra.mxu0 %v8725_v38  ;;  %v1183_v38 = vrot.slane %v8423_v63, 1  ;;  %v1182_v37 = vsel %vm918_vm3, %v1181_v20, %v1180_v29  ;;  %v1200_v20 = vrot.slane %v8559_v13, 7 }
 0x5b5   : > { %3121 = vmatprep.subr.bf16.mxu0 %v8729_v58 }
 0x5b6   : > { %7092 = vmatpush3.bf16.msra.mxu1 %v7550_v18  ;;  %v1184_v40 = vsel %vm921_vm4, %v1183_v38, %v1182_v37  ;;  %v1194_v18 = vsel %vm915_vm2, %v1193_v55, %v1192_v0  ;;  %v7567_v55 = vld [vmem:[#allocation8 + $0x68] ss:$12 sps:$4 sm:$0xff]   ;;  %v7570_v0 = vld [vmem:[#allocation8 + $0x4c] ss:$12 sps:$4 sm:$0xff]  }
 0x5b7   : > { %7093 = vmatprep.subr.bf16.mxu1 %v9606_v23  ;;  %v1185_v31 = vsel %vm924_vm5, %v8429_v4, %v1184_v40  ;;  %v1196_v30 = vsel %vm918_vm3, %v1195_v5, %v1194_v18  ;;  %v7568_v5 = vld [vmem:[#allocation8 + $0x48] ss:$12 sps:$4 sm:$0xff]  }
 0x5b8   : > { %3122 = vmatpush1.bf16.msra.mxu0 %v8732_v21  ;;  %v1187_v47 = vsel %vm927_vm6, %v1186_v2, %v1185_v31  ;;  %v7554_v31 = vld [vmem:[#allocation8 + $0xac] ss:$12 sps:$4 sm:$0xff]   ;;  %v7574_v18 = vld [vmem:[#allocation8 + $0x34] ss:$12 sps:$4 sm:$0xff]  }
 0x5b9   : > { %3377 = vmatprep.subr.bf16.mxu0 %v7554_v31 }
 0x5ba   : > { %7094 = vmatpush3.bf16.msra.mxu1 %v7551_v25  ;;  %v1197_v25 = vrot.slane %v8536_v51, 1 }
 0x5bb   : > { %7099 = vmatprep.subr.bf16.mxu1 %v9606_v23 }
 0x5bc   : > { %v1198_v35 = vsel %vm921_vm4, %v1197_v25, %v1196_v30  ;;  %v7575_v25 = vld [vmem:[#allocation8 + $0x38] ss:$12 sps:$4 sm:$0xff]   ;;  %v7572_v30 = vld [vmem:[#allocation8 + $0x30] ss:$12 sps:$4 sm:$0xff]  }
 0x5bd   : > { %v1199_v38 = vsel %vm924_vm5, %v8542_v61, %v1198_v35  ;;  %v7578_v35 = vld [vmem:[#allocation8 + $0x1c] ss:$12 sps:$4 sm:$0xff]  }
 0x65b   : > { %v2871_v58 = vpop.f32.mrf.mxu0  ;;  %v2912_v21 = vpop.f32.mrf.mxu1 }
 0x65c   : > { %v2872_v48 = vadd.f32 %v2871_v58, %v8389_v41  ;;  %v2913_v29 = vadd.f32 %v2912_v21, %v8555_v43  ;;  %v7552_v21 = vld [vmem:[#allocation8 + $0xa8] ss:$12 sps:$4 sm:$0xff]  }
 0x65d   : > { %v2873_v33 = vpop.f32.mrf.mxu0  ;;  %v7077_v9 = vpop.f32.mrf.mxu1 }
 0x65e   : > { %v2921_v16 = vadd.f32 %v2872_v48, %v8589_v7  ;;  %v2874_v52 = vadd.f32 %v2873_v33, %v8395_v46  ;;  %v1189_v7 = vsel %vm930_vm7, %v1188_v39, %v1187_v47  ;;  %v1201_v48 = vsel %vm927_vm6, %v1200_v20, %v1199_v38  ;;  %v7559_v47 = vld [vmem:[#allocation8 + $0x98] ss:$12 sps:$4 sm:$0xff]  }
 0x65f   : > { %v2875_v36 = vpop.f32.mrf.mxu0  ;;  %v2915_v19 = vpop.f32.mrf.mxu1  ;;  %v1203_v9 = vsel %vm930_vm7, %v1202_v45, %v1201_v48  ;;  %v7576_v20 = vld [vmem:[#allocation8 + $0x18] ss:$12 sps:$4 sm:$0xff]   ;;  %v7580_v45 = vld [vmem:[#allocation8] ss:$12 sps:$4 sm:$0xff]   ;;  %v8985_v48 = vld [vmem:[#allocation10 + $0xb0] ss:$12 sps:$4 sm:$0xff]  }
 0x660   : > { %v6451_v62 = vmul.f32 -1.442695, %v2921_v16  ;;  %v2928_v44 = vadd.f32 %v2874_v52, %v1189_v7  ;;  %v7556_v7 = vld [vmem:[#allocation8 + $0x90] ss:$12 sps:$4 sm:$0xff]  }
 0x661   : > { %v2876_v10 = vpop.f32.mrf.mxu0  ;;  %v7078_v60 = vpop.f32.mrf.mxu1  ;;  %v7582_v38 = vld [vmem:[#allocation8 + $0x4] ss:$12 sps:$4 sm:$0xff]  }
 0x662   : > { %7778 = vpow2.f32 %v6451_v62  ;;  %v6452_v11 = vmul.f32 -1.442695, %v2928_v44  ;;  %v7555_v10 = vld [vmem:[#allocation8 + $0xb0] ss:$12 sps:$4 sm:$0xff]   ;;  %v7558_v60 = vld [vmem:[#allocation8 + $0x94] ss:$12 sps:$4 sm:$0xff]  }
 0x663   : > { %v7562_v44 = vld [vmem:[#allocation8 + $0x7c] ss:$12 sps:$4 sm:$0xff]  }
 0x664   : > { %7780 = vpow2.f32 %v6452_v11  ;;  %v7563_v11 = vld [vmem:[#allocation8 + $0x80] ss:$12 sps:$4 sm:$0xff]  }
 0x66f   : > { %v7779_v57 = vpop.eup %7778 }
 0x670   : > { %v2925_v3 = vadd.f32 1.0, %v7779_v57  ;;  %v7564_v57 = vld [vmem:[#allocation8 + $0x60] ss:$12 sps:$4 sm:$0xff]  }
 0x671   : > { %v7781_v15 = vpop.eup %7780 }
 0x672   : > { %7782 = vrcp.f32 %v2925_v3  ;;  %v2932_v58 = vadd.f32 1.0, %v7781_v15  ;;  %v7571_v3 = vld [vmem:[#allocation8 + $0x50] ss:$12 sps:$4 sm:$0xff]   ;;  %v7579_v15 = vld [vmem:[#allocation8 + $0x20] ss:$12 sps:$4 sm:$0xff]  }
 0x674   : > { %7784 = vrcp.f32 %v2932_v58  ;;  %v7583_v58 = vld [vmem:[#allocation8 + $0x8] ss:$12 sps:$4 sm:$0xff]  }
 0x67f   : > { %v7783_v37 = vpop.eup %7782 }
 0x680   : > { %v2935_v33 = vmul.f32 %v7783_v37, %v2913_v29  ;;  %v7586_v29 = vld [vmem:[#allocation10 + $0xac] ss:$12 sps:$4 sm:$0xff]   ;;  %v1226_v37 = vrot.slane %v8377_v34, 5 }
 0x681   : > { %v7785_v40 = vpop.eup %7784 }
 0x682   : > { %v2936_v16 = vadd.f32 %v2935_v33, %v1203_v9  ;;  %v2938_v2 = vsub.f32 1.0, %v7785_v40  ;;  %v2940_v19 = vmul.f32 %v7785_v40, %v8906_v28  ;;  %v1228_v33 = vrot.slane %v8403_v50, 4 }
 0x683   : > { %v1225_v9 = vrot.slane %v8400_v49, 6  ;;  %v1232_v40 = vrot.slane %v8423_v63, 2 }
 0x684   : > { %7786 = vtanh.f32 %v2936_v16  ;;  %v1230_v16 = vrot.slane %v8416_v59, 3 }
 0x691   : > { %v7787_v39 = vpop.eup %7786 }
 0x692   : > { %v2939_v36 = vmul.f32 %v7787_v39, %v2938_v2 }
 0x694   : > { %v8971_v62 = vadd.f32 %v2940_v19, %v2939_v36  ;;  %v1227_v36 = vsel %vm912_vm1, %v1226_v37, %v1225_v9  ;;  %v1234_v19 = vrot.slane %v8429_v4, 1  ;;  %v1246_v37 = vrot.slane %v8536_v51, 2 }
 0x695   : > { %v1248_v9 = vrot.slane %v8542_v61, 1 }
 0x696   : > { %v2946_v52 = vpack.c.bf16 %v8971_v62, %v8971_v62 }
 0x698   : > { %3140 = vmatmul.mubr.bf16.vlgmr.msra.gmra.mxu0 %v2946_v52  ;;  %7096 = vmatmul.mubr.bf16.vlgmr.msra.gmra.mxu1 %v2946_v52 }
 0x699   : > { %3409 = vmatprep.mubr.bf16.mxu0 %v9605_v27  ;;  %7115 = vmatprep.mubr.msk.bf16.mxu1 %vm8077_vm0, %v9606_v23 }
 0x69a   : > { %7100 = vmatpush3.bf16.msra.mxu1 %v7555_v10  ;;  %3378 = vmatpush1.bf16.msra.mxu0 %v7552_v21  ;;  %v1229_v21 = vsel %vm915_vm2, %v1228_v33, %v1227_v36 }
 0x69b   : > { %7101 = vmatprep.subr.bf16.mxu1 %v9606_v23  ;;  %3379 = vmatprep.subr.bf16.mxu0 %v7558_v60  ;;  %v1231_v31 = vsel %vm918_vm3, %v1230_v16, %v1229_v21 }
 0x69e   : > { %7102 = vmatpush3.bf16.msra.mxu1 %v7559_v47  ;;  %3380 = vmatpush1.bf16.msra.mxu0 %v7556_v7  ;;  %v1233_v7 = vsel %vm921_vm4, %v1232_v40, %v1231_v31 }
 0x69f   : > { %7103 = vmatprep.subr.bf16.mxu1 %v9606_v23  ;;  %3381 = vmatprep.subr.bf16.mxu0 %v7562_v44  ;;  %v1235_v44 = vsel %vm924_vm5, %v1234_v19, %v1233_v7  ;;  %v1251_v19 = vrot.slane %v8569_v32, 7 }
 0x6a2   : > { %7104 = vmatpush3.bf16.msra.mxu1 %v7563_v11  ;;  %3382 = vmatpush1.bf16.msra.mxu0 %v7560_v17  ;;  %v1237_v11 = vrot.slane %v8453_v42, 7 }
 0x6a3   : > { %7105 = vmatprep.subr.bf16.mxu1 %v9606_v23  ;;  %3383 = vmatprep.subr.bf16.mxu0 %v7566_v53 }
 0x6a6   : > { %7106 = vmatpush3.bf16.msra.mxu1 %v7567_v55  ;;  %3384 = vmatpush1.bf16.msra.mxu0 %v7564_v57 }
 0x6a7   : > { %7107 = vmatprep.subr.bf16.mxu1 %v9606_v23  ;;  %3385 = vmatprep.subr.bf16.mxu0 %v7570_v0 }
 0x6aa   : > { %7108 = vmatpush3.bf16.msra.mxu1 %v7571_v3  ;;  %3386 = vmatpush1.bf16.msra.mxu0 %v7568_v5  ;;  %v1236_v5 = vsel %vm927_vm6, %v8435_v8, %v1235_v44 }
 0x6ab   : > { %7109 = vmatprep.subr.bf16.mxu1 %v9606_v23  ;;  %3387 = vmatprep.subr.bf16.mxu0 %v7574_v18  ;;  %v1238_v18 = vsel %vm930_vm7, %v1237_v11, %v1236_v5  ;;  %v6754_v5 = vpack.c.bf16 %v8675_v6, %v8617_v12  ;;  %v7596_v12 = vld [vmem:[#allocation10 + $0x60] ss:$12 sps:$4 sm:$0xff]  }
 0x6ac   : > { %v7602_v6 = vld [vmem:[#allocation10 + $0x4c] ss:$12 sps:$4 sm:$0xff]  }
 0x6ae   : > { %7110 = vmatpush3.bf16.msra.mxu1 %v7575_v25  ;;  %3388 = vmatpush1.bf16.msra.mxu0 %v7572_v30  ;;  %v1239_v30 = vrot.slane %v8519_v24, 6 }
 0x6af   : > { %7111 = vmatprep.subr.bf16.mxu1 %v9606_v23  ;;  %3389 = vmatprep.subr.bf16.mxu0 %v7578_v35  ;;  %v1240_v35 = vrot.slane %v8504_v1, 5 }
 0x6b2   : > { %7112 = vmatpush3.bf16.msra.mxu1 %v7579_v15  ;;  %3390 = vmatpush1.bf16.msra.mxu0 %v7576_v20  ;;  %v1242_v15 = vrot.slane %v8515_v54, 4 }
 0x6b3   : > { %7113 = vmatprep.subr.bf16.mxu1 %v9606_v23  ;;  %3391 = vmatprep.subr.bf16.mxu0 %v7582_v38  ;;  %v1241_v38 = vsel %vm912_vm1, %v1240_v35, %v1239_v30  ;;  %v7592_v30 = vld [vmem:[#allocation10 + $0x78] ss:$12 sps:$4 sm:$0xff]  }
 0x6b4   : > { %v7598_v35 = vld [vmem:[#allocation10 + $0x64] ss:$12 sps:$4 sm:$0xff]  }
 0x6b6   : > { %7114 = vmatpush3.bf16.msra.mxu1 %v7583_v58  ;;  %3392 = vmatpush1.bf16.msra.mxu0 %v7580_v45  ;;  %v1244_v45 = vrot.slane %v8522_v26, 3 }
 0x6b7   : > { %7119 = vmatprep.subr.bf16.mxu1 %v8985_v48  ;;  %3702 = vmatprep.subr.bf16.mxu0 %v7586_v29  ;;  %v1243_v29 = vsel %vm915_vm2, %v1242_v15, %v1241_v38  ;;  %v7599_v15 = vld [vmem:[#allocation10 + $0x68] ss:$12 sps:$4 sm:$0xff]  }
 0x6b8   : > { %v1245_v33 = vsel %vm918_vm3, %v1244_v45, %v1243_v29  ;;  %v7606_v38 = vld [vmem:[#allocation10 + $0x34] ss:$12 sps:$4 sm:$0xff]   ;;  %v7604_v45 = vld [vmem:[#allocation10 + $0x30] ss:$12 sps:$4 sm:$0xff]  }
 0x6b9   : > { %v1247_v16 = vsel %vm921_vm4, %v1246_v37, %v1245_v33  ;;  %v7610_v29 = vld [vmem:[#allocation10 + $0x1c] ss:$12 sps:$4 sm:$0xff]   ;;  %v7611_v37 = vld [vmem:[#allocation10 + $0x20] ss:$12 sps:$4 sm:$0xff]   ;;  %v7608_v33 = vld [vmem:[#allocation10 + $0x18] ss:$12 sps:$4 sm:$0xff]  }
 0x758   : > { %v3141_v2 = vpop.f32.mrf.mxu0  ;;  %v3182_v39 = vpop.f32.mrf.mxu1 }
 0x759   : > { %v3142_v52 = vadd.f32 %v3141_v2, %v8389_v41  ;;  %v1249_v2 = vsel %vm924_vm5, %v1248_v9, %v1247_v16  ;;  %v3183_v21 = vadd.f32 %v3182_v39, %v8555_v43  ;;  %v7590_v39 = vld [vmem:[#allocation10 + $0x94] ss:$12 sps:$4 sm:$0xff]   ;;  %v7614_v9 = vld [vmem:[#allocation10 + $0x4] ss:$12 sps:$4 sm:$0xff]  }
 0x75a   : > { %v3143_v10 = vpop.f32.mrf.mxu0  ;;  %v7097_v60 = vpop.f32.mrf.mxu1  ;;  %v7615_v16 = vld [vmem:[#allocation10 + $0x8] ss:$12 sps:$4 sm:$0xff]  }
 0x75b   : > { %v3191_v47 = vadd.f32 %v3142_v52, %v8606_v14  ;;  %v3144_v57 = vadd.f32 %v3143_v10, %v8395_v46  ;;  %v1250_v52 = vsel %vm927_vm6, %v8559_v13, %v1249_v2  ;;  %v6755_v2 = vpack.c.bf16 %v8840_v22, %v8774_v56  ;;  %v9044_v56 = vld [vmem:[#allocation11 + $0x94] ss:$12 sps:$4 sm:$0xff]   ;;  %v9047_v22 = vld [vmem:[#allocation11 + $0x90] ss:$12 sps:$4 sm:$0xff]  }
 0x75c   : > { %v3145_v17 = vpop.f32.mrf.mxu0  ;;  %v3185_v53 = vpop.f32.mrf.mxu1  ;;  %v1252_v60 = vsel %vm930_vm7, %v1251_v19, %v1250_v52  ;;  %v9039_v19 = vld [vmem:[#allocation11 + $0xa8] ss:$12 sps:$4 sm:$0xff]   ;;  %v9041_v52 = vld [vmem:[#allocation11 + $0xac] ss:$12 sps:$4 sm:$0xff]  }
 0x75d   : > { %v6477_v55 = vmul.f32 -1.442695, %v3191_v47  ;;  %v3198_v14 = vadd.f32 %v3144_v57, %v1238_v18  ;;  %v7584_v57 = vld [vmem:[#allocation10 + $0xa8] ss:$12 sps:$4 sm:$0xff]   ;;  %v7588_v18 = vld [vmem:[#allocation10 + $0x90] ss:$12 sps:$4 sm:$0xff]  }
 0x75e   : > { %v3146_v0 = vpop.f32.mrf.mxu0  ;;  %v7098_v3 = vpop.f32.mrf.mxu1 }
 0x75f   : > { %7788 = vpow2.f32 %v6477_v55  ;;  %v6478_v25 = vmul.f32 -1.442695, %v3198_v14  ;;  %v7591_v3 = vld [vmem:[#allocation10 + $0x98] ss:$12 sps:$4 sm:$0xff]   ;;  %v7594_v14 = vld [vmem:[#allocation10 + $0x7c] ss:$12 sps:$4 sm:$0xff]  }
 0x761   : > { %7790 = vpow2.f32 %v6478_v25  ;;  %v7595_v25 = vld [vmem:[#allocation10 + $0x80] ss:$12 sps:$4 sm:$0xff]  }
 0x76c   : > { %v7789_v20 = vpop.eup %7788 }
 0x76d   : > { %v3195_v58 = vadd.f32 1.0, %v7789_v20  ;;  %v7600_v20 = vld [vmem:[#allocation10 + $0x48] ss:$12 sps:$4 sm:$0xff]  }
 0x76e   : > { %v7791_v40 = vpop.eup %7790 }
 0x76f   : > { %7792 = vrcp.f32 %v3195_v58  ;;  %v3202_v36 = vadd.f32 1.0, %v7791_v40  ;;  %v7607_v58 = vld [vmem:[#allocation10 + $0x38] ss:$12 sps:$4 sm:$0xff]   ;;  %v7612_v40 = vld [vmem:[#allocation10] ss:$12 sps:$4 sm:$0xff]  }
 0x771   : > { %7794 = vrcp.f32 %v3202_v36  ;;  %v6756_v36 = vpack.c.bf16 %v8971_v62, %v8906_v28  ;;  %v9050_v28 = vld [vmem:[#allocation11 + $0x7c] ss:$12 sps:$4 sm:$0xff]  }
 0x77c   : > { %v7793_v31 = vpop.eup %7792 }
 0x77d   : > { %v3205_v10 = vmul.f32 %v7793_v31, %v3183_v21  ;;  %v9056_v21 = vld [vmem:[#allocation11 + $0x64] ss:$12 sps:$4 sm:$0xff]   ;;  %v9059_v31 = vld [vmem:[#allocation11 + $0x60] ss:$12 sps:$4 sm:$0xff]  }
 0x77e   : > { %v7795_v7 = vpop.eup %7794 }
 0x77f   : > { %v3206_v47 = vadd.f32 %v3205_v10, %v1252_v60  ;;  %v3208_v44 = vsub.f32 1.0, %v7795_v7  ;;  %v3210_v53 = vmul.f32 %v7795_v7, %v8971_v62  ;;  %v9053_v62 = vld [vmem:[#allocation11 + $0x78] ss:$12 sps:$4 sm:$0xff]   ;;  %v9065_v60 = vld [vmem:[#allocation11 + $0x48] ss:$12 sps:$4 sm:$0xff]  }
 0x780   : > { %v9062_v10 = vld [vmem:[#allocation11 + $0x4c] ss:$12 sps:$4 sm:$0xff]   ;;  %v9071_v7 = vld [vmem:[#allocation11 + $0x30] ss:$12 sps:$4 sm:$0xff]  }
 0x781   : > { %7796 = vtanh.f32 %v3206_v47  ;;  %v9068_v47 = vld [vmem:[#allocation11 + $0x34] ss:$12 sps:$4 sm:$0xff]  }
 0x78e   : > { %v7797_v11 = vpop.eup %7796 }
 0x78f   : > { %v3209_v17 = vmul.f32 %v7797_v11, %v3208_v44  ;;  %v9074_v44 = vld [vmem:[#allocation11 + $0x1c] ss:$12 sps:$4 sm:$0xff]  }
 0x790   : > { %v7640_v11 = vld [vmem:[#allocation11 + $0xb0] ss:$12 sps:$4 sm:$0xff]  }
 0x791   : > { %v9023_v55 = vadd.f32 %v3210_v53, %v3209_v17  ;;  %v9077_v17 = vld [vmem:[#allocation11 + $0x18] ss:$12 sps:$4 sm:$0xff]  }
 0x792   : > { %v9080_v53 = vld [vmem:[#allocation11 + $0x4] ss:$12 sps:$4 sm:$0xff]  }
 0x793   : > { %v3216_v0 = vpack.c.bf16 %v9023_v55, %v9023_v55 }
 0x795   : > { %3410 = vmatmul.mubr.bf16.vlgmr.msra.gmra.mxu0 %v3216_v0  ;;  %7116 = vmatmul.mubr.bf16.vlgmr.msra.gmra.mxu1 %v3216_v0  ;;  %v7641_v0 = vld [vmem:[#allocation11 + $0x98] ss:$12 sps:$4 sm:$0xff]  }
 0x796   : > { %3703 = vmatpush1.bf16.msra.mxu0 %v7584_v57  ;;  %7120 = vmatpush3.bf16.msra.mxu1 %v8985_v48  ;;  %v7603_v48 = vld [vmem:[#allocation10 + $0x50] ss:$12 sps:$4 sm:$0xff]   ;;  %v9084_v57 = vld [vmem:[#allocation11] ss:$12 sps:$4 sm:$0xff]  }
 0x797   : > { %7135 = vmatprep.mubr.bf16.mxu1 %v6754_v5  ;;  %3704 = vmatprep.subr.bf16.mxu0 %v7590_v39  ;;  %v7642_v39 = vld [vmem:[#allocation11 + $0x80] ss:$12 sps:$4 sm:$0xff]  }
 0x798   : > { %7121 = vmatprep.subr.bf16.mxu1 %v7591_v3  ;;  %3734 = vmatprep.mubr.bf16.mxu0 %v9605_v27 }
 0x79a   : > { %3705 = vmatpush1.bf16.msra.mxu0 %v7588_v18  ;;  %7122 = vmatpush3.bf16.msra.mxu1 %v7591_v3  ;;  %v7643_v3 = vld [vmem:[#allocation11 + $0x68] ss:$12 sps:$4 sm:$0xff]   ;;  %v7645_v18 = vld [vmem:[#allocation11 + $0x38] ss:$12 sps:$4 sm:$0xff]  }
 0x79b   : > { %3706 = vmatprep.subr.bf16.mxu0 %v7594_v14  ;;  %7123 = vmatprep.subr.bf16.mxu1 %v7595_v25  ;;  %v7646_v14 = vld [vmem:[#allocation11 + $0x20] ss:$12 sps:$4 sm:$0xff]  }
 0x79e   : > { %3707 = vmatpush1.bf16.msra.mxu0 %v7592_v30  ;;  %7124 = vmatpush3.bf16.msra.mxu1 %v7595_v25  ;;  %v7647_v25 = vld [vmem:[#allocation11 + $0x8] ss:$12 sps:$4 sm:$0xff]   ;;  %v1275_v30 = vrot.slane %v8377_v34, 6  ;;  %v1285_v34 = vrot.slane %v8435_v8, 1 }
 0x79f   : > { %3708 = vmatprep.subr.bf16.mxu0 %v7598_v35  ;;  %7125 = vmatprep.subr.bf16.mxu1 %v7599_v15  ;;  %v1277_v35 = vrot.slane %v8403_v50, 5 }
 0x7a2   : > { %3709 = vmatpush1.bf16.msra.mxu0 %v7596_v12  ;;  %7126 = vmatpush3.bf16.msra.mxu1 %v7599_v15  ;;  %v1274_v15 = vrot.slane %v8400_v49, 7  ;;  %v1279_v12 = vrot.slane %v8416_v59, 4 }
 0x7a3   : > { %3710 = vmatprep.subr.bf16.mxu0 %v7602_v6  ;;  %7127 = vmatprep.subr.bf16.mxu1 %v7603_v48  ;;  %v1281_v6 = vrot.slane %v8423_v63, 3 }
 0x7a6   : > { %3711 = vmatpush1.bf16.msra.mxu0 %v7600_v20  ;;  %7128 = vmatpush3.bf16.msra.mxu1 %v7603_v48 }
 0x7a7   : > { %3712 = vmatprep.subr.bf16.mxu0 %v7606_v38  ;;  %7129 = vmatprep.subr.bf16.mxu1 %v7607_v58  ;;  %v1276_v38 = vsel %vm912_vm1, %v1275_v30, %v1274_v15 }
 0x7aa   : > { %3713 = vmatpush1.bf16.msra.mxu0 %v7604_v45  ;;  %7130 = vmatpush3.bf16.msra.mxu1 %v7607_v58  ;;  %v1283_v58 = vrot.slane %v8429_v4, 2 }
 0x7ab   : > { %3714 = vmatprep.subr.bf16.mxu0 %v7610_v29  ;;  %7131 = vmatprep.subr.bf16.mxu1 %v7611_v37  ;;  %v1278_v29 = vsel %vm915_vm2, %v1277_v35, %v1276_v38 }
 0x7ac   : > { %v1280_v50 = vsel %vm918_vm3, %v1279_v12, %v1278_v29 }
 0x7ad   : > { %v1282_v63 = vsel %vm921_vm4, %v1281_v6, %v1280_v50 }
 0x7ae   : > { %3715 = vmatpush1.bf16.msra.mxu0 %v7608_v33  ;;  %7132 = vmatpush3.bf16.msra.mxu1 %v7611_v37  ;;  %v9607_v33 = vld [vmem:[#allocation21_spill] sm:$0xff] }
 0x7af   : > { %3716 = vmatprep.subr.bf16.mxu0 %v7614_v9  ;;  %7133 = vmatprep.subr.bf16.mxu1 %v7615_v16  ;;  %v1284_v9 = vsel %vm924_vm5, %v1283_v58, %v1282_v63  ;;  %v7651_v63 = vld [vmem:[#allocation11 + $0x68] ss:$12 sps:$4 sm:$0xff]  }
 0x7b0   : > { %v1286_v4 = vsel %vm927_vm6, %v1285_v34, %v1284_v9  ;;  %v7652_v9 = vld [vmem:[#allocation11 + $0x50] ss:$12 sps:$4 sm:$0xff]  }
 0x7b1   : > { %v1287_v8 = vsel %vm930_vm7, %v8453_v42, %v1286_v4  ;;  %v1295_v42 = vrot.slane %v8536_v51, 3  ;;  %v7654_v4 = vld [vmem:[#allocation11 + $0x20] ss:$12 sps:$4 sm:$0xff]  }
 0x7b2   : > { %3717 = vmatpush1.bf16.msra.mxu0 %v7612_v40  ;;  %7134 = vmatpush3.bf16.msra.mxu1 %v7615_v16 }
 0x7b3   : > { %7143 = vmatprep.subr.bf16.mxu1 %v9606_v23  ;;  %4044 = vmatprep.subr.bf16.mxu0 %v9041_v52 }
 0x7b5   : > { %3735 = vmatmul.mubr.bf16.vlgmr.msra.gmra.mxu0 %v6754_v5  ;;  %7136 = vmatmul.mubr.bf16.vlgmr.msra.gmra.mxu1 %v6755_v2  ;;  %v7644_v5 = vld [vmem:[#allocation11 + $0x50] ss:$12 sps:$4 sm:$0xff]  }
 0x7b6   : > { %7139 = vmatprep.mubr.bf16.mxu1 %v6756_v36  ;;  %3744 = vmatprep.mubr.bf16.mxu0 %v9605_v27 }
 0x7b7   : > { %4045 = vmatpush1.bf16.msra.mxu0 %v9039_v19  ;;  %7144 = vmatpush3.bf16.msra.mxu1 %v7640_v11 }
 0x7b8   : > { %4046 = vmatprep.subr.bf16.mxu0 %v9044_v56  ;;  %7145 = vmatprep.subr.bf16.mxu1 %v9606_v23 }
 0x7bb   : > { %4047 = vmatpush1.bf16.msra.mxu0 %v9047_v22  ;;  %7146 = vmatpush3.bf16.msra.mxu1 %v7641_v0 }
 0x7bc   : > { %4048 = vmatprep.subr.bf16.mxu0 %v9050_v28  ;;  %7147 = vmatprep.subr.bf16.mxu1 %v9606_v23 }
 0x7bd   : > { %3745 = vmatmul.mubr.bf16.gmra.mxu0 %v6755_v2 }
 0x7be   : > { %3754 = vmatprep.mubr.bf16.mxu0 %v9605_v27 }
 0x7bf   : > { %4049 = vmatpush1.bf16.msra.mxu0 %v9053_v62  ;;  %7148 = vmatpush3.bf16.msra.mxu1 %v7642_v39 }
 0x7c0   : > { %4050 = vmatprep.subr.bf16.mxu0 %v9056_v21  ;;  %7149 = vmatprep.subr.bf16.mxu1 %v9606_v23 }
 0x7c3   : > { %4051 = vmatpush1.bf16.msra.mxu0 %v9059_v31  ;;  %7150 = vmatpush3.bf16.msra.mxu1 %v7643_v3  ;;  %v1288_v3 = vrot.slane %v8519_v24, 7  ;;  %v1297_v24 = vrot.slane %v8542_v61, 2 }
 0x7c4   : > { %4052 = vmatprep.subr.bf16.mxu0 %v9062_v10  ;;  %7151 = vmatprep.subr.bf16.mxu1 %v9606_v23 }
 0x7c5   : > { %3755 = vmatmul.mubr.bf16.gmra.mxu0 %v6756_v36 }
 0x7c6   : > { %3764 = vmatprep.mubr.bf16.mxu0 %v9605_v27 }
 0x7c7   : > { %4053 = vmatpush1.bf16.msra.mxu0 %v9065_v60  ;;  %7152 = vmatpush3.bf16.msra.mxu1 %v7644_v5  ;;  %v1289_v5 = vrot.slane %v8504_v1, 6 }
 0x7c8   : > { %4054 = vmatprep.subr.bf16.mxu0 %v9068_v47  ;;  %7153 = vmatprep.subr.bf16.mxu1 %v9606_v23 }
 0x7cb   : > { %4055 = vmatpush1.bf16.msra.mxu0 %v9071_v7  ;;  %7154 = vmatpush3.bf16.msra.mxu1 %v7645_v18  ;;  %v1291_v18 = vrot.slane %v8515_v54, 5  ;;  %v1299_v54 = vrot.slane %v8559_v13, 1 }
 0x7cc   : > { %4056 = vmatprep.subr.bf16.mxu0 %v9074_v44  ;;  %7155 = vmatprep.subr.bf16.mxu1 %v9606_v23 }
 0x7cf   : > { %4057 = vmatpush1.bf16.msra.mxu0 %v9077_v17  ;;  %7156 = vmatpush3.bf16.msra.mxu1 %v7646_v14 }
 0x7d0   : > { %4058 = vmatprep.subr.bf16.mxu0 %v9080_v53  ;;  %7157 = vmatprep.subr.bf16.mxu1 %v9606_v23 }
 0x7d3   : > { %4059 = vmatpush1.bf16.msra.mxu0 %v9084_v57  ;;  %7158 = vmatpush3.bf16.msra.mxu1 %v7647_v25  ;;  %v1290_v25 = vsel %vm912_vm1, %v1289_v5, %v1288_v3 }
 0x7d4   : > { %4312 = vmatprep.subr.bf16.mxu0 %v9041_v52  ;;  %7163 = vmatprep.subr.bf16.mxu1 %v9606_v23  ;;  %v1292_v35 = vsel %vm915_vm2, %v1291_v18, %v1290_v25 }
 0x855   : > { %v3411_v48 = vpop.f32.mrf.mxu0  ;;  %v3452_v20 = vpop.f32.mrf.mxu1 }
 0x856   : > { %v3412_v45 = vadd.f32 %v3411_v48, %v8389_v41 }
 0x857   : > { %v3413_v37 = vpop.f32.mrf.mxu0  ;;  %v7117_v49 = vpop.f32.mrf.mxu1 }
 0x858   : > { %v3461_v59 = vadd.f32 %v3412_v45, %v9607_v33  ;;  %v3414_v41 = vadd.f32 %v3413_v37, %v8395_v46  ;;  %v1293_v46 = vrot.slane %v8522_v26, 4  ;;  %v3453_v26 = vadd.f32 %v3452_v20, %v8555_v43  ;;  %v9133_v43 = vld [vmem:[#allocation4 + $0x8] sm:$0xff] }
 0x859   : > { %v3415_v16 = vpop.f32.mrf.mxu0  ;;  %v3455_v40 = vpop.f32.mrf.mxu1  ;;  %v7649_v20 = vld [vmem:[#allocation11 + $0x98] ss:$12 sps:$4 sm:$0xff]  }
 0x85a   : > { %v6503_v2 = vmul.f32 -1.442695, %v3461_v59  ;;  %v3468_v0 = vadd.f32 %v3414_v41, %v1287_v8  ;;  %v1294_v15 = vsel %vm918_vm3, %v1293_v46, %v1292_v35  ;;  %v7650_v59 = vld [vmem:[#allocation11 + $0x80] ss:$12 sps:$4 sm:$0xff]   ;;  %v7653_v40 = vld [vmem:[#allocation11 + $0x38] ss:$12 sps:$4 sm:$0xff]  }
 0x85b   : > { %v3416_v36 = vpop.f32.mrf.mxu0  ;;  %v7118_v11 = vpop.f32.mrf.mxu1  ;;  %v1296_v1 = vsel %vm921_vm4, %v1295_v42, %v1294_v15 }
 0x85c   : > { %7798 = vpow2.f32 %v6503_v2  ;;  %v6504_v39 = vmul.f32 -1.442695, %v3468_v0  ;;  %v1298_v6 = vsel %vm924_vm5, %v1297_v24, %v1296_v1  ;;  %v7655_v36 = vld [vmem:[#allocation11 + $0x8] ss:$12 sps:$4 sm:$0xff]   ;;  %v3533_v1 = vld [vmem:[%s9577_s7] sm:$0x7] }
 0x85d   : > { %v1300_v38 = vsel %vm927_vm6, %v1299_v54, %v1298_v6  ;;  %v3864_v6 = vld [vmem:[%s9578_s8] sm:$0x7] }
 0x85e   : > { %7800 = vpow2.f32 %v6504_v39  ;;  %v1301_v51 = vsel %vm930_vm7, %v8569_v32, %v1300_v38  ;;  %v3883_v32 = vpack.c.bf16 %v9133_v43, %v9133_v43 }
 0x869   : > { %v7799_v14 = vpop.eup %7798 }
 0x86a   : > { %v3465_v30 = vadd.f32 1.0, %v7799_v14 }
 0x86b   : > { %v7801_v12 = vpop.eup %7800 }
 0x86c   : > { %7802 = vrcp.f32 %v3465_v30  ;;  %v3472_v48 = vadd.f32 1.0, %v7801_v12 }
 0x86e   : > { %7804 = vrcp.f32 %v3472_v48 }
 0x875   : > { %v3736_v16 = vpop.f32.mrf.mxu0  ;;  %v9178_v5 = vpop.f32.mrf.mxu1 }
 0x877   : > { %v3738_v2 = vpop.f32.mrf.mxu0  ;;  %v3809_v14 = vpop.f32.mrf.mxu1 }
 0x879   : > { %v7803_v58 = vpop.eup %7802  ;;  %v9164_v41 = vpop.f32.mrf.mxu0 }
 0x87a   : > { %v3475_v45 = vmul.f32 %v7803_v58, %v3453_v26  ;;  %v9184_v30 = vpop.f32.mrf.mxu1  ;;  %v9609_v26 = vld [vmem:[#allocation18_spill] sm:$0xff] }
 0x87b   : > { %v7805_v61 = vpop.eup %7804  ;;  %v9167_v11 = vpop.f32.mrf.mxu0  ;;  %v9211_v58 = vrot.slane %v3533_v1, %v9609_v26 }
 0x87c   : > { %v3476_v29 = vadd.f32 %v3475_v45, %v1301_v51  ;;  %v3478_v34 = vsub.f32 1.0, %v7805_v61  ;;  %v3480_v13 = vmul.f32 %v7805_v61, %v9023_v55  ;;  %v9188_v35 = vpop.f32.mrf.mxu1  ;;  %v9214_v45 = vrot.slane %v3864_v6, %v9609_v26 }
 0x87d   : > { %v9170_v8 = vpop.f32.mrf.mxu0 }
 0x87e   : > { %7806 = vtanh.f32 %v3476_v29 }
 0x87f   : > { %v9172_v0 = vpop.f32.mrf.mxu0 }
 0x881   : > { %v9174_v39 = vpop.f32.mrf.mxu0 }
 0x883   : > { %v9176_v3 = vpop.f32.mrf.mxu0 }
 0x885   : > { %v9180_v18 = vpop.f32.mrf.mxu0 }
 0x887   : > { %v9182_v25 = vpop.f32.mrf.mxu0 }
 0x889   : > { %v9186_v46 = vpop.f32.mrf.mxu0 }
 0x88b   : > { %v7807_v50 = vpop.eup %7806  ;;  %v9190_v42 = vpop.f32.mrf.mxu0 }
 0x88c   : > { %v3479_v37 = vmul.f32 %v7807_v50, %v3478_v34  ;;  %v3737_v50 = vadd.f32 %v3736_v16, %v9211_v58 }
 0x88e   : > { %v3481_v49 = vadd.f32 %v3480_v13, %v3479_v37  ;;  %v9611_v13 = vld [vmem:[#allocation19_spill] sm:$0xff] }
 0x890   : > { %3482 = vst [vmem:[#allocation4] sm:$0xff] %v3481_v49  ;;  %v6757_v33 = vpack.c.bf16 %v3481_v49, %v9023_v55  ;;  %v7648_v55 = vld [vmem:[#allocation11 + $0xb0] ss:$12 sps:$4 sm:$0xff]   ;;  %v9223_v49 = vrot.slane %v3864_v6, %v9611_v13 }
 0x892   : > { %3765 = vmatmul.mubr.bf16.gmra.mxu0 %v6757_v33  ;;  %7140 = vmatmul.mubr.bf16.gmra.mxu1 %v6757_v33 }
 0x893   : > { %4076 = vmatprep.mubr.bf16.mxu0 %v9605_v27  ;;  %7159 = vmatprep.mubr.msk.bf16.mxu1 %vm8077_vm0, %v9606_v23 }
 0x89a   : > { %4077 = vmatmul.mubr.bf16.vlgmr.msra.gmra.mxu0 %v3883_v32  ;;  %7160 = vmatmul.mubr.bf16.vlgmr.msra.gmra.mxu1 %v3883_v32 }
 0x89b   : > { %4313 = vmatpush1.bf16.msra.mxu0 %v9039_v19  ;;  %4344 = vmatprep.mubr.bf16.mxu0 %v9605_v27 }
 0x89c   : > { %4314 = vmatprep.subr.bf16.mxu0 %v9044_v56  ;;  %7179 = vmatprep.mubr.msk.bf16.mxu1 %vm8077_vm0, %v9606_v23 }
 0x89d   : > { %7164 = vmatpush3.bf16.msra.mxu1 %v7648_v55  ;;  %v9226_v55 = vrot.slane %v3533_v1, %v9611_v13 }
 0x89e   : > { %7165 = vmatprep.subr.bf16.mxu1 %v9606_v23 }
 0x89f   : > { %4315 = vmatpush1.bf16.msra.mxu0 %v9047_v22  ;;  %v3739_v16 = vadd.f32 %v3738_v2, %v9226_v55 }
 0x8a0   : > { %4316 = vmatprep.subr.bf16.mxu0 %v9050_v28 }
 0x8a1   : > { %7166 = vmatpush3.bf16.msra.mxu1 %v7649_v20 }
 0x8a2   : > { %7167 = vmatprep.subr.bf16.mxu1 %v9606_v23 }
 0x8a3   : > { %4317 = vmatpush1.bf16.msra.mxu0 %v9053_v62 }
 0x8a4   : > { %4318 = vmatprep.subr.bf16.mxu0 %v9056_v21 }
 0x8a5   : > { %7168 = vmatpush3.bf16.msra.mxu1 %v7650_v59 }
 0x8a6   : > { %7169 = vmatprep.subr.bf16.mxu1 %v9606_v23 }
 0x8a7   : > { %4319 = vmatpush1.bf16.msra.mxu0 %v9059_v31 }
 0x8a8   : > { %4320 = vmatprep.subr.bf16.mxu0 %v9062_v10 }
 0x8a9   : > { %7170 = vmatpush3.bf16.msra.mxu1 %v7651_v63 }
 0x8aa   : > { %7171 = vmatprep.subr.bf16.mxu1 %v9606_v23 }
 0x8ab   : > { %4321 = vmatpush1.bf16.msra.mxu0 %v9065_v60 }
 0x8ac   : > { %4322 = vmatprep.subr.bf16.mxu0 %v9068_v47 }
 0x8ad   : > { %7172 = vmatpush3.bf16.msra.mxu1 %v7652_v9 }
 0x8ae   : > { %7173 = vmatprep.subr.bf16.mxu1 %v9606_v23 }
 0x8af   : > { %4323 = vmatpush1.bf16.msra.mxu0 %v9071_v7 }
 0x8b0   : > { %4324 = vmatprep.subr.bf16.mxu0 %v9074_v44 }
 0x8b1   : > { %7174 = vmatpush3.bf16.msra.mxu1 %v7653_v40 }
 0x8b2   : > { %7175 = vmatprep.subr.bf16.mxu1 %v9606_v23 }
 0x8b3   : > { %4325 = vmatpush1.bf16.msra.mxu0 %v9077_v17 }
 0x8b4   : > { %4326 = vmatprep.subr.bf16.mxu0 %v9080_v53 }
 0x8b5   : > { %7176 = vmatpush3.bf16.msra.mxu1 %v7654_v4 }
 0x8b6   : > { %7177 = vmatprep.subr.bf16.mxu1 %v9606_v23 }
 0x8b7   : > { %4327 = vmatpush1.bf16.msra.mxu0 %v9084_v57 }
 0x8b8   : > { %4580 = vmatprep.subr.bf16.mxu0 %v9041_v52 }
 0x8b9   : > { %7178 = vmatpush3.bf16.msra.mxu1 %v7655_v36 }
 0x8ba   : > { %7183 = vmatprep.subr.bf16.mxu1 %v9606_v23 }
 0x952   : > { %v9192_v15 = vpop.f32.mrf.mxu0  ;;  %v9194_v24 = vpop.f32.mrf.mxu1 }
 0x954   : > { %v9199_v12 = vpop.f32.mrf.mxu0  ;;  %v9201_v54 = vpop.f32.mrf.mxu1 }
 0x956   : > { %v9206_v48 = vpop.f32.mrf.mxu0  ;;  %v9208_v38 = vpop.f32.mrf.mxu1 }
 0x957   : > { %9608 = vst [vmem:[#allocation21_spill] sm:$0xff] %v9208_v38 }
 0x958   : > { %v9216_v51 = vpop.f32.mrf.mxu0  ;;  %v9218_v29 = vpop.f32.mrf.mxu1 }
 0x959   : > { %9610 = vst [vmem:[#allocation18_spill] sm:$0xff] %v9216_v51 }
 0x95a   : > { %v4078_v61 = vpop.f32.mrf.mxu0  ;;  %v4119_v34 = vpop.f32.mrf.mxu1 }
 0x95b   : > { %v4079_v37 = vadd.f32 %v4078_v61, %v9214_v45 }
 0x95c   : > { %v4080_v33 = vpop.f32.mrf.mxu0  ;;  %v7161_v32 = vpop.f32.mrf.mxu1 }
 0x95d   : > { %v4128_v20 = vadd.f32 %v4079_v37, %v3737_v50  ;;  %v4081_v40 = vadd.f32 %v4080_v33, %v9223_v49  ;;  %v9612_v32 = vld [vmem:[#allocation20_spill] sm:$0xff] }
 0x95e   : > { %v4082_v59 = vpop.f32.mrf.mxu0  ;;  %v4122_v63 = vpop.f32.mrf.mxu1  ;;  %v9231_v13 = vrot.slane %v3864_v6, %v9612_v32  ;;  %v9235_v33 = vrot.slane %v3533_v1, %v9612_v32  ;;  %v7658_v1 = vld [vmem:[#allocation11 + $0x80] ss:$12 sps:$4 sm:$0xff]   ;;  %v7663_v32 = vld [vmem:[#allocation11 + $0x8] ss:$12 sps:$4 sm:$0xff]  }
 0x95f   : > { %v6557_v9 = vmul.f32 -1.442695, %v4128_v20  ;;  %v4135_v26 = vadd.f32 %v4081_v40, %v3739_v16  ;;  %v7659_v16 = vld [vmem:[#allocation11 + $0x68] ss:$12 sps:$4 sm:$0xff]  }
 0x960   : > { %v4083_v4 = vpop.f32.mrf.mxu0  ;;  %v7162_v36 = vpop.f32.mrf.mxu1  ;;  %v4120_v20 = vadd.f32 %v4119_v34, %v9231_v13  ;;  %v3810_v2 = vadd.f32 %v3809_v14, %v9235_v33  ;;  %v7657_v14 = vld [vmem:[#allocation11 + $0x98] ss:$12 sps:$4 sm:$0xff]  }
 0x961   : > { %7808 = vpow2.f32 %v6557_v9  ;;  %v6558_v61 = vmul.f32 -1.442695, %v4135_v26  ;;  %v7660_v26 = vld [vmem:[#allocation11 + $0x50] ss:$12 sps:$4 sm:$0xff]  }
 0x963   : > { %7810 = vpow2.f32 %v6558_v61  ;;  %v7661_v61 = vld [vmem:[#allocation11 + $0x38] ss:$12 sps:$4 sm:$0xff]  }
 0x96e   : > { %v7809_v38 = vpop.eup %7808 }
 0x96f   : > { %v4132_v51 = vadd.f32 1.0, %v7809_v38 }
 0x970   : > { %v7811_v50 = vpop.eup %7810 }
 0x971   : > { %7812 = vrcp.f32 %v4132_v51  ;;  %v4139_v37 = vadd.f32 1.0, %v7811_v50 }
 0x973   : > { %7814 = vrcp.f32 %v4139_v37 }
 0x97e   : > { %v7813_v59 = vpop.eup %7812 }
 0x97f   : > { %v4142_v63 = vmul.f32 %v7813_v59, %v4120_v20  ;;  %v3741_v20 = vadd.f32 %v9164_v41, %v9211_v58 }
 0x980   : > { %v7815_v40 = vpop.eup %7814 }
 0x981   : > { %v4143_v9 = vadd.f32 %v4142_v63, %v3810_v2  ;;  %v4145_v38 = vsub.f32 1.0, %v7815_v40  ;;  %v4147_v6 = vmul.f32 %v7815_v40, %v9133_v43  ;;  %v7656_v43 = vld [vmem:[#allocation11 + $0xb0] ss:$12 sps:$4 sm:$0xff]  }
 0x983   : > { %7816 = vtanh.f32 %v4143_v9 }
 0x990   : > { %v7817_v51 = vpop.eup %7816 }
 0x991   : > { %v4146_v4 = vmul.f32 %v7817_v51, %v4145_v38 }
 0x993   : > { %v9239_v36 = vadd.f32 %v4147_v6, %v4146_v4 }
 0x995   : > { %v4151_v34 = vpack.c.bf16 %v9239_v36, %v9239_v36 }
 0x997   : > { %4345 = vmatmul.mubr.bf16.vlgmr.msra.gmra.mxu0 %v4151_v34  ;;  %7180 = vmatmul.mubr.bf16.vlgmr.msra.gmra.mxu1 %v4151_v34 }
 0x998   : > { %4581 = vmatpush1.bf16.msra.mxu0 %v9039_v19  ;;  %4612 = vmatprep.mubr.bf16.mxu0 %v9605_v27 }
 0x999   : > { %4582 = vmatprep.subr.bf16.mxu0 %v9044_v56  ;;  %7199 = vmatprep.mubr.msk.bf16.mxu1 %vm8077_vm0, %v9606_v23 }
 0x99a   : > { %7184 = vmatpush3.bf16.msra.mxu1 %v7656_v43  ;;  %v3743_v43 = vadd.f32 %v9167_v11, %v9226_v55 }
 0x99b   : > { %7185 = vmatprep.subr.bf16.mxu1 %v9606_v23 }
 0x99c   : > { %4583 = vmatpush1.bf16.msra.mxu0 %v9047_v22 }
 0x99d   : > { %4584 = vmatprep.subr.bf16.mxu0 %v9050_v28 }
 0x99e   : > { %7186 = vmatpush3.bf16.msra.mxu1 %v7657_v14 }
 0x99f   : > { %7187 = vmatprep.subr.bf16.mxu1 %v9606_v23 }
 0x9a0   : > { %4585 = vmatpush1.bf16.msra.mxu0 %v9053_v62 }
 0x9a1   : > { %4586 = vmatprep.subr.bf16.mxu0 %v9056_v21 }
 0x9a2   : > { %7188 = vmatpush3.bf16.msra.mxu1 %v7658_v1 }
 0x9a3   : > { %7189 = vmatprep.subr.bf16.mxu1 %v9606_v23 }
 0x9a4   : > { %4587 = vmatpush1.bf16.msra.mxu0 %v9059_v31 }
 0x9a5   : > { %4588 = vmatprep.subr.bf16.mxu0 %v9062_v10 }
 0x9a6   : > { %7190 = vmatpush3.bf16.msra.mxu1 %v7659_v16 }
 0x9a7   : > { %7191 = vmatprep.subr.bf16.mxu1 %v9606_v23 }
 0x9a8   : > { %4589 = vmatpush1.bf16.msra.mxu0 %v9065_v60 }
 0x9a9   : > { %4590 = vmatprep.subr.bf16.mxu0 %v9068_v47 }
 0x9aa   : > { %7192 = vmatpush3.bf16.msra.mxu1 %v7660_v26 }
 0x9ab   : > { %7193 = vmatprep.subr.bf16.mxu1 %v9606_v23 }
 0x9ac   : > { %4591 = vmatpush1.bf16.msra.mxu0 %v9071_v7 }
 0x9ad   : > { %4592 = vmatprep.subr.bf16.mxu0 %v9074_v44 }
 0x9ae   : > { %7194 = vmatpush3.bf16.msra.mxu1 %v7661_v61 }
 0x9af   : > { %7195 = vmatprep.subr.bf16.mxu1 %v9606_v23 }
 0x9b0   : > { %4593 = vmatpush1.bf16.msra.mxu0 %v9077_v17 }
 0x9b1   : > { %4594 = vmatprep.subr.bf16.mxu0 %v9080_v53 }
 0x9b4   : > { %4595 = vmatpush1.bf16.msra.mxu0 %v9084_v57 }
 0x9b5   : > { %4848 = vmatprep.subr.bf16.mxu0 %v9041_v52  ;;  %v7662_v52 = vld [vmem:[#allocation11 + $0x20] ss:$12 sps:$4 sm:$0xff]  }
 0x9b6   : > { %7196 = vmatpush3.bf16.msra.mxu1 %v7662_v52 }
 0x9b7   : > { %7197 = vmatprep.subr.bf16.mxu1 %v9606_v23 }
 0x9ba   : > { %7198 = vmatpush3.bf16.msra.mxu1 %v7663_v32 }
 0x9bb   : > { %7203 = vmatprep.subr.bf16.mxu1 %v9606_v23 }
 0xa57   : > { %v4346_v50 = vpop.f32.mrf.mxu0  ;;  %v4387_v37 = vpop.f32.mrf.mxu1 }
 0xa58   : > { %v4347_v59 = vadd.f32 %v4346_v50, %v9214_v45  ;;  %v4388_v52 = vadd.f32 %v4387_v37, %v9231_v13  ;;  %v3813_v50 = vadd.f32 %v9188_v35, %v9235_v33 }
 0xa59   : > { %v4348_v2 = vpop.f32.mrf.mxu0  ;;  %v7181_v63 = vpop.f32.mrf.mxu1 }
 0xa5a   : > { %v4396_v9 = vadd.f32 %v4347_v59, %v3741_v20  ;;  %v4349_v6 = vadd.f32 %v4348_v2, %v9223_v49 }
 0xa5b   : > { %v4350_v40 = vpop.f32.mrf.mxu0  ;;  %v4390_v38 = vpop.f32.mrf.mxu1 }
 0xa5c   : > { %v6583_v51 = vmul.f32 -1.442695, %v4396_v9  ;;  %v4403_v14 = vadd.f32 %v4349_v6, %v3743_v43  ;;  %v3749_v43 = vadd.f32 %v9172_v0, %v9226_v55 }
 0xa5d   : > { %v4351_v4 = vpop.f32.mrf.mxu0  ;;  %v7182_v34 = vpop.f32.mrf.mxu1 }
 0xa5e   : > { %7818 = vpow2.f32 %v6583_v51  ;;  %v6584_v1 = vmul.f32 -1.442695, %v4403_v14 }
 0xa60   : > { %7820 = vpow2.f32 %v6584_v1 }
 0xa6b   : > { %v7819_v41 = vpop.eup %7818 }
 0xa6c   : > { %v4400_v16 = vadd.f32 1.0, %v7819_v41 }
 0xa6d   : > { %v7821_v26 = vpop.eup %7820 }
 0xa6e   : > { %7822 = vrcp.f32 %v4400_v16  ;;  %v4407_v61 = vadd.f32 1.0, %v7821_v26 }
 0xa70   : > { %7824 = vrcp.f32 %v4407_v61 }
 0xa7b   : > { %v7823_v32 = vpop.eup %7822 }
 0xa7c   : > { %v4410_v20 = vmul.f32 %v7823_v32, %v4388_v52  ;;  %v3818_v32 = vadd.f32 %v9178_v5, %v9235_v33  ;;  %v9327_v5 = vld [vmem:[#allocation11 + $0xa8] ss:$12 sps:$4 sm:$0xff]  }
 0xa7d   : > { %v7825_v11 = vpop.eup %7824 }
 0xa7e   : > { %v4411_v59 = vadd.f32 %v4410_v20, %v3813_v50  ;;  %v4413_v2 = vsub.f32 1.0, %v7825_v11  ;;  %v4415_v40 = vmul.f32 %v7825_v11, %v9239_v36 }
 0xa80   : > { %7826 = vtanh.f32 %v4411_v59 }
 0xa8d   : > { %v7827_v63 = vpop.eup %7826 }
 0xa8e   : > { %v4414_v9 = vmul.f32 %v7827_v63, %v4413_v2 }
 0xa90   : > { %v9280_v38 = vadd.f32 %v4415_v40, %v4414_v9 }
 0xa92   : > { %v4419_v51 = vpack.c.bf16 %v9280_v38, %v9280_v38 }
 0xa94   : > { %4613 = vmatmul.mubr.bf16.vlgmr.msra.gmra.mxu0 %v4419_v51  ;;  %7200 = vmatmul.mubr.bf16.vlgmr.msra.gmra.mxu1 %v4419_v51  ;;  %v9329_v51 = vld [vmem:[#allocation11 + $0xac] ss:$12 sps:$4 sm:$0xff]  }
 0xa95   : > { %4849 = vmatpush1.bf16.msra.mxu0 %v9039_v19  ;;  %4880 = vmatprep.mubr.bf16.mxu0 %v9605_v27  ;;  %v7664_v19 = vld [vmem:[#allocation11 + $0xb0] ss:$12 sps:$4 sm:$0xff]  }
 0xa96   : > { %4850 = vmatprep.subr.bf16.mxu0 %v9044_v56  ;;  %7219 = vmatprep.mubr.msk.bf16.mxu1 %vm8077_vm0, %v9606_v23  ;;  %v7665_v56 = vld [vmem:[#allocation11 + $0x98] ss:$12 sps:$4 sm:$0xff]  }
 0xa97   : > { %7204 = vmatpush3.bf16.msra.mxu1 %v7664_v19  ;;  %v7675_v19 = vld [vmem:[#allocation11 + $0xb0] ss:$12 sps:$4 sm:$0xff]  }
 0xa98   : > { %7205 = vmatprep.subr.bf16.mxu1 %v9606_v23 }
 0xa99   : > { %4851 = vmatpush1.bf16.msra.mxu0 %v9047_v22  ;;  %v7666_v22 = vld [vmem:[#allocation11 + $0x80] ss:$12 sps:$4 sm:$0xff]  }
 0xa9a   : > { %4852 = vmatprep.subr.bf16.mxu0 %v9050_v28  ;;  %v7667_v28 = vld [vmem:[#allocation11 + $0x68] ss:$12 sps:$4 sm:$0xff]  }
 0xa9b   : > { %7206 = vmatpush3.bf16.msra.mxu1 %v7665_v56  ;;  %v9331_v56 = vld [vmem:[#allocation11 + $0x94] ss:$12 sps:$4 sm:$0xff]  }
 0xa9c   : > { %7207 = vmatprep.subr.bf16.mxu1 %v9606_v23 }
 0xa9d   : > { %4853 = vmatpush1.bf16.msra.mxu0 %v9053_v62  ;;  %v7668_v62 = vld [vmem:[#allocation11 + $0x50] ss:$12 sps:$4 sm:$0xff]  }
 0xa9e   : > { %4854 = vmatprep.subr.bf16.mxu0 %v9056_v21  ;;  %v7669_v21 = vld [vmem:[#allocation11 + $0x38] ss:$12 sps:$4 sm:$0xff]  }
 0xa9f   : > { %7208 = vmatpush3.bf16.msra.mxu1 %v7666_v22  ;;  %v9335_v22 = vld [vmem:[#allocation11 + $0x90] ss:$12 sps:$4 sm:$0xff]  }
 0xaa0   : > { %7209 = vmatprep.subr.bf16.mxu1 %v9606_v23 }
 0xaa1   : > { %4855 = vmatpush1.bf16.msra.mxu0 %v9059_v31  ;;  %v7670_v31 = vld [vmem:[#allocation11 + $0x20] ss:$12 sps:$4 sm:$0xff]  }
 0xaa2   : > { %4856 = vmatprep.subr.bf16.mxu0 %v9062_v10  ;;  %v7671_v10 = vld [vmem:[#allocation11 + $0x8] ss:$12 sps:$4 sm:$0xff]  }
 0xaa3   : > { %7210 = vmatpush3.bf16.msra.mxu1 %v7667_v28  ;;  %v9339_v28 = vld [vmem:[#allocation11 + $0x7c] ss:$12 sps:$4 sm:$0xff]  }
 0xaa4   : > { %7211 = vmatprep.subr.bf16.mxu1 %v9606_v23 }
 0xaa5   : > { %4857 = vmatpush1.bf16.msra.mxu0 %v9065_v60 }
 0xaa6   : > { %4858 = vmatprep.subr.bf16.mxu0 %v9068_v47 }
 0xaa7   : > { %7212 = vmatpush3.bf16.msra.mxu1 %v7668_v62  ;;  %v7683_v62 = vld [vmem:[#allocation11 + $0x80] ss:$12 sps:$4 sm:$0xff]  }
 0xaa8   : > { %7213 = vmatprep.subr.bf16.mxu1 %v9606_v23 }
 0xaa9   : > { %4859 = vmatpush1.bf16.msra.mxu0 %v9071_v7  ;;  %v3747_v7 = vadd.f32 %v9170_v8, %v9211_v58 }
 0xaaa   : > { %4860 = vmatprep.subr.bf16.mxu0 %v9074_v44 }
 0xaab   : > { %7214 = vmatpush3.bf16.msra.mxu1 %v7669_v21  ;;  %v9342_v21 = vld [vmem:[#allocation11 + $0x78] ss:$12 sps:$4 sm:$0xff]  }
 0xaac   : > { %7215 = vmatprep.subr.bf16.mxu1 %v9606_v23 }
 0xaad   : > { %4861 = vmatpush1.bf16.msra.mxu0 %v9077_v17 }
 0xaae   : > { %4862 = vmatprep.subr.bf16.mxu0 %v9080_v53 }
 0xaaf   : > { %7216 = vmatpush3.bf16.msra.mxu1 %v7670_v31  ;;  %v9346_v31 = vld [vmem:[#allocation11 + $0x64] ss:$12 sps:$4 sm:$0xff]  }
 0xab0   : > { %7217 = vmatprep.subr.bf16.mxu1 %v9606_v23 }
 0xab1   : > { %4863 = vmatpush1.bf16.msra.mxu0 %v9084_v57 }
 0xab2   : > { %5116 = vmatprep.subr.bf16.mxu0 %v9329_v51 }
 0xab3   : > { %7218 = vmatpush3.bf16.msra.mxu1 %v7671_v10  ;;  %v7687_v10 = vld [vmem:[#allocation11 + $0x68] ss:$12 sps:$4 sm:$0xff]  }
 0xab4   : > { %7223 = vmatprep.subr.bf16.mxu1 %v9606_v23 }
 0xb54   : > { %v4614_v60 = vpop.f32.mrf.mxu0  ;;  %v4655_v47 = vpop.f32.mrf.mxu1 }
 0xb55   : > { %v4615_v44 = vadd.f32 %v4614_v60, %v9214_v45  ;;  %v4656_v61 = vadd.f32 %v4655_v47, %v9231_v13  ;;  %v9349_v60 = vld [vmem:[#allocation11 + $0x60] ss:$12 sps:$4 sm:$0xff]  }
 0xb56   : > { %v4616_v17 = vpop.f32.mrf.mxu0  ;;  %v7201_v53 = vpop.f32.mrf.mxu1  ;;  %v9353_v47 = vld [vmem:[#allocation11 + $0x4c] ss:$12 sps:$4 sm:$0xff]  }
 0xb57   : > { %v4664_v57 = vadd.f32 %v4615_v44, %v3747_v7  ;;  %v4617_v6 = vadd.f32 %v4616_v17, %v9223_v49  ;;  %v7691_v7 = vld [vmem:[#allocation11 + $0x50] ss:$12 sps:$4 sm:$0xff]   ;;  %v9356_v44 = vld [vmem:[#allocation11 + $0x48] ss:$12 sps:$4 sm:$0xff]   ;;  %v7695_v53 = vld [vmem:[#allocation11 + $0x38] ss:$12 sps:$4 sm:$0xff]  }
 0xb58   : > { %v4618_v35 = vpop.f32.mrf.mxu0  ;;  %v4658_v36 = vpop.f32.mrf.mxu1  ;;  %v9360_v17 = vld [vmem:[#allocation11 + $0x34] ss:$12 sps:$4 sm:$0xff]  }
 0xb59   : > { %v6609_v37 = vmul.f32 -1.442695, %v4664_v57  ;;  %v4671_v14 = vadd.f32 %v4617_v6, %v3749_v43  ;;  %v9363_v57 = vld [vmem:[#allocation11 + $0x30] ss:$12 sps:$4 sm:$0xff]   ;;  %v7699_v36 = vld [vmem:[#allocation11 + $0x20] ss:$12 sps:$4 sm:$0xff]  }
 0xb5a   : > { %v4619_v4 = vpop.f32.mrf.mxu0  ;;  %v7202_v34 = vpop.f32.mrf.mxu1  ;;  %v9367_v35 = vld [vmem:[#allocation11 + $0x1c] ss:$12 sps:$4 sm:$0xff]   ;;  %v9374_v6 = vld [vmem:[#allocation11 + $0x4] ss:$12 sps:$4 sm:$0xff]  }
 0xb5b   : > { %7828 = vpow2.f32 %v6609_v37  ;;  %v6610_v1 = vmul.f32 -1.442695, %v4671_v14  ;;  %v9370_v37 = vld [vmem:[#allocation11 + $0x18] ss:$12 sps:$4 sm:$0xff]   ;;  %v7703_v4 = vld [vmem:[#allocation11 + $0x8] ss:$12 sps:$4 sm:$0xff]  }
 0xb5c   : > { %v9377_v34 = vld [vmem:[#allocation11] ss:$12 sps:$4 sm:$0xff]  }
 0xb5d   : > { %7830 = vpow2.f32 %v6610_v1  ;;  %v3751_v1 = vadd.f32 %v9174_v39, %v9211_v58 }
 0xb68   : > { %v7829_v8 = vpop.eup %7828 }
 0xb69   : > { %v4668_v41 = vadd.f32 1.0, %v7829_v8 }
 0xb6a   : > { %v7831_v16 = vpop.eup %7830 }
 0xb6b   : > { %7832 = vrcp.f32 %v4668_v41  ;;  %v4675_v26 = vadd.f32 1.0, %v7831_v16 }
 0xb6d   : > { %7834 = vrcp.f32 %v4675_v26 }
 0xb78   : > { %v7833_v52 = vpop.eup %7832 }
 0xb79   : > { %v4678_v50 = vmul.f32 %v7833_v52, %v4656_v61 }
 0xb7a   : > { %v7835_v0 = vpop.eup %7834 }
 0xb7b   : > { %v4679_v20 = vadd.f32 %v4678_v50, %v3818_v32  ;;  %v4681_v59 = vsub.f32 1.0, %v7835_v0  ;;  %v4683_v63 = vmul.f32 %v7835_v0, %v9280_v38  ;;  %v7679_v38 = vld [vmem:[#allocation11 + $0x98] ss:$12 sps:$4 sm:$0xff]  }
 0xb7d   : > { %7836 = vtanh.f32 %v4679_v20 }
 0xb8a   : > { %v7837_v11 = vpop.eup %7836 }
 0xb8b   : > { %v4682_v2 = vmul.f32 %v7837_v11, %v4681_v59  ;;  %v3753_v59 = vadd.f32 %v9176_v3, %v9226_v55 }
 0xb8d   : > { %v9320_v9 = vadd.f32 %v4683_v63, %v4682_v2 }
 0xb8f   : > { %v4687_v40 = vpack.c.bf16 %v9320_v9, %v9320_v9 }
 0xb91   : > { %4881 = vmatmul.mubr.bf16.vlgmr.msra.gmra.mxu0 %v4687_v40  ;;  %7220 = vmatmul.mubr.bf16.vlgmr.msra.gmra.mxu1 %v4687_v40 }
 0xb92   : > { %5148 = vmatprep.mubr.bf16.mxu0 %v9605_v27  ;;  %7239 = vmatprep.mubr.msk.bf16.mxu1 %vm8077_vm0, %v9606_v23 }
 0xb93   : > { %7224 = vmatpush3.bf16.msra.mxu1 %v7675_v19  ;;  %5117 = vmatpush1.bf16.msra.mxu0 %v9327_v5 }
 0xb94   : > { %7225 = vmatprep.subr.bf16.mxu1 %v9606_v23  ;;  %5118 = vmatprep.subr.bf16.mxu0 %v9331_v56 }
 0xb97   : > { %7226 = vmatpush3.bf16.msra.mxu1 %v7679_v38  ;;  %5119 = vmatpush1.bf16.msra.mxu0 %v9335_v22 }
 0xb98   : > { %7227 = vmatprep.subr.bf16.mxu1 %v9606_v23  ;;  %5120 = vmatprep.subr.bf16.mxu0 %v9339_v28 }
 0xb9b   : > { %7228 = vmatpush3.bf16.msra.mxu1 %v7683_v62  ;;  %5121 = vmatpush1.bf16.msra.mxu0 %v9342_v21 }
 0xb9c   : > { %7229 = vmatprep.subr.bf16.mxu1 %v9606_v23  ;;  %5122 = vmatprep.subr.bf16.mxu0 %v9346_v31 }
 0xb9f   : > { %7230 = vmatpush3.bf16.msra.mxu1 %v7687_v10  ;;  %5123 = vmatpush1.bf16.msra.mxu0 %v9349_v60  ;;  %v3821_v10 = vadd.f32 %v9184_v30, %v9235_v33  ;;  %v7704_v30 = vld [vmem:[#allocation11 + $0xb0] ss:$12 sps:$4 sm:$0xff]  }
 0xba0   : > { %7231 = vmatprep.subr.bf16.mxu1 %v9606_v23  ;;  %5124 = vmatprep.subr.bf16.mxu0 %v9353_v47 }
 0xba3   : > { %7232 = vmatpush3.bf16.msra.mxu1 %v7691_v7  ;;  %5125 = vmatpush1.bf16.msra.mxu0 %v9356_v44 }
 0xba4   : > { %7233 = vmatprep.subr.bf16.mxu1 %v9606_v23  ;;  %5126 = vmatprep.subr.bf16.mxu0 %v9360_v17 }
 0xba7   : > { %7234 = vmatpush3.bf16.msra.mxu1 %v7695_v53  ;;  %5127 = vmatpush1.bf16.msra.mxu0 %v9363_v57 }
 0xba8   : > { %7235 = vmatprep.subr.bf16.mxu1 %v9606_v23  ;;  %5128 = vmatprep.subr.bf16.mxu0 %v9367_v35 }
 0xbab   : > { %7236 = vmatpush3.bf16.msra.mxu1 %v7699_v36  ;;  %5129 = vmatpush1.bf16.msra.mxu0 %v9370_v37 }
 0xbac   : > { %7237 = vmatprep.subr.bf16.mxu1 %v9606_v23  ;;  %5130 = vmatprep.subr.bf16.mxu0 %v9374_v6 }
 0xbaf   : > { %7238 = vmatpush3.bf16.msra.mxu1 %v7703_v4  ;;  %5131 = vmatpush1.bf16.msra.mxu0 %v9377_v34 }
 0xbb0   : > { %7243 = vmatprep.subr.bf16.mxu1 %v9606_v23  ;;  %5384 = vmatprep.subr.bf16.mxu0 %v9329_v51 }
 0xc51   : > { %v4882_v43 = vpop.f32.mrf.mxu0  ;;  %v4923_v14 = vpop.f32.mrf.mxu1 }
 0xc52   : > { %v4883_v8 = vadd.f32 %v4882_v43, %v9214_v45  ;;  %v4924_v38 = vadd.f32 %v4923_v14, %v9231_v13  ;;  %v7706_v14 = vld [vmem:[#allocation11 + $0x80] ss:$12 sps:$4 sm:$0xff]  }
 0xc53   : > { %v4884_v41 = vpop.f32.mrf.mxu0  ;;  %v7221_v16 = vpop.f32.mrf.mxu1 }
 0xc54   : > { %v4932_v26 = vadd.f32 %v4883_v8, %v3751_v1  ;;  %v4885_v50 = vadd.f32 %v4884_v41, %v9223_v49  ;;  %v7707_v16 = vld [vmem:[#allocation11 + $0x68] ss:$12 sps:$4 sm:$0xff]  }
 0xc55   : > { %v4886_v61 = vpop.f32.mrf.mxu0  ;;  %v4926_v52 = vpop.f32.mrf.mxu1 }
 0xc56   : > { %v6635_v32 = vmul.f32 -1.442695, %v4932_v26  ;;  %v4939_v11 = vadd.f32 %v4885_v50, %v3753_v59  ;;  %v7708_v26 = vld [vmem:[#allocation11 + $0x50] ss:$12 sps:$4 sm:$0xff]   ;;  %v7709_v61 = vld [vmem:[#allocation11 + $0x38] ss:$12 sps:$4 sm:$0xff]  }
 0xc57   : > { %v4887_v20 = vpop.f32.mrf.mxu0  ;;  %v7222_v0 = vpop.f32.mrf.mxu1  ;;  %v7710_v52 = vld [vmem:[#allocation11 + $0x20] ss:$12 sps:$4 sm:$0xff]  }
 0xc58   : > { %7838 = vpow2.f32 %v6635_v32  ;;  %v6636_v2 = vmul.f32 -1.442695, %v4939_v11  ;;  %v7711_v32 = vld [vmem:[#allocation11 + $0x8] ss:$12 sps:$4 sm:$0xff]   ;;  %v3757_v0 = vadd.f32 %v9180_v18, %v9211_v58 }
 0xc5a   : > { %7840 = vpow2.f32 %v6636_v2 }
 0xc65   : > { %v7839_v39 = vpop.eup %7838 }
 0xc66   : > { %v4936_v63 = vadd.f32 1.0, %v7839_v39 }
 0xc67   : > { %v7841_v40 = vpop.eup %7840 }
 0xc68   : > { %7842 = vrcp.f32 %v4936_v63  ;;  %v4943_v19 = vadd.f32 1.0, %v7841_v40 }
 0xc6a   : > { %7844 = vrcp.f32 %v4943_v19 }
 0xc75   : > { %v7843_v62 = vpop.eup %7842 }
 0xc76   : > { %v4946_v7 = vmul.f32 %v7843_v62, %v4924_v38 }
 0xc77   : > { %v7845_v3 = vpop.eup %7844 }
 0xc78   : > { %v4947_v53 = vadd.f32 %v4946_v7, %v3821_v10  ;;  %v4949_v36 = vsub.f32 1.0, %v7845_v3  ;;  %v4951_v1 = vmul.f32 %v7845_v3, %v9320_v9  ;;  %v7705_v9 = vld [vmem:[#allocation11 + $0x98] ss:$12 sps:$4 sm:$0xff]   ;;  %v3759_v7 = vadd.f32 %v9182_v25, %v9226_v55 }
 0xc7a   : > { %7846 = vtanh.f32 %v4947_v53 }
 0xc87   : > { %v7847_v4 = vpop.eup %7846 }
 0xc88   : > { %v4950_v43 = vmul.f32 %v7847_v4, %v4949_v36 }
 0xc8a   : > { %v9394_v8 = vadd.f32 %v4951_v1, %v4950_v43 }
 0xc8c   : > { %v4955_v41 = vpack.c.bf16 %v9394_v8, %v9394_v8 }
 0xc8e   : > { %5149 = vmatmul.mubr.bf16.vlgmr.msra.gmra.mxu0 %v4955_v41  ;;  %7240 = vmatmul.mubr.bf16.vlgmr.msra.gmra.mxu1 %v4955_v41 }
 0xc8f   : > { %5385 = vmatpush1.bf16.msra.mxu0 %v9327_v5  ;;  %5416 = vmatprep.mubr.bf16.mxu0 %v9605_v27 }
 0xc90   : > { %5386 = vmatprep.subr.bf16.mxu0 %v9331_v56  ;;  %7259 = vmatprep.mubr.msk.bf16.mxu1 %vm8077_vm0, %v9606_v23 }
 0xc91   : > { %7244 = vmatpush3.bf16.msra.mxu1 %v7704_v30  ;;  %v3826_v30 = vadd.f32 %v9201_v54, %v9235_v33  ;;  %v7712_v54 = vld [vmem:[#allocation11 + $0xb0] ss:$12 sps:$4 sm:$0xff]  }
 0xc92   : > { %7245 = vmatprep.subr.bf16.mxu1 %v9606_v23 }
 0xc93   : > { %5387 = vmatpush1.bf16.msra.mxu0 %v9335_v22 }
 0xc94   : > { %5388 = vmatprep.subr.bf16.mxu0 %v9339_v28 }
 0xc95   : > { %7246 = vmatpush3.bf16.msra.mxu1 %v7705_v9 }
 0xc96   : > { %7247 = vmatprep.subr.bf16.mxu1 %v9606_v23 }
 0xc97   : > { %5389 = vmatpush1.bf16.msra.mxu0 %v9342_v21 }
 0xc98   : > { %5390 = vmatprep.subr.bf16.mxu0 %v9346_v31 }
 0xc99   : > { %7248 = vmatpush3.bf16.msra.mxu1 %v7706_v14 }
 0xc9a   : > { %7249 = vmatprep.subr.bf16.mxu1 %v9606_v23 }
 0xc9b   : > { %5391 = vmatpush1.bf16.msra.mxu0 %v9349_v60 }
 0xc9c   : > { %5392 = vmatprep.subr.bf16.mxu0 %v9353_v47 }
 0xc9d   : > { %7250 = vmatpush3.bf16.msra.mxu1 %v7707_v16 }
 0xc9e   : > { %7251 = vmatprep.subr.bf16.mxu1 %v9606_v23 }
 0xc9f   : > { %5393 = vmatpush1.bf16.msra.mxu0 %v9356_v44 }
 0xca0   : > { %5394 = vmatprep.subr.bf16.mxu0 %v9360_v17 }
 0xca1   : > { %7252 = vmatpush3.bf16.msra.mxu1 %v7708_v26 }
 0xca2   : > { %7253 = vmatprep.subr.bf16.mxu1 %v9606_v23 }
 0xca3   : > { %5395 = vmatpush1.bf16.msra.mxu0 %v9363_v57 }
 0xca4   : > { %5396 = vmatprep.subr.bf16.mxu0 %v9367_v35 }
 0xca5   : > { %7254 = vmatpush3.bf16.msra.mxu1 %v7709_v61 }
 0xca6   : > { %7255 = vmatprep.subr.bf16.mxu1 %v9606_v23 }
 0xca7   : > { %5397 = vmatpush1.bf16.msra.mxu0 %v9370_v37 }
 0xca8   : > { %5398 = vmatprep.subr.bf16.mxu0 %v9374_v6 }
 0xca9   : > { %7256 = vmatpush3.bf16.msra.mxu1 %v7710_v52 }
 0xcaa   : > { %7257 = vmatprep.subr.bf16.mxu1 %v9606_v23 }
 0xcab   : > { %5399 = vmatpush1.bf16.msra.mxu0 %v9377_v34 }
 0xcac   : > { %5652 = vmatprep.subr.bf16.mxu0 %v9329_v51 }
 0xcad   : > { %7258 = vmatpush3.bf16.msra.mxu1 %v7711_v32 }
 0xcae   : > { %7263 = vmatprep.subr.bf16.mxu1 %v9606_v23 }
 0xd4e   : > { %v5150_v50 = vpop.f32.mrf.mxu0  ;;  %v5191_v20 = vpop.f32.mrf.mxu1 }
 0xd4f   : > { %v5151_v59 = vadd.f32 %v5150_v50, %v9214_v45  ;;  %v5192_v1 = vadd.f32 %v5191_v20, %v9231_v13  ;;  %v7714_v20 = vld [vmem:[#allocation11 + $0x80] ss:$12 sps:$4 sm:$0xff]  }
 0xd50   : > { %v5152_v11 = vpop.f32.mrf.mxu0  ;;  %v7241_v2 = vpop.f32.mrf.mxu1 }
 0xd51   : > { %v5200_v39 = vadd.f32 %v5151_v59, %v3757_v0  ;;  %v5153_v38 = vadd.f32 %v5152_v11, %v9223_v49  ;;  %v7715_v0 = vld [vmem:[#allocation11 + $0x68] ss:$12 sps:$4 sm:$0xff]   ;;  %v7716_v59 = vld [vmem:[#allocation11 + $0x50] ss:$12 sps:$4 sm:$0xff]   ;;  %v7717_v11 = vld [vmem:[#allocation11 + $0x38] ss:$12 sps:$4 sm:$0xff]  }
 0xd52   : > { %v5154_v63 = vpop.f32.mrf.mxu0  ;;  %v5194_v40 = vpop.f32.mrf.mxu1  ;;  %v7719_v2 = vld [vmem:[#allocation11 + $0x8] ss:$12 sps:$4 sm:$0xff]  }
 0xd53   : > { %v6661_v19 = vmul.f32 -1.442695, %v5200_v39  ;;  %v5207_v53 = vadd.f32 %v5153_v38, %v3759_v7  ;;  %v3761_v40 = vadd.f32 %v9186_v46, %v9211_v58 }
 0xd54   : > { %v5155_v62 = vpop.f32.mrf.mxu0  ;;  %v7242_v10 = vpop.f32.mrf.mxu1 }
 0xd55   : > { %7848 = vpow2.f32 %v6661_v19  ;;  %v6662_v3 = vmul.f32 -1.442695, %v5207_v53 }
 0xd57   : > { %7850 = vpow2.f32 %v6662_v3 }
 0xd62   : > { %v7849_v18 = vpop.eup %7848 }
 0xd63   : > { %v5204_v36 = vadd.f32 1.0, %v7849_v18 }
 0xd64   : > { %v7851_v4 = vpop.eup %7850 }
 0xd65   : > { %7852 = vrcp.f32 %v5204_v36  ;;  %v5211_v43 = vadd.f32 1.0, %v7851_v4 }
 0xd67   : > { %7854 = vrcp.f32 %v5211_v43  ;;  %v3763_v43 = vadd.f32 %v9190_v42, %v9226_v55 }
 0xd72   : > { %v7853_v41 = vpop.eup %7852 }
 0xd73   : > { %v5214_v9 = vmul.f32 %v7853_v41, %v5192_v1 }
 0xd74   : > { %v7855_v25 = vpop.eup %7854 }
 0xd75   : > { %v5215_v14 = vadd.f32 %v5214_v9, %v3826_v30  ;;  %v5217_v16 = vsub.f32 1.0, %v7855_v25  ;;  %v5219_v52 = vmul.f32 %v7855_v25, %v9394_v8  ;;  %v7713_v8 = vld [vmem:[#allocation11 + $0x98] ss:$12 sps:$4 sm:$0xff]  }
 0xd77   : > { %7856 = vtanh.f32 %v5215_v14 }
 0xd84   : > { %v7857_v26 = vpop.eup %7856 }
 0xd85   : > { %v5218_v61 = vmul.f32 %v7857_v26, %v5217_v16  ;;  %v3829_v26 = vadd.f32 %v9218_v29, %v9235_v33  ;;  %v7721_v29 = vld [vmem:[#allocation11 + $0x98] ss:$12 sps:$4 sm:$0xff]  }
 0xd87   : > { %v9435_v32 = vadd.f32 %v5219_v52, %v5218_v61 }
 0xd89   : > { %v5223_v50 = vpack.c.bf16 %v9435_v32, %v9435_v32 }
 0xd8b   : > { %5417 = vmatmul.mubr.bf16.vlgmr.msra.gmra.mxu0 %v5223_v50  ;;  %7260 = vmatmul.mubr.bf16.vlgmr.msra.gmra.mxu1 %v5223_v50 }
 0xd8c   : > { %5653 = vmatpush1.bf16.msra.mxu0 %v9327_v5  ;;  %5684 = vmatprep.mubr.bf16.mxu0 %v9605_v27 }
 0xd8d   : > { %5654 = vmatprep.subr.bf16.mxu0 %v9331_v56  ;;  %7279 = vmatprep.mubr.msk.bf16.mxu1 %vm8077_vm0, %v9606_v23 }
 0xd8e   : > { %7264 = vmatpush3.bf16.msra.mxu1 %v7712_v54 }
 0xd8f   : > { %7265 = vmatprep.subr.bf16.mxu1 %v9606_v23 }
 0xd90   : > { %5655 = vmatpush1.bf16.msra.mxu0 %v9335_v22 }
 0xd91   : > { %5656 = vmatprep.subr.bf16.mxu0 %v9339_v28 }
 0xd92   : > { %7266 = vmatpush3.bf16.msra.mxu1 %v7713_v8 }
 0xd93   : > { %7267 = vmatprep.subr.bf16.mxu1 %v9606_v23 }
 0xd94   : > { %5657 = vmatpush1.bf16.msra.mxu0 %v9342_v21 }
 0xd95   : > { %5658 = vmatprep.subr.bf16.mxu0 %v9346_v31 }
 0xd96   : > { %7268 = vmatpush3.bf16.msra.mxu1 %v7714_v20 }
 0xd97   : > { %7269 = vmatprep.subr.bf16.mxu1 %v9606_v23 }
 0xd98   : > { %5659 = vmatpush1.bf16.msra.mxu0 %v9349_v60 }
 0xd99   : > { %5660 = vmatprep.subr.bf16.mxu0 %v9353_v47 }
 0xd9a   : > { %7270 = vmatpush3.bf16.msra.mxu1 %v7715_v0 }
 0xd9b   : > { %7271 = vmatprep.subr.bf16.mxu1 %v9606_v23 }
 0xd9c   : > { %5661 = vmatpush1.bf16.msra.mxu0 %v9356_v44 }
 0xd9d   : > { %5662 = vmatprep.subr.bf16.mxu0 %v9360_v17 }
 0xd9e   : > { %7272 = vmatpush3.bf16.msra.mxu1 %v7716_v59 }
 0xd9f   : > { %7273 = vmatprep.subr.bf16.mxu1 %v9606_v23 }
 0xda0   : > { %5663 = vmatpush1.bf16.msra.mxu0 %v9363_v57 }
 0xda1   : > { %5664 = vmatprep.subr.bf16.mxu0 %v9367_v35 }
 0xda2   : > { %7274 = vmatpush3.bf16.msra.mxu1 %v7717_v11 }
 0xda3   : > { %7275 = vmatprep.subr.bf16.mxu1 %v9606_v23 }
 0xda4   : > { %5665 = vmatpush1.bf16.msra.mxu0 %v9370_v37 }
 0xda5   : > { %5666 = vmatprep.subr.bf16.mxu0 %v9374_v6 }
 0xda8   : > { %5667 = vmatpush1.bf16.msra.mxu0 %v9377_v34 }
 0xda9   : > { %5920 = vmatprep.subr.bf16.mxu0 %v9329_v51  ;;  %v7718_v51 = vld [vmem:[#allocation11 + $0x20] ss:$12 sps:$4 sm:$0xff]  }
 0xdaa   : > { %7276 = vmatpush3.bf16.msra.mxu1 %v7718_v51 }
 0xdab   : > { %7277 = vmatprep.subr.bf16.mxu1 %v9606_v23 }
 0xdae   : > { %7278 = vmatpush3.bf16.msra.mxu1 %v7719_v2 }
 0xdaf   : > { %7283 = vmatprep.subr.bf16.mxu1 %v9606_v23 }
 0xe4b   : > { %v5418_v39 = vpop.f32.mrf.mxu0  ;;  %v5459_v63 = vpop.f32.mrf.mxu1 }
 0xe4c   : > { %v5419_v19 = vadd.f32 %v5418_v39, %v9214_v45  ;;  %v5460_v25 = vadd.f32 %v5459_v63, %v9231_v13 }
 0xe4d   : > { %v5420_v38 = vpop.f32.mrf.mxu0  ;;  %v7261_v62 = vpop.f32.mrf.mxu1 }
 0xe4e   : > { %v5468_v10 = vadd.f32 %v5419_v19, %v3761_v40  ;;  %v5421_v18 = vadd.f32 %v5420_v38, %v9223_v49 }
 0xe4f   : > { %v5422_v7 = vpop.f32.mrf.mxu0  ;;  %v5462_v53 = vpop.f32.mrf.mxu1 }
 0xe50   : > { %v6687_v3 = vmul.f32 -1.442695, %v5468_v10  ;;  %v5475_v1 = vadd.f32 %v5421_v18, %v3763_v43  ;;  %v3834_v7 = vadd.f32 %v9194_v24, %v9235_v33 }
 0xe51   : > { %v5423_v36 = vpop.f32.mrf.mxu0  ;;  %v7262_v4 = vpop.f32.mrf.mxu1 }
 0xe52   : > { %7858 = vpow2.f32 %v6687_v3  ;;  %v6688_v41 = vmul.f32 -1.442695, %v5475_v1 }
 0xe54   : > { %7860 = vpow2.f32 %v6688_v41 }
 0xe5f   : > { %v7859_v46 = vpop.eup %7858 }
 0xe60   : > { %v5472_v30 = vadd.f32 1.0, %v7859_v46 }
 0xe61   : > { %v7861_v9 = vpop.eup %7860 }
 0xe62   : > { %7862 = vrcp.f32 %v5472_v30  ;;  %v5479_v14 = vadd.f32 1.0, %v7861_v9  ;;  %v3771_v9 = vadd.f32 %v9206_v48, %v9211_v58 }
 0xe64   : > { %7864 = vrcp.f32 %v5479_v14 }
 0xe6f   : > { %v7863_v16 = vpop.eup %7862 }
 0xe70   : > { %v5482_v61 = vmul.f32 %v7863_v16, %v5460_v25 }
 0xe71   : > { %v7865_v42 = vpop.eup %7864 }
 0xe72   : > { %v5483_v52 = vadd.f32 %v5482_v61, %v3829_v26  ;;  %v5485_v50 = vsub.f32 1.0, %v7865_v42  ;;  %v5487_v20 = vmul.f32 %v7865_v42, %v9435_v32 }
 0xe74   : > { %7866 = vtanh.f32 %v5483_v52 }
 0xe81   : > { %v7867_v54 = vpop.eup %7866 }
 0xe82   : > { %v5486_v8 = vmul.f32 %v7867_v54, %v5485_v50 }
 0xe84   : > { %v9476_v0 = vadd.f32 %v5487_v20, %v5486_v8  ;;  %v9613_v8 = vld [vmem:[#allocation18_spill] sm:$0xff] }
 0xe85   : > { %v3773_v20 = vadd.f32 %v9613_v8, %v9226_v55 }
 0xe86   : > { %v5491_v59 = vpack.c.bf16 %v9476_v0, %v9476_v0 }
 0xe88   : > { %5685 = vmatmul.mubr.bf16.vlgmr.msra.gmra.mxu0 %v5491_v59  ;;  %7280 = vmatmul.mubr.bf16.vlgmr.msra.gmra.mxu1 %v5491_v59 }
 0xe89   : > { %5921 = vmatpush1.bf16.msra.mxu0 %v9327_v5  ;;  %5952 = vmatprep.mubr.bf16.mxu0 %v9605_v27  ;;  %v7720_v27 = vld [vmem:[#allocation11 + $0xb0] ss:$12 sps:$4 sm:$0xff]   ;;  %v7722_v5 = vld [vmem:[#allocation11 + $0x80] ss:$12 sps:$4 sm:$0xff]  }
 0xe8a   : > { %5922 = vmatprep.subr.bf16.mxu0 %v9331_v56  ;;  %7299 = vmatprep.mubr.msk.bf16.mxu1 %vm8077_vm0, %v9606_v23  ;;  %v7723_v56 = vld [vmem:[#allocation11 + $0x68] ss:$12 sps:$4 sm:$0xff]  }
 0xe8b   : > { %7284 = vmatpush3.bf16.msra.mxu1 %v7720_v27 }
 0xe8c   : > { %7285 = vmatprep.subr.bf16.mxu1 %v9606_v23 }
 0xe8d   : > { %5923 = vmatpush1.bf16.msra.mxu0 %v9335_v22  ;;  %v7724_v22 = vld [vmem:[#allocation11 + $0x50] ss:$12 sps:$4 sm:$0xff]  }
 0xe8e   : > { %5924 = vmatprep.subr.bf16.mxu0 %v9339_v28  ;;  %v7725_v28 = vld [vmem:[#allocation11 + $0x38] ss:$12 sps:$4 sm:$0xff]  }
 0xe8f   : > { %7286 = vmatpush3.bf16.msra.mxu1 %v7721_v29 }
 0xe90   : > { %7287 = vmatprep.subr.bf16.mxu1 %v9606_v23 }
 0xe91   : > { %5925 = vmatpush1.bf16.msra.mxu0 %v9342_v21  ;;  %v7726_v21 = vld [vmem:[#allocation11 + $0x20] ss:$12 sps:$4 sm:$0xff]  }
 0xe92   : > { %5926 = vmatprep.subr.bf16.mxu0 %v9346_v31  ;;  %v7727_v31 = vld [vmem:[#allocation11 + $0x8] ss:$12 sps:$4 sm:$0xff]  }
 0xe93   : > { %7288 = vmatpush3.bf16.msra.mxu1 %v7722_v5 }
 0xe94   : > { %7289 = vmatprep.subr.bf16.mxu1 %v9606_v23 }
 0xe95   : > { %5927 = vmatpush1.bf16.msra.mxu0 %v9349_v60 }
 0xe96   : > { %5928 = vmatprep.subr.bf16.mxu0 %v9353_v47 }
 0xe97   : > { %7290 = vmatpush3.bf16.msra.mxu1 %v7723_v56  ;;  %v9614_v56 = vld [vmem:[#allocation21_spill] sm:$0xff] }
 0xe98   : > { %7291 = vmatprep.subr.bf16.mxu1 %v9606_v23 }
 0xe99   : > { %5929 = vmatpush1.bf16.msra.mxu0 %v9356_v44  ;;  %v3767_v44 = vadd.f32 %v9192_v15, %v9211_v58 }
 0xe9a   : > { %5930 = vmatprep.subr.bf16.mxu0 %v9360_v17 }
 0xe9b   : > { %7292 = vmatpush3.bf16.msra.mxu1 %v7724_v22 }
 0xe9c   : > { %7293 = vmatprep.subr.bf16.mxu1 %v9606_v23 }
 0xe9d   : > { %5931 = vmatpush1.bf16.msra.mxu0 %v9363_v57 }
 0xe9e   : > { %5932 = vmatprep.subr.bf16.mxu0 %v9367_v35 }
 0xe9f   : > { %7294 = vmatpush3.bf16.msra.mxu1 %v7725_v28 }
 0xea0   : > { %7295 = vmatprep.subr.bf16.mxu1 %v9606_v23 }
 0xea1   : > { %5933 = vmatpush1.bf16.msra.mxu0 %v9370_v37 }
 0xea2   : > { %5934 = vmatprep.subr.bf16.mxu0 %v9374_v6 }
 0xea3   : > { %7296 = vmatpush3.bf16.msra.mxu1 %v7726_v21 }
 0xea4   : > { %7297 = vmatprep.subr.bf16.mxu1 %v9606_v23  ;;  %v3769_v23 = vadd.f32 %v9199_v12, %v9226_v55 }
 0xea5   : > { %5935 = vmatpush1.bf16.msra.mxu0 %v9377_v34 }
 0xea7   : > { %7298 = vmatpush3.bf16.msra.mxu1 %v7727_v31 }
 0xf48   : > { %v5686_v60 = vpop.f32.mrf.mxu0  ;;  %v5727_v47 = vpop.f32.mrf.mxu1 }
 0xf49   : > { %v5687_v17 = vadd.f32 %v5686_v60, %v9214_v45  ;;  %v5728_v62 = vadd.f32 %v5727_v47, %v9231_v13 }
 0xf4a   : > { %v5688_v57 = vpop.f32.mrf.mxu0  ;;  %v7281_v35 = vpop.f32.mrf.mxu1 }
 0xf4b   : > { %v5736_v37 = vadd.f32 %v5687_v17, %v3767_v44  ;;  %v5689_v11 = vadd.f32 %v5688_v57, %v9223_v49 }
 0xf4c   : > { %v5690_v6 = vpop.f32.mrf.mxu0  ;;  %v5730_v34 = vpop.f32.mrf.mxu1 }
 0xf4d   : > { %v6713_v32 = vmul.f32 -1.442695, %v5736_v37  ;;  %v5743_v39 = vadd.f32 %v5689_v11, %v3769_v23 }
 0xf4e   : > { %v5691_v51 = vpop.f32.mrf.mxu0  ;;  %v7282_v2 = vpop.f32.mrf.mxu1 }
 0xf4f   : > { %7868 = vpow2.f32 %v6713_v32  ;;  %v6714_v63 = vmul.f32 -1.442695, %v5743_v39 }
 0xf51   : > { %7870 = vpow2.f32 %v6714_v63 }
 0xf5c   : > { %v7869_v15 = vpop.eup %7868 }
 0xf5d   : > { %v5740_v40 = vadd.f32 1.0, %v7869_v15 }
 0xf5e   : > { %v7871_v19 = vpop.eup %7870 }
 0xf5f   : > { %7872 = vrcp.f32 %v5740_v40  ;;  %v5747_v38 = vadd.f32 1.0, %v7871_v19 }
 0xf61   : > { %7874 = vrcp.f32 %v5747_v38 }
 0xf6c   : > { %v7873_v10 = vpop.eup %7872 }
 0xf6d   : > { %v5750_v53 = vmul.f32 %v7873_v10, %v5728_v62 }
 0xf6e   : > { %v7875_v12 = vpop.eup %7874 }
 0xf6f   : > { %v5751_v3 = vadd.f32 %v5750_v53, %v3834_v7  ;;  %v5753_v18 = vsub.f32 1.0, %v7875_v12  ;;  %v5755_v43 = vmul.f32 %v7875_v12, %v9476_v0 }
 0xf71   : > { %7876 = vtanh.f32 %v5751_v3 }
 0xf7e   : > { %v7877_v36 = vpop.eup %7876 }
 0xf7f   : > { %v5754_v4 = vmul.f32 %v7877_v36, %v5753_v18 }
 0xf81   : > { %v5756_v1 = vadd.f32 %v5755_v43, %v5754_v4 }
 0xf83   : > { %v5759_v41 = vpack.c.bf16 %v5756_v1, %v5756_v1 }
 0xf85   : > { %5953 = vmatmul.mubr.bf16.vlgmr.msra.gmra.mxu0 %v5759_v41  ;;  %7300 = vmatmul.mubr.bf16.vlgmr.msra.gmra.mxu1 %v5759_v41 }
0x1045   : > { %v5954_v46 = vpop.f32.mrf.mxu0  ;;  %v5995_v30 = vpop.f32.mrf.mxu1 }
0x1046   : > { %v5955_v24 = vadd.f32 %v5954_v46, %v9214_v45  ;;  %v5996_v29 = vadd.f32 %v5995_v30, %v9231_v13 }
0x1047   : > { %v5956_v14 = vpop.f32.mrf.mxu0  ;;  %v7301_v25 = vpop.f32.mrf.mxu1 }
0x1048   : > { %v6004_v16 = vadd.f32 %v5955_v24, %v3771_v9  ;;  %v5957_v42 = vadd.f32 %v5956_v14, %v9223_v49  ;;  %v3837_v49 = vadd.f32 %v9614_v56, %v9235_v33 }
0x1049   : > { %v5958_v26 = vpop.f32.mrf.mxu0  ;;  %v5998_v61 = vpop.f32.mrf.mxu1 }
0x104a   : > { %v6739_v52 = vmul.f32 -1.442695, %v6004_v16  ;;  %v6011_v0 = vadd.f32 %v5957_v42, %v3773_v20 }
0x104b   : > { %v5959_v50 = vpop.f32.mrf.mxu0  ;;  %v7302_v54 = vpop.f32.mrf.mxu1 }
0x104c   : > { %7878 = vpow2.f32 %v6739_v52  ;;  %v6740_v59 = vmul.f32 -1.442695, %v6011_v0 }
0x104e   : > { %7880 = vpow2.f32 %v6740_v59 }
0x1059   : > { %v7879_v48 = vpop.eup %7878 }
0x105a   : > { %v6008_v58 = vadd.f32 1.0, %v7879_v48 }
0x105b   : > { %v7881_v45 = vpop.eup %7880 }
0x105c   : > { %7882 = vrcp.f32 %v6008_v58  ;;  %v6015_v27 = vadd.f32 1.0, %v7881_v45 }
0x105e   : > { %7884 = vrcp.f32 %v6015_v27 }
0x1069   : > { %v7883_v5 = vpop.eup %7882 }
0x106a   : > { %v6018_v22 = vmul.f32 %v7883_v5, %v5996_v29 }
0x106b   : > { %v7885_v55 = vpop.eup %7884 }
0x106c   : > { %v6019_v28 = vadd.f32 %v6018_v22, %v3837_v49  ;;  %v6021_v21 = vsub.f32 1.0, %v7885_v55  ;;  %v6023_v47 = vmul.f32 %v7885_v55, %v5756_v1 }
0x106e   : > { %7886 = vtanh.f32 %v6019_v28 }
0x107b   : > { %v7887_v31 = vpop.eup %7886 }
0x107c   : > { %v6022_v60 = vmul.f32 %v7887_v31, %v6021_v21  ;;  %6029 = sbr.rel (%p6741_p7) target bundleno = 4457 (0x1169), region = 129 }
0x107e   : > { %v6024_v44 = vadd.f32 %v6023_v47, %v6022_v60 }
0x1080   : > { %6025 = vst [vmem:[#allocation4 + $0x8] sm:$0xff] %v6024_v44 }
0x1081   : > { %v7904_v13 = vld [vmem:[%s9579_s9 + $0x38] sm:$0xff]   ;;  %v8078_v17 = vmov 0.0   ;;  %v7905_v33 = vld [vmem:[%s9579_s9 + $0x30] sm:$0xff]   ;;  %vm8079_vm8 = vmmov 0   ;;  %v7906_v57 = vld [vmem:[%s9579_s9 + $0x28] sm:$0xff]   ;;  %vm6143_vm9 = vcmask 31744  }
0x1082   : > { %7303 = vmatprep.subr.bf16.mxu0 %v8078_v17  ;;  %7319 = vmatprep.mubr.msk.bf16.mxu0 %vm8079_vm8, %v8078_v17  ;;  %v7907_v35 = vld [vmem:[%s9579_s9 + $0x20] sm:$0xff]   ;;  %v7908_v37 = vld [vmem:[%s9579_s9 + $0x18] sm:$0xff]   ;;  %v7909_v6 = vld [vmem:[%s9579_s9 + $0x10] sm:$0xff]  }
0x1083   : > { %7304 = vmatpush3.bf16.msra.mxu0 %v7904_v13  ;;  %v7910_v34 = vld [vmem:[%s9579_s9 + $0x8] sm:$0xff]   ;;  %v7911_v32 = vld [vmem:[%s9579_s9] sm:$0xff]  }
0x1084   : > { %7305 = vmatprep.subr.bf16.mxu0 %v8078_v17  ;;  %v6742_v2 = vld [vmem:[%s9580_s10] ss:$0 sm:$0xff] }
0x1087   : > { %7306 = vmatpush3.bf16.msra.mxu0 %v7905_v33  ;;  %v6030_v11 = vld [vmem:[#allocation4 + $0x8] sm:$0xff] }
0x1088   : > { %7307 = vmatprep.subr.bf16.mxu0 %v8078_v17  ;;  %v6031_v51 = vpack.c.bf16 %v6030_v11, %v6030_v11 }
0x108b   : > { %7308 = vmatpush3.bf16.msra.mxu0 %v7906_v57 }
0x108c   : > { %7309 = vmatprep.subr.bf16.mxu0 %v8078_v17 }
0x108f   : > { %7310 = vmatpush3.bf16.msra.mxu0 %v7907_v35 }
0x1090   : > { %7311 = vmatprep.subr.bf16.mxu0 %v8078_v17 }
0x1093   : > { %7312 = vmatpush3.bf16.msra.mxu0 %v7908_v37 }
0x1094   : > { %7313 = vmatprep.subr.bf16.mxu0 %v8078_v17 }
0x1097   : > { %7314 = vmatpush3.bf16.msra.mxu0 %v7909_v6 }
0x1098   : > { %7315 = vmatprep.subr.bf16.mxu0 %v8078_v17 }
0x109b   : > { %7316 = vmatpush3.bf16.msra.mxu0 %v7910_v34 }
0x109c   : > { %7317 = vmatprep.subr.bf16.mxu0 %v8078_v17 }
0x109f   : > { %7318 = vmatpush3.bf16.msra.mxu0 %v7911_v32 }
0x10a2   : > { %7320 = vmatmul.mubr.bf16.vlgmr.msra.gmra.mxu0 %v6031_v51 }
0x1162   : > { %v6137_v23 = vpop.f32.mrf.mxu0 }
0x1163   : > { %v6138_v39 = vadd.f32 %v6742_v2, %v6137_v23 }
0x1164   : > { %v7321_v63 = vpop.f32.mrf.mxu0 }
0x1165   : > { %6144 = vst.msk [vmem:[%s9581_s11] sm:$0xff] %vm6143_vm9, %v6138_v39 }
0x1166   : > { %v6140_v15 = vpop.f32.mrf.mxu0 }
0x1168   : > { %v7322_v40 = vpop.f32.mrf.mxu0 }
0x1169 PF: > { %s24_s21 = sadd.s32 1, %s8066_s21   ;;  %s9615_s30 = sld [smem:[#allocation17_spill]] }
0x116a   : > { %p21_p8 = scmp.ge.s32.totalorder %s24_s21, 4   ;;  %s9616_s13 = sld [smem:[#allocation16_spill]] }
0x116b   : > { %s9617_s17 = smov %s8054_s18  ;;  %s9619_s19 = smov %s8062_s20 }
0x116c   :  { %23 = sbr.rel (!%p21_p8) target bundleno = 7 (0x7), region = 180 }
0x116f   : > { %s9618_s18 = smov %s9615_s30 }
0x1170   : > { %s9620_s20 = smov %s9616_s13 }
0x1171   :  { %6164 = vsyncpa [#allocation7], 1 }
0x1172   :  { %6166 = vsyncpa [#allocation7 + $0x1], 1 }
0x1173   :  { %6167 = vsyncpa [#allocation9], 1 }
0x1174   :  { %6168 = vsyncpa [#allocation12], 1 }

</bundles_post_ra>
